<compile_context>
chip_gen: v7x
topology: tpu7x:2x2x1
jax: 0.10.0
libtpu: 0.0.40
codegen_flags: <defaults>
</compile_context>

<pallas_src>
import numpy as np
import jax
import jax.numpy as jnp
from jax import lax
from jax.experimental import pallas as pl
from jax.experimental.pallas import tpu as pltpu  # noqa: F401  (TPU backend)


# ---------------------------------------------------------------------------
# One-time parameter preparation (hoisted out of the per-call path).
# ---------------------------------------------------------------------------
def _build_conv1_toeplitz(conv1_w):
    """[10,1,5,5] -> T1[5, 28, 240] with T1[ky, w, j*10+c] = w[c, 0, ky, w-j]."""
    w = jnp.transpose(conv1_w[:, 0], (1, 2, 0))                 # [ky, kx, c] = [5,5,10]
    w_in, w_out, cout, k = 28, 24, 10, 5
    kx = np.arange(w_in)[:, None] - np.arange(w_out)[None, :]   # [28, 24]
    mask = (kx >= 0) & (kx < k)
    t = w[:, np.clip(kx, 0, k - 1), :]                          # [5, 28, 24, 10]
    t = t * jnp.asarray(mask, jnp.float32)[None, :, :, None]
    return t.reshape(k, w_in, w_out * cout)


def _build_conv2_toeplitz(conv2_w):
    """[20,10,5,5] -> T2[5, 120, 160] with T2[ky, jp*10+ci, j*20+co] = w[co,ci,ky,jp-j]."""
    w = jnp.transpose(conv2_w, (2, 3, 1, 0))                    # [ky, kx, ci, co]
    w_in, w_out, cin, cout, k = 12, 8, 10, 20, 5
    kx = np.arange(w_in)[:, None] - np.arange(w_out)[None, :]   # [12, 8]
    mask = (kx >= 0) & (kx < k)
    t = w[:, np.clip(kx, 0, k - 1), :, :]                       # [5, 12, 8, 10, 20]
    t = t * jnp.asarray(mask, jnp.float32)[None, :, :, None, None]
    t = jnp.transpose(t, (0, 1, 3, 2, 4))                       # [5, 12, 10, 8, 20]
    return t.reshape(k, w_in * cin, w_out * cout)


def _pool_col_selectors(n, c):
    """0/1 matrices Se/So [n*c, (n//2)*c] picking even/odd spatial columns of a
    [rows, n*c] tile whose columns are ordered (spatial, channel)."""
    e = np.zeros((n, n // 2), np.float32)
    o = np.zeros((n, n // 2), np.float32)
    e[np.arange(0, n, 2), np.arange(n // 2)] = 1.0
    o[np.arange(1, n, 2), np.arange(n // 2)] = 1.0
    eye = np.eye(c, dtype=np.float32)
    return jnp.asarray(np.kron(e, eye)), jnp.asarray(np.kron(o, eye))


def _pool_row_selectors(n):
    """0/1 matrices Re/Ro [n//2, n] picking even/odd rows."""
    e = np.zeros((n // 2, n), np.float32)
    o = np.zeros((n // 2, n), np.float32)
    e[np.arange(n // 2), np.arange(0, n, 2)] = 1.0
    o[np.arange(n // 2), np.arange(1, n, 2)] = 1.0
    return jnp.asarray(e), jnp.asarray(o)


def prepare_params(params):
    """Rearrange PyTorch-layout parameters once into kernel-ready tensors."""
    se1, so1 = _pool_col_selectors(24, 10)      # [240, 120]
    re1, ro1 = _pool_row_selectors(24)          # [12, 24]
    se2, so2 = _pool_col_selectors(8, 20)       # [160, 80]
    re2, ro2 = _pool_row_selectors(8)           # [4, 8]
    # fc1 weight permuted so the kernel consumes h2 tiles of shape
    # [4 (ip), 80 (jp*20+c)] directly in PyTorch's NCHW flatten order (c*16+ip*4+jp).
    w1p = jnp.transpose(params["fc1_w"].reshape(50, 20, 4, 4), (2, 3, 1, 0))
    w1p = w1p.reshape(4, 80, 50)
    return {
        "t1": _build_conv1_toeplitz(params["conv1_w"]),         # [5, 28, 240]
        "b1t": jnp.tile(params["conv1_b"], 24)[None, :],        # [1, 240]
        "se1": se1, "so1": so1, "re1": re1, "ro1": ro1,
        "t2": _build_conv2_toeplitz(params["conv2_w"]),         # [5, 120, 160]
        "b2t": jnp.tile(params["conv2_b"], 8)[None, :],         # [1, 160]
        "se2": se2, "so2": so2, "re2": re2, "ro2": ro2,
        "w1p": w1p,                                             # [4, 80, 50]
        "fb1": params["fc1_b"][None, :],                        # [1, 50]
        "w2fc": params["fc2_w"].T,                              # [50, 10]
        "fb2": params["fc2_b"][None, :],                        # [1, 10]
    }


# ---------------------------------------------------------------------------
# Single fused kernel for the whole forward pass.
# ---------------------------------------------------------------------------
def _net_kernel(x_ref, t1_ref, b1_ref, se1_ref, so1_ref, re1_ref, ro1_ref,
                t2_ref, b2_ref, se2_ref, so2_ref, re2_ref, ro2_ref,
                w1p_ref, fb1_ref, w2fc_ref, fb2_ref, o_ref):
    f32 = jnp.float32
    batch = x_ref.shape[0]

    def mm(a, b_):
        return jnp.dot(a, b_, preferred_element_type=f32)

    for b in range(batch):                       # tiny static batch: full unroll
        xb = x_ref[b, 0]                         # [28, 28]

        # conv1 as 5 MXU matmuls against Toeplitz weights; register accumulator.
        acc1 = mm(xb[0:24, :], t1_ref[0])
        for ky in range(1, 5):
            acc1 = acc1 + mm(xb[ky:ky + 24, :], t1_ref[ky])
        acc1 = acc1 + b1_ref[...]                # [24, 240], cols = j*10 + c

        # 2x2 max-pool via even/odd selection matmuls, then ReLU.
        pj = jnp.maximum(mm(acc1, se1_ref[...]), mm(acc1, so1_ref[...]))   # [24, 120]
        h1 = jnp.maximum(mm(re1_ref[...], pj), mm(ro1_ref[...], pj))       # [12, 120]
        h1 = jnp.maximum(h1, 0.0)

        # conv2; Dropout2d is identity in eval mode.
        # TODO(synk): training-mode Dropout2d / F.dropout (RNG) not implemented.
        acc2 = mm(h1[0:8, :], t2_ref[0])
        for ky in range(1, 5):
            acc2 = acc2 + mm(h1[ky:ky + 8, :], t2_ref[ky])
        acc2 = acc2 + b2_ref[...]                # [8, 160], cols = j*20 + c

        pj2 = jnp.maximum(mm(acc2, se2_ref[...]), mm(acc2, so2_ref[...]))  # [8, 80]
        h2 = jnp.maximum(mm(re2_ref[...], pj2), mm(ro2_ref[...], pj2))     # [4, 80]
        h2 = jnp.maximum(h2, 0.0)

        # fc1 (+ReLU): contraction blocked over the 4 pooled rows; the PyTorch
        # NCHW flatten order is baked into the prepared w1p weight.
        h3 = fb1_ref[...]                        # [1, 50]
        for r in range(4):
            h3 = h3 + mm(h2[r:r + 1, :], w1p_ref[r])
        h3 = jnp.maximum(h3, 0.0)

        # fc2 + log_softmax (dim=1).
        logits = mm(h3, w2fc_ref[...]) + fb2_ref[...]          # [1, 10]
        m = jnp.max(logits, axis=-1, keepdims=True)
        s = logits - m
        lse = jnp.log(jnp.sum(jnp.exp(s), axis=-1, keepdims=True))
        o_ref[b:b + 1, :] = s - lse


def net_forward(x, prep):
    batch = x.shape[0]
    return pl.pallas_call(
        _net_kernel,
        out_shape=jax.ShapeDtypeStruct((batch, 10), jnp.float32),
    )(x.astype(jnp.float32),
      prep["t1"], prep["b1t"], prep["se1"], prep["so1"], prep["re1"], prep["ro1"],
      prep["t2"], prep["b2t"], prep["se2"], prep["so2"], prep["re2"], prep["ro2"],
      prep["w1p"], prep["fb1"], prep["w2fc"], prep["fb2"])


# ---------------------------------------------------------------------------
# Pure-JAX reference (for verification) and deterministic parameter init.
# ---------------------------------------------------------------------------
def reference_forward(x, p):
    hp = lax.Precision.HIGHEST
    y = lax.conv_general_dilated(
        x, p["conv1_w"], (1, 1), "VALID",
        dimension_numbers=("NCHW", "OIHW", "NCHW"), precision=hp,
    ) + p["conv1_b"][None, :, None, None]
    B, C, H, W = y.shape
    y = jax.nn.relu(y.reshape(B, C, H // 2, 2, W // 2, 2).max(axis=(3, 5)))
    y = lax.conv_general_dilated(
        y, p["conv2_w"], (1, 1), "VALID",
        dimension_numbers=("NCHW", "OIHW", "NCHW"), precision=hp,
    ) + p["conv2_b"][None, :, None, None]
    B, C, H, W = y.shape
    y = jax.nn.relu(y.reshape(B, C, H // 2, 2, W // 2, 2).max(axis=(3, 5)))
    flat = y.reshape(B, -1)
    h = jax.nn.relu(jnp.dot(flat, p["fc1_w"].T, precision=hp) + p["fc1_b"])
    logits = jnp.dot(h, p["fc2_w"].T, precision=hp) + p["fc2_b"]
    return jax.nn.log_softmax(logits, axis=1)


def init_params(key):
    ks = jax.random.split(key, 8)

    def u(k, shape, fan_in):
        bound = 1.0 / jnp.sqrt(jnp.float32(fan_in))
        return jax.random.uniform(k, shape, jnp.float32, -bound, bound)

    return {
        "conv1_w": u(ks[0], (10, 1, 5, 5), 1 * 5 * 5),
        "conv1_b": u(ks[1], (10,), 1 * 5 * 5),
        "conv2_w": u(ks[2], (20, 10, 5, 5), 10 * 5 * 5),
        "conv2_b": u(ks[3], (20,), 10 * 5 * 5),
        "fc1_w": u(ks[4], (50, 320), 320),
        "fc1_b": u(ks[5], (50,), 320),
        "fc2_w": u(ks[6], (10, 50), 50),
        "fc2_b": u(ks[7], (10,), 50),
    }


if __name__ == "__main__":
    root = jax.random.PRNGKey(0)
    pkey, xkey = jax.random.split(root)
    params = init_params(pkey)
    # 28x28 spatial size is required by the architecture (fc1 expects 320 = 20*4*4).
    x = jax.random.normal(xkey, (2, 1, 28, 28), dtype=jnp.float32)

    prep = prepare_params(params)          # one-time weight rearrangement
    fwd = jax.jit(net_forward)
    out = jax.block_until_ready(fwd(x, prep))

    ref = jax.block_until_ready(reference_forward(x, params))
    max_err = float(jnp.max(jnp.abs(out - ref)))
    assert out.shape == (2, 10), out.shape
    assert max_err < 1e-2, f"mismatch vs reference: max_err={max_err}"

    print("KERNEL_OK")
</pallas_src>

<mosaic_0001>
module attributes {stable_mosaic.version = 11 : i64} {
  func.func @_net_kernel(%arg0: memref<2x1x28x28xf32, #tpu.memory_space<vmem>>, %arg1: memref<5x28x240xf32, #tpu.memory_space<vmem>>, %arg2: memref<1x240xf32, #tpu.memory_space<vmem>>, %arg3: memref<240x120xf32, #tpu.memory_space<vmem>>, %arg4: memref<240x120xf32, #tpu.memory_space<vmem>>, %arg5: memref<12x24xf32, #tpu.memory_space<vmem>>, %arg6: memref<12x24xf32, #tpu.memory_space<vmem>>, %arg7: memref<5x120x160xf32, #tpu.memory_space<vmem>>, %arg8: memref<1x160xf32, #tpu.memory_space<vmem>>, %arg9: memref<160x80xf32, #tpu.memory_space<vmem>>, %arg10: memref<160x80xf32, #tpu.memory_space<vmem>>, %arg11: memref<4x8xf32, #tpu.memory_space<vmem>>, %arg12: memref<4x8xf32, #tpu.memory_space<vmem>>, %arg13: memref<4x80x50xf32, #tpu.memory_space<vmem>>, %arg14: memref<1x50xf32, #tpu.memory_space<vmem>>, %arg15: memref<50x10xf32, #tpu.memory_space<vmem>>, %arg16: memref<1x10xf32, #tpu.memory_space<vmem>>, %arg17: memref<2x10xf32, #tpu.memory_space<vmem>>) attributes {dimension_semantics = [], scalar_prefetch = 0 : i64, scratch_operands = 0 : i64, tpu.core_type = #tpu.core_type<tc>} {
    %c0 = arith.constant 0 : index
    %c0_0 = arith.constant 0 : index
    %c0_1 = arith.constant 0 : index
    %c0_2 = arith.constant 0 : index
    %0 = vector.load %arg0[%c0, %c0_0, %c0_1, %c0_2] : memref<2x1x28x28xf32, #tpu.memory_space<vmem>>, vector<1x1x28x28xf32>
    %1 = vector.shape_cast %0 : vector<1x1x28x28xf32> to vector<28x28xf32>
    %2 = vector.extract_strided_slice %1 {offsets = [0, 0], sizes = [24, 28], strides = [1, 1]} : vector<28x28xf32> to vector<24x28xf32>
    %c0_3 = arith.constant 0 : index
    %c0_4 = arith.constant 0 : index
    %c0_5 = arith.constant 0 : index
    %3 = vector.load %arg1[%c0_3, %c0_4, %c0_5] : memref<5x28x240xf32, #tpu.memory_space<vmem>>, vector<1x28x240xf32>
    %4 = vector.shape_cast %3 : vector<1x28x240xf32> to vector<28x240xf32>
    %cst = arith.constant dense<0.000000e+00> : vector<24x240xf32>
    %5 = tpu.matmul %2, %4, %cst {dimension_numbers = #tpu.dot_dimension_numbers<[1], [0], [0], [1], [0, 0, 1, 1], [], []>} : vector<24x28xf32>, vector<28x240xf32>, vector<24x240xf32> -> vector<24x240xf32>
    %6 = vector.extract_strided_slice %1 {offsets = [1, 0], sizes = [24, 28], strides = [1, 1]} : vector<28x28xf32> to vector<24x28xf32>
    %c1 = arith.constant 1 : index
    %c0_6 = arith.constant 0 : index
    %c0_7 = arith.constant 0 : index
    %7 = vector.load %arg1[%c1, %c0_6, %c0_7] : memref<5x28x240xf32, #tpu.memory_space<vmem>>, vector<1x28x240xf32>
    %8 = vector.shape_cast %7 : vector<1x28x240xf32> to vector<28x240xf32>
    %cst_8 = arith.constant dense<0.000000e+00> : vector<24x240xf32>
    %9 = tpu.matmul %6, %8, %cst_8 {dimension_numbers = #tpu.dot_dimension_numbers<[1], [0], [0], [1], [0, 0, 1, 1], [], []>} : vector<24x28xf32>, vector<28x240xf32>, vector<24x240xf32> -> vector<24x240xf32>
    %10 = arith.addf %5, %9 : vector<24x240xf32>
    %11 = vector.extract_strided_slice %1 {offsets = [2, 0], sizes = [24, 28], strides = [1, 1]} : vector<28x28xf32> to vector<24x28xf32>
    %c2 = arith.constant 2 : index
    %c0_9 = arith.constant 0 : index
    %c0_10 = arith.constant 0 : index
    %12 = vector.load %arg1[%c2, %c0_9, %c0_10] : memref<5x28x240xf32, #tpu.memory_space<vmem>>, vector<1x28x240xf32>
    %13 = vector.shape_cast %12 : vector<1x28x240xf32> to vector<28x240xf32>
    %cst_11 = arith.constant dense<0.000000e+00> : vector<24x240xf32>
    %14 = tpu.matmul %11, %13, %cst_11 {dimension_numbers = #tpu.dot_dimension_numbers<[1], [0], [0], [1], [0, 0, 1, 1], [], []>} : vector<24x28xf32>, vector<28x240xf32>, vector<24x240xf32> -> vector<24x240xf32>
    %15 = arith.addf %10, %14 : vector<24x240xf32>
    %16 = vector.extract_strided_slice %1 {offsets = [3, 0], sizes = [24, 28], strides = [1, 1]} : vector<28x28xf32> to vector<24x28xf32>
    %c3 = arith.constant 3 : index
    %c0_12 = arith.constant 0 : index
    %c0_13 = arith.constant 0 : index
    %17 = vector.load %arg1[%c3, %c0_12, %c0_13] : memref<5x28x240xf32, #tpu.memory_space<vmem>>, vector<1x28x240xf32>
    %18 = vector.shape_cast %17 : vector<1x28x240xf32> to vector<28x240xf32>
    %cst_14 = arith.constant dense<0.000000e+00> : vector<24x240xf32>
    %19 = tpu.matmul %16, %18, %cst_14 {dimension_numbers = #tpu.dot_dimension_numbers<[1], [0], [0], [1], [0, 0, 1, 1], [], []>} : vector<24x28xf32>, vector<28x240xf32>, vector<24x240xf32> -> vector<24x240xf32>
    %20 = arith.addf %15, %19 : vector<24x240xf32>
    %21 = vector.extract_strided_slice %1 {offsets = [4, 0], sizes = [24, 28], strides = [1, 1]} : vector<28x28xf32> to vector<24x28xf32>
    %c4 = arith.constant 4 : index
    %c0_15 = arith.constant 0 : index
    %c0_16 = arith.constant 0 : index
    %22 = vector.load %arg1[%c4, %c0_15, %c0_16] : memref<5x28x240xf32, #tpu.memory_space<vmem>>, vector<1x28x240xf32>
    %23 = vector.shape_cast %22 : vector<1x28x240xf32> to vector<28x240xf32>
    %cst_17 = arith.constant dense<0.000000e+00> : vector<24x240xf32>
    %24 = tpu.matmul %21, %23, %cst_17 {dimension_numbers = #tpu.dot_dimension_numbers<[1], [0], [0], [1], [0, 0, 1, 1], [], []>} : vector<24x28xf32>, vector<28x240xf32>, vector<24x240xf32> -> vector<24x240xf32>
    %25 = arith.addf %20, %24 : vector<24x240xf32>
    %c0_18 = arith.constant 0 : index
    %c0_19 = arith.constant 0 : index
    %26 = vector.load %arg2[%c0_18, %c0_19] : memref<1x240xf32, #tpu.memory_space<vmem>>, vector<1x240xf32>
    %27 = vector.broadcast %26 : vector<1x240xf32> to vector<24x240xf32>
    %28 = arith.addf %25, %27 : vector<24x240xf32>
    %c0_20 = arith.constant 0 : index
    %c0_21 = arith.constant 0 : index
    %29 = vector.load %arg3[%c0_20, %c0_21] : memref<240x120xf32, #tpu.memory_space<vmem>>, vector<240x120xf32>
    %cst_22 = arith.constant dense<0.000000e+00> : vector<24x120xf32>
    %30 = tpu.matmul %28, %29, %cst_22 {dimension_numbers = #tpu.dot_dimension_numbers<[1], [0], [0], [1], [0, 0, 1, 1], [], []>} : vector<24x240xf32>, vector<240x120xf32>, vector<24x120xf32> -> vector<24x120xf32>
    %c0_23 = arith.constant 0 : index
    %c0_24 = arith.constant 0 : index
    %31 = vector.load %arg4[%c0_23, %c0_24] : memref<240x120xf32, #tpu.memory_space<vmem>>, vector<240x120xf32>
    %cst_25 = arith.constant dense<0.000000e+00> : vector<24x120xf32>
    %32 = tpu.matmul %28, %31, %cst_25 {dimension_numbers = #tpu.dot_dimension_numbers<[1], [0], [0], [1], [0, 0, 1, 1], [], []>} : vector<24x240xf32>, vector<240x120xf32>, vector<24x120xf32> -> vector<24x120xf32>
    %33 = arith.maximumf %30, %32 : vector<24x120xf32>
    %c0_26 = arith.constant 0 : index
    %c0_27 = arith.constant 0 : index
    %34 = vector.load %arg5[%c0_26, %c0_27] : memref<12x24xf32, #tpu.memory_space<vmem>>, vector<12x24xf32>
    %cst_28 = arith.constant dense<0.000000e+00> : vector<12x120xf32>
    %35 = tpu.matmul %34, %33, %cst_28 {dimension_numbers = #tpu.dot_dimension_numbers<[1], [0], [0], [1], [0, 0, 1, 1], [], []>} : vector<12x24xf32>, vector<24x120xf32>, vector<12x120xf32> -> vector<12x120xf32>
    %c0_29 = arith.constant 0 : index
    %c0_30 = arith.constant 0 : index
    %36 = vector.load %arg6[%c0_29, %c0_30] : memref<12x24xf32, #tpu.memory_space<vmem>>, vector<12x24xf32>
    %cst_31 = arith.constant dense<0.000000e+00> : vector<12x120xf32>
    %37 = tpu.matmul %36, %33, %cst_31 {dimension_numbers = #tpu.dot_dimension_numbers<[1], [0], [0], [1], [0, 0, 1, 1], [], []>} : vector<12x24xf32>, vector<24x120xf32>, vector<12x120xf32> -> vector<12x120xf32>
    %38 = arith.maximumf %35, %37 : vector<12x120xf32>
    %cst_32 = arith.constant 0.000000e+00 : f32
    %39 = vector.broadcast %cst_32 : f32 to vector<12x120xf32>
    %40 = arith.maximumf %38, %39 : vector<12x120xf32>
    %41 = vector.extract_strided_slice %40 {offsets = [0, 0], sizes = [8, 120], strides = [1, 1]} : vector<12x120xf32> to vector<8x120xf32>
    %c0_33 = arith.constant 0 : index
    %c0_34 = arith.constant 0 : index
    %c0_35 = arith.constant 0 : index
    %42 = vector.load %arg7[%c0_33, %c0_34, %c0_35] : memref<5x120x160xf32, #tpu.memory_space<vmem>>, vector<1x120x160xf32>
    %43 = vector.shape_cast %42 : vector<1x120x160xf32> to vector<120x160xf32>
    %cst_36 = arith.constant dense<0.000000e+00> : vector<8x160xf32>
    %44 = tpu.matmul %41, %43, %cst_36 {dimension_numbers = #tpu.dot_dimension_numbers<[1], [0], [0], [1], [0, 0, 1, 1], [], []>} : vector<8x120xf32>, vector<120x160xf32>, vector<8x160xf32> -> vector<8x160xf32>
    %45 = vector.extract_strided_slice %40 {offsets = [1, 0], sizes = [8, 120], strides = [1, 1]} : vector<12x120xf32> to vector<8x120xf32>
    %c1_37 = arith.constant 1 : index
    %c0_38 = arith.constant 0 : index
    %c0_39 = arith.constant 0 : index
    %46 = vector.load %arg7[%c1_37, %c0_38, %c0_39] : memref<5x120x160xf32, #tpu.memory_space<vmem>>, vector<1x120x160xf32>
    %47 = vector.shape_cast %46 : vector<1x120x160xf32> to vector<120x160xf32>
    %cst_40 = arith.constant dense<0.000000e+00> : vector<8x160xf32>
    %48 = tpu.matmul %45, %47, %cst_40 {dimension_numbers = #tpu.dot_dimension_numbers<[1], [0], [0], [1], [0, 0, 1, 1], [], []>} : vector<8x120xf32>, vector<120x160xf32>, vector<8x160xf32> -> vector<8x160xf32>
    %49 = arith.addf %44, %48 : vector<8x160xf32>
    %50 = vector.extract_strided_slice %40 {offsets = [2, 0], sizes = [8, 120], strides = [1, 1]} : vector<12x120xf32> to vector<8x120xf32>
    %c2_41 = arith.constant 2 : index
    %c0_42 = arith.constant 0 : index
    %c0_43 = arith.constant 0 : index
    %51 = vector.load %arg7[%c2_41, %c0_42, %c0_43] : memref<5x120x160xf32, #tpu.memory_space<vmem>>, vector<1x120x160xf32>
    %52 = vector.shape_cast %51 : vector<1x120x160xf32> to vector<120x160xf32>
    %cst_44 = arith.constant dense<0.000000e+00> : vector<8x160xf32>
    %53 = tpu.matmul %50, %52, %cst_44 {dimension_numbers = #tpu.dot_dimension_numbers<[1], [0], [0], [1], [0, 0, 1, 1], [], []>} : vector<8x120xf32>, vector<120x160xf32>, vector<8x160xf32> -> vector<8x160xf32>
    %54 = arith.addf %49, %53 : vector<8x160xf32>
    %55 = vector.extract_strided_slice %40 {offsets = [3, 0], sizes = [8, 120], strides = [1, 1]} : vector<12x120xf32> to vector<8x120xf32>
    %c3_45 = arith.constant 3 : index
    %c0_46 = arith.constant 0 : index
    %c0_47 = arith.constant 0 : index
    %56 = vector.load %arg7[%c3_45, %c0_46, %c0_47] : memref<5x120x160xf32, #tpu.memory_space<vmem>>, vector<1x120x160xf32>
    %57 = vector.shape_cast %56 : vector<1x120x160xf32> to vector<120x160xf32>
    %cst_48 = arith.constant dense<0.000000e+00> : vector<8x160xf32>
    %58 = tpu.matmul %55, %57, %cst_48 {dimension_numbers = #tpu.dot_dimension_numbers<[1], [0], [0], [1], [0, 0, 1, 1], [], []>} : vector<8x120xf32>, vector<120x160xf32>, vector<8x160xf32> -> vector<8x160xf32>
    %59 = arith.addf %54, %58 : vector<8x160xf32>
    %60 = vector.extract_strided_slice %40 {offsets = [4, 0], sizes = [8, 120], strides = [1, 1]} : vector<12x120xf32> to vector<8x120xf32>
    %c4_49 = arith.constant 4 : index
    %c0_50 = arith.constant 0 : index
    %c0_51 = arith.constant 0 : index
    %61 = vector.load %arg7[%c4_49, %c0_50, %c0_51] : memref<5x120x160xf32, #tpu.memory_space<vmem>>, vector<1x120x160xf32>
    %62 = vector.shape_cast %61 : vector<1x120x160xf32> to vector<120x160xf32>
    %cst_52 = arith.constant dense<0.000000e+00> : vector<8x160xf32>
    %63 = tpu.matmul %60, %62, %cst_52 {dimension_numbers = #tpu.dot_dimension_numbers<[1], [0], [0], [1], [0, 0, 1, 1], [], []>} : vector<8x120xf32>, vector<120x160xf32>, vector<8x160xf32> -> vector<8x160xf32>
    %64 = arith.addf %59, %63 : vector<8x160xf32>
    %c0_53 = arith.constant 0 : index
    %c0_54 = arith.constant 0 : index
    %65 = vector.load %arg8[%c0_53, %c0_54] : memref<1x160xf32, #tpu.memory_space<vmem>>, vector<1x160xf32>
    %66 = vector.broadcast %65 : vector<1x160xf32> to vector<8x160xf32>
    %67 = arith.addf %64, %66 : vector<8x160xf32>
    %c0_55 = arith.constant 0 : index
    %c0_56 = arith.constant 0 : index
    %68 = vector.load %arg9[%c0_55, %c0_56] : memref<160x80xf32, #tpu.memory_space<vmem>>, vector<160x80xf32>
    %cst_57 = arith.constant dense<0.000000e+00> : vector<8x80xf32>
    %69 = tpu.matmul %67, %68, %cst_57 {dimension_numbers = #tpu.dot_dimension_numbers<[1], [0], [0], [1], [0, 0, 1, 1], [], []>} : vector<8x160xf32>, vector<160x80xf32>, vector<8x80xf32> -> vector<8x80xf32>
    %c0_58 = arith.constant 0 : index
    %c0_59 = arith.constant 0 : index
    %70 = vector.load %arg10[%c0_58, %c0_59] : memref<160x80xf32, #tpu.memory_space<vmem>>, vector<160x80xf32>
    %cst_60 = arith.constant dense<0.000000e+00> : vector<8x80xf32>
    %71 = tpu.matmul %67, %70, %cst_60 {dimension_numbers = #tpu.dot_dimension_numbers<[1], [0], [0], [1], [0, 0, 1, 1], [], []>} : vector<8x160xf32>, vector<160x80xf32>, vector<8x80xf32> -> vector<8x80xf32>
    %72 = arith.maximumf %69, %71 : vector<8x80xf32>
    %c0_61 = arith.constant 0 : index
    %c0_62 = arith.constant 0 : index
    %73 = vector.load %arg11[%c0_61, %c0_62] : memref<4x8xf32, #tpu.memory_space<vmem>>, vector<4x8xf32>
    %cst_63 = arith.constant dense<0.000000e+00> : vector<4x80xf32>
    %74 = tpu.matmul %73, %72, %cst_63 {dimension_numbers = #tpu.dot_dimension_numbers<[1], [0], [0], [1], [0, 0, 1, 1], [], []>} : vector<4x8xf32>, vector<8x80xf32>, vector<4x80xf32> -> vector<4x80xf32>
    %c0_64 = arith.constant 0 : index
    %c0_65 = arith.constant 0 : index
    %75 = vector.load %arg12[%c0_64, %c0_65] : memref<4x8xf32, #tpu.memory_space<vmem>>, vector<4x8xf32>
    %cst_66 = arith.constant dense<0.000000e+00> : vector<4x80xf32>
    %76 = tpu.matmul %75, %72, %cst_66 {dimension_numbers = #tpu.dot_dimension_numbers<[1], [0], [0], [1], [0, 0, 1, 1], [], []>} : vector<4x8xf32>, vector<8x80xf32>, vector<4x80xf32> -> vector<4x80xf32>
    %77 = arith.maximumf %74, %76 : vector<4x80xf32>
    %cst_67 = arith.constant 0.000000e+00 : f32
    %78 = vector.broadcast %cst_67 : f32 to vector<4x80xf32>
    %79 = arith.maximumf %77, %78 : vector<4x80xf32>
    %c0_68 = arith.constant 0 : index
    %c0_69 = arith.constant 0 : index
    %80 = vector.load %arg14[%c0_68, %c0_69] : memref<1x50xf32, #tpu.memory_space<vmem>>, vector<1x50xf32>
    %81 = vector.extract_strided_slice %79 {offsets = [0, 0], sizes = [1, 80], strides = [1, 1]} : vector<4x80xf32> to vector<1x80xf32>
    %c0_70 = arith.constant 0 : index
    %c0_71 = arith.constant 0 : index
    %c0_72 = arith.constant 0 : index
    %82 = vector.load %arg13[%c0_70, %c0_71, %c0_72] : memref<4x80x50xf32, #tpu.memory_space<vmem>>, vector<1x80x50xf32>
    %83 = vector.shape_cast %82 : vector<1x80x50xf32> to vector<80x50xf32>
    %cst_73 = arith.constant dense<0.000000e+00> : vector<1x50xf32>
    %84 = tpu.matmul %81, %83, %cst_73 {dimension_numbers = #tpu.dot_dimension_numbers<[1], [0], [0], [1], [0, 0, 1, 1], [], []>} : vector<1x80xf32>, vector<80x50xf32>, vector<1x50xf32> -> vector<1x50xf32>
    %85 = arith.addf %80, %84 : vector<1x50xf32>
    %86 = vector.extract_strided_slice %79 {offsets = [1, 0], sizes = [1, 80], strides = [1, 1]} : vector<4x80xf32> to vector<1x80xf32>
    %c1_74 = arith.constant 1 : index
    %c0_75 = arith.constant 0 : index
    %c0_76 = arith.constant 0 : index
    %87 = vector.load %arg13[%c1_74, %c0_75, %c0_76] : memref<4x80x50xf32, #tpu.memory_space<vmem>>, vector<1x80x50xf32>
    %88 = vector.shape_cast %87 : vector<1x80x50xf32> to vector<80x50xf32>
    %cst_77 = arith.constant dense<0.000000e+00> : vector<1x50xf32>
    %89 = tpu.matmul %86, %88, %cst_77 {dimension_numbers = #tpu.dot_dimension_numbers<[1], [0], [0], [1], [0, 0, 1, 1], [], []>} : vector<1x80xf32>, vector<80x50xf32>, vector<1x50xf32> -> vector<1x50xf32>
    %90 = arith.addf %85, %89 : vector<1x50xf32>
    %91 = vector.extract_strided_slice %79 {offsets = [2, 0], sizes = [1, 80], strides = [1, 1]} : vector<4x80xf32> to vector<1x80xf32>
    %c2_78 = arith.constant 2 : index
    %c0_79 = arith.constant 0 : index
    %c0_80 = arith.constant 0 : index
    %92 = vector.load %arg13[%c2_78, %c0_79, %c0_80] : memref<4x80x50xf32, #tpu.memory_space<vmem>>, vector<1x80x50xf32>
    %93 = vector.shape_cast %92 : vector<1x80x50xf32> to vector<80x50xf32>
    %cst_81 = arith.constant dense<0.000000e+00> : vector<1x50xf32>
    %94 = tpu.matmul %91, %93, %cst_81 {dimension_numbers = #tpu.dot_dimension_numbers<[1], [0], [0], [1], [0, 0, 1, 1], [], []>} : vector<1x80xf32>, vector<80x50xf32>, vector<1x50xf32> -> vector<1x50xf32>
    %95 = arith.addf %90, %94 : vector<1x50xf32>
    %96 = vector.extract_strided_slice %79 {offsets = [3, 0], sizes = [1, 80], strides = [1, 1]} : vector<4x80xf32> to vector<1x80xf32>
    %c3_82 = arith.constant 3 : index
    %c0_83 = arith.constant 0 : index
    %c0_84 = arith.constant 0 : index
    %97 = vector.load %arg13[%c3_82, %c0_83, %c0_84] : memref<4x80x50xf32, #tpu.memory_space<vmem>>, vector<1x80x50xf32>
    %98 = vector.shape_cast %97 : vector<1x80x50xf32> to vector<80x50xf32>
    %cst_85 = arith.constant dense<0.000000e+00> : vector<1x50xf32>
    %99 = tpu.matmul %96, %98, %cst_85 {dimension_numbers = #tpu.dot_dimension_numbers<[1], [0], [0], [1], [0, 0, 1, 1], [], []>} : vector<1x80xf32>, vector<80x50xf32>, vector<1x50xf32> -> vector<1x50xf32>
    %100 = arith.addf %95, %99 : vector<1x50xf32>
    %cst_86 = arith.constant 0.000000e+00 : f32
    %101 = vector.broadcast %cst_86 : f32 to vector<1x50xf32>
    %102 = arith.maximumf %100, %101 : vector<1x50xf32>
    %c0_87 = arith.constant 0 : index
    %c0_88 = arith.constant 0 : index
    %103 = vector.load %arg15[%c0_87, %c0_88] : memref<50x10xf32, #tpu.memory_space<vmem>>, vector<50x10xf32>
    %cst_89 = arith.constant dense<0.000000e+00> : vector<1x10xf32>
    %104 = tpu.matmul %102, %103, %cst_89 {dimension_numbers = #tpu.dot_dimension_numbers<[1], [0], [0], [1], [0, 0, 1, 1], [], []>} : vector<1x50xf32>, vector<50x10xf32>, vector<1x10xf32> -> vector<1x10xf32>
    %c0_90 = arith.constant 0 : index
    %c0_91 = arith.constant 0 : index
    %105 = vector.load %arg16[%c0_90, %c0_91] : memref<1x10xf32, #tpu.memory_space<vmem>>, vector<1x10xf32>
    %106 = arith.addf %104, %105 : vector<1x10xf32>
    %cst_92 = arith.constant dense<0xFF800000> : vector<1xf32>
    %107 = vector.multi_reduction <maximumf>, %106, %cst_92 [1] : vector<1x10xf32> to vector<1xf32>
    %108 = vector.shape_cast %107 : vector<1xf32> to vector<1x1xf32>
    %109 = vector.broadcast %108 : vector<1x1xf32> to vector<1x10xf32>
    %110 = arith.subf %106, %109 : vector<1x10xf32>
    %111 = math.exp %110 : vector<1x10xf32>
    %cst_93 = arith.constant dense<0.000000e+00> : vector<1xf32>
    %112 = vector.multi_reduction <add>, %111, %cst_93 [1] : vector<1x10xf32> to vector<1xf32>
    %113 = vector.shape_cast %112 : vector<1xf32> to vector<1x1xf32>
    %114 = math.log %113 : vector<1x1xf32>
    %115 = vector.broadcast %114 : vector<1x1xf32> to vector<1x10xf32>
    %116 = arith.subf %110, %115 : vector<1x10xf32>
    %c0_94 = arith.constant 0 : index
    %c0_95 = arith.constant 0 : index
    %117 = vector.load %arg17[%c0_94, %c0_95] : memref<2x10xf32, #tpu.memory_space<vmem>>, vector<1x10xf32>
    tpu.vector_store %arg17[%c0_94, %c0_95], %116 {strides = array<i32>} : memref<2x10xf32, #tpu.memory_space<vmem>>, vector<1x10xf32>,
    %c1_96 = arith.constant 1 : index
    %c0_97 = arith.constant 0 : index
    %c0_98 = arith.constant 0 : index
    %c0_99 = arith.constant 0 : index
    %118 = vector.load %arg0[%c1_96, %c0_97, %c0_98, %c0_99] : memref<2x1x28x28xf32, #tpu.memory_space<vmem>>, vector<1x1x28x28xf32>
    %119 = vector.shape_cast %118 : vector<1x1x28x28xf32> to vector<28x28xf32>
    %120 = vector.extract_strided_slice %119 {offsets = [0, 0], sizes = [24, 28], strides = [1, 1]} : vector<28x28xf32> to vector<24x28xf32>
    %c0_100 = arith.constant 0 : index
    %c0_101 = arith.constant 0 : index
    %c0_102 = arith.constant 0 : index
    %121 = vector.load %arg1[%c0_100, %c0_101, %c0_102] : memref<5x28x240xf32, #tpu.memory_space<vmem>>, vector<1x28x240xf32>
    %122 = vector.shape_cast %121 : vector<1x28x240xf32> to vector<28x240xf32>
    %cst_103 = arith.constant dense<0.000000e+00> : vector<24x240xf32>
    %123 = tpu.matmul %120, %122, %cst_103 {dimension_numbers = #tpu.dot_dimension_numbers<[1], [0], [0], [1], [0, 0, 1, 1], [], []>} : vector<24x28xf32>, vector<28x240xf32>, vector<24x240xf32> -> vector<24x240xf32>
    %124 = vector.extract_strided_slice %119 {offsets = [1, 0], sizes = [24, 28], strides = [1, 1]} : vector<28x28xf32> to vector<24x28xf32>
    %c1_104 = arith.constant 1 : index
    %c0_105 = arith.constant 0 : index
    %c0_106 = arith.constant 0 : index
    %125 = vector.load %arg1[%c1_104, %c0_105, %c0_106] : memref<5x28x240xf32, #tpu.memory_space<vmem>>, vector<1x28x240xf32>
    %126 = vector.shape_cast %125 : vector<1x28x240xf32> to vector<28x240xf32>
    %cst_107 = arith.constant dense<0.000000e+00> : vector<24x240xf32>
    %127 = tpu.matmul %124, %126, %cst_107 {dimension_numbers = #tpu.dot_dimension_numbers<[1], [0], [0], [1], [0, 0, 1, 1], [], []>} : vector<24x28xf32>, vector<28x240xf32>, vector<24x240xf32> -> vector<24x240xf32>
    %128 = arith.addf %123, %127 : vector<24x240xf32>
    %129 = vector.extract_strided_slice %119 {offsets = [2, 0], sizes = [24, 28], strides = [1, 1]} : vector<28x28xf32> to vector<24x28xf32>
    %c2_108 = arith.constant 2 : index
    %c0_109 = arith.constant 0 : index
    %c0_110 = arith.constant 0 : index
    %130 = vector.load %arg1[%c2_108, %c0_109, %c0_110] : memref<5x28x240xf32, #tpu.memory_space<vmem>>, vector<1x28x240xf32>
    %131 = vector.shape_cast %130 : vector<1x28x240xf32> to vector<28x240xf32>
    %cst_111 = arith.constant dense<0.000000e+00> : vector<24x240xf32>
    %132 = tpu.matmul %129, %131, %cst_111 {dimension_numbers = #tpu.dot_dimension_numbers<[1], [0], [0], [1], [0, 0, 1, 1], [], []>} : vector<24x28xf32>, vector<28x240xf32>, vector<24x240xf32> -> vector<24x240xf32>
    %133 = arith.addf %128, %132 : vector<24x240xf32>
    %134 = vector.extract_strided_slice %119 {offsets = [3, 0], sizes = [24, 28], strides = [1, 1]} : vector<28x28xf32> to vector<24x28xf32>
    %c3_112 = arith.constant 3 : index
    %c0_113 = arith.constant 0 : index
    %c0_114 = arith.constant 0 : index
    %135 = vector.load %arg1[%c3_112, %c0_113, %c0_114] : memref<5x28x240xf32, #tpu.memory_space<vmem>>, vector<1x28x240xf32>
    %136 = vector.shape_cast %135 : vector<1x28x240xf32> to vector<28x240xf32>
    %cst_115 = arith.constant dense<0.000000e+00> : vector<24x240xf32>
    %137 = tpu.matmul %134, %136, %cst_115 {dimension_numbers = #tpu.dot_dimension_numbers<[1], [0], [0], [1], [0, 0, 1, 1], [], []>} : vector<24x28xf32>, vector<28x240xf32>, vector<24x240xf32> -> vector<24x240xf32>
    %138 = arith.addf %133, %137 : vector<24x240xf32>
    %139 = vector.extract_strided_slice %119 {offsets = [4, 0], sizes = [24, 28], strides = [1, 1]} : vector<28x28xf32> to vector<24x28xf32>
    %c4_116 = arith.constant 4 : index
    %c0_117 = arith.constant 0 : index
    %c0_118 = arith.constant 0 : index
    %140 = vector.load %arg1[%c4_116, %c0_117, %c0_118] : memref<5x28x240xf32, #tpu.memory_space<vmem>>, vector<1x28x240xf32>
    %141 = vector.shape_cast %140 : vector<1x28x240xf32> to vector<28x240xf32>
    %cst_119 = arith.constant dense<0.000000e+00> : vector<24x240xf32>
    %142 = tpu.matmul %139, %141, %cst_119 {dimension_numbers = #tpu.dot_dimension_numbers<[1], [0], [0], [1], [0, 0, 1, 1], [], []>} : vector<24x28xf32>, vector<28x240xf32>, vector<24x240xf32> -> vector<24x240xf32>
    %143 = arith.addf %138, %142 : vector<24x240xf32>
    %c0_120 = arith.constant 0 : index
    %c0_121 = arith.constant 0 : index
    %144 = vector.load %arg2[%c0_120, %c0_121] : memref<1x240xf32, #tpu.memory_space<vmem>>, vector<1x240xf32>
    %145 = vector.broadcast %144 : vector<1x240xf32> to vector<24x240xf32>
    %146 = arith.addf %143, %145 : vector<24x240xf32>
    %c0_122 = arith.constant 0 : index
    %c0_123 = arith.constant 0 : index
    %147 = vector.load %arg3[%c0_122, %c0_123] : memref<240x120xf32, #tpu.memory_space<vmem>>, vector<240x120xf32>
    %cst_124 = arith.constant dense<0.000000e+00> : vector<24x120xf32>
    %148 = tpu.matmul %146, %147, %cst_124 {dimension_numbers = #tpu.dot_dimension_numbers<[1], [0], [0], [1], [0, 0, 1, 1], [], []>} : vector<24x240xf32>, vector<240x120xf32>, vector<24x120xf32> -> vector<24x120xf32>
    %c0_125 = arith.constant 0 : index
    %c0_126 = arith.constant 0 : index
    %149 = vector.load %arg4[%c0_125, %c0_126] : memref<240x120xf32, #tpu.memory_space<vmem>>, vector<240x120xf32>
    %cst_127 = arith.constant dense<0.000000e+00> : vector<24x120xf32>
    %150 = tpu.matmul %146, %149, %cst_127 {dimension_numbers = #tpu.dot_dimension_numbers<[1], [0], [0], [1], [0, 0, 1, 1], [], []>} : vector<24x240xf32>, vector<240x120xf32>, vector<24x120xf32> -> vector<24x120xf32>
    %151 = arith.maximumf %148, %150 : vector<24x120xf32>
    %c0_128 = arith.constant 0 : index
    %c0_129 = arith.constant 0 : index
    %152 = vector.load %arg5[%c0_128, %c0_129] : memref<12x24xf32, #tpu.memory_space<vmem>>, vector<12x24xf32>
    %cst_130 = arith.constant dense<0.000000e+00> : vector<12x120xf32>
    %153 = tpu.matmul %152, %151, %cst_130 {dimension_numbers = #tpu.dot_dimension_numbers<[1], [0], [0], [1], [0, 0, 1, 1], [], []>} : vector<12x24xf32>, vector<24x120xf32>, vector<12x120xf32> -> vector<12x120xf32>
    %c0_131 = arith.constant 0 : index
    %c0_132 = arith.constant 0 : index
    %154 = vector.load %arg6[%c0_131, %c0_132] : memref<12x24xf32, #tpu.memory_space<vmem>>, vector<12x24xf32>
    %cst_133 = arith.constant dense<0.000000e+00> : vector<12x120xf32>
    %155 = tpu.matmul %154, %151, %cst_133 {dimension_numbers = #tpu.dot_dimension_numbers<[1], [0], [0], [1], [0, 0, 1, 1], [], []>} : vector<12x24xf32>, vector<24x120xf32>, vector<12x120xf32> -> vector<12x120xf32>
    %156 = arith.maximumf %153, %155 : vector<12x120xf32>
    %cst_134 = arith.constant 0.000000e+00 : f32
    %157 = vector.broadcast %cst_134 : f32 to vector<12x120xf32>
    %158 = arith.maximumf %156, %157 : vector<12x120xf32>
    %159 = vector.extract_strided_slice %158 {offsets = [0, 0], sizes = [8, 120], strides = [1, 1]} : vector<12x120xf32> to vector<8x120xf32>
    %c0_135 = arith.constant 0 : index
    %c0_136 = arith.constant 0 : index
    %c0_137 = arith.constant 0 : index
    %160 = vector.load %arg7[%c0_135, %c0_136, %c0_137] : memref<5x120x160xf32, #tpu.memory_space<vmem>>, vector<1x120x160xf32>
    %161 = vector.shape_cast %160 : vector<1x120x160xf32> to vector<120x160xf32>
    %cst_138 = arith.constant dense<0.000000e+00> : vector<8x160xf32>
    %162 = tpu.matmul %159, %161, %cst_138 {dimension_numbers = #tpu.dot_dimension_numbers<[1], [0], [0], [1], [0, 0, 1, 1], [], []>} : vector<8x120xf32>, vector<120x160xf32>, vector<8x160xf32> -> vector<8x160xf32>
    %163 = vector.extract_strided_slice %158 {offsets = [1, 0], sizes = [8, 120], strides = [1, 1]} : vector<12x120xf32> to vector<8x120xf32>
    %c1_139 = arith.constant 1 : index
    %c0_140 = arith.constant 0 : index
    %c0_141 = arith.constant 0 : index
    %164 = vector.load %arg7[%c1_139, %c0_140, %c0_141] : memref<5x120x160xf32, #tpu.memory_space<vmem>>, vector<1x120x160xf32>
    %165 = vector.shape_cast %164 : vector<1x120x160xf32> to vector<120x160xf32>
    %cst_142 = arith.constant dense<0.000000e+00> : vector<8x160xf32>
    %166 = tpu.matmul %163, %165, %cst_142 {dimension_numbers = #tpu.dot_dimension_numbers<[1], [0], [0], [1], [0, 0, 1, 1], [], []>} : vector<8x120xf32>, vector<120x160xf32>, vector<8x160xf32> -> vector<8x160xf32>
    %167 = arith.addf %162, %166 : vector<8x160xf32>
    %168 = vector.extract_strided_slice %158 {offsets = [2, 0], sizes = [8, 120], strides = [1, 1]} : vector<12x120xf32> to vector<8x120xf32>
    %c2_143 = arith.constant 2 : index
    %c0_144 = arith.constant 0 : index
    %c0_145 = arith.constant 0 : index
    %169 = vector.load %arg7[%c2_143, %c0_144, %c0_145] : memref<5x120x160xf32, #tpu.memory_space<vmem>>, vector<1x120x160xf32>
    %170 = vector.shape_cast %169 : vector<1x120x160xf32> to vector<120x160xf32>
    %cst_146 = arith.constant dense<0.000000e+00> : vector<8x160xf32>
    %171 = tpu.matmul %168, %170, %cst_146 {dimension_numbers = #tpu.dot_dimension_numbers<[1], [0], [0], [1], [0, 0, 1, 1], [], []>} : vector<8x120xf32>, vector<120x160xf32>, vector<8x160xf32> -> vector<8x160xf32>
    %172 = arith.addf %167, %171 : vector<8x160xf32>
    %173 = vector.extract_strided_slice %158 {offsets = [3, 0], sizes = [8, 120], strides = [1, 1]} : vector<12x120xf32> to vector<8x120xf32>
    %c3_147 = arith.constant 3 : index
    %c0_148 = arith.constant 0 : index
    %c0_149 = arith.constant 0 : index
    %174 = vector.load %arg7[%c3_147, %c0_148, %c0_149] : memref<5x120x160xf32, #tpu.memory_space<vmem>>, vector<1x120x160xf32>
    %175 = vector.shape_cast %174 : vector<1x120x160xf32> to vector<120x160xf32>
    %cst_150 = arith.constant dense<0.000000e+00> : vector<8x160xf32>
    %176 = tpu.matmul %173, %175, %cst_150 {dimension_numbers = #tpu.dot_dimension_numbers<[1], [0], [0], [1], [0, 0, 1, 1], [], []>} : vector<8x120xf32>, vector<120x160xf32>, vector<8x160xf32> -> vector<8x160xf32>
    %177 = arith.addf %172, %176 : vector<8x160xf32>
    %178 = vector.extract_strided_slice %158 {offsets = [4, 0], sizes = [8, 120], strides = [1, 1]} : vector<12x120xf32> to vector<8x120xf32>
    %c4_151 = arith.constant 4 : index
    %c0_152 = arith.constant 0 : index
    %c0_153 = arith.constant 0 : index
    %179 = vector.load %arg7[%c4_151, %c0_152, %c0_153] : memref<5x120x160xf32, #tpu.memory_space<vmem>>, vector<1x120x160xf32>
    %180 = vector.shape_cast %179 : vector<1x120x160xf32> to vector<120x160xf32>
    %cst_154 = arith.constant dense<0.000000e+00> : vector<8x160xf32>
    %181 = tpu.matmul %178, %180, %cst_154 {dimension_numbers = #tpu.dot_dimension_numbers<[1], [0], [0], [1], [0, 0, 1, 1], [], []>} : vector<8x120xf32>, vector<120x160xf32>, vector<8x160xf32> -> vector<8x160xf32>
    %182 = arith.addf %177, %181 : vector<8x160xf32>
    %c0_155 = arith.constant 0 : index
    %c0_156 = arith.constant 0 : index
    %183 = vector.load %arg8[%c0_155, %c0_156] : memref<1x160xf32, #tpu.memory_space<vmem>>, vector<1x160xf32>
    %184 = vector.broadcast %183 : vector<1x160xf32> to vector<8x160xf32>
    %185 = arith.addf %182, %184 : vector<8x160xf32>
    %c0_157 = arith.constant 0 : index
    %c0_158 = arith.constant 0 : index
    %186 = vector.load %arg9[%c0_157, %c0_158] : memref<160x80xf32, #tpu.memory_space<vmem>>, vector<160x80xf32>
    %cst_159 = arith.constant dense<0.000000e+00> : vector<8x80xf32>
    %187 = tpu.matmul %185, %186, %cst_159 {dimension_numbers = #tpu.dot_dimension_numbers<[1], [0], [0], [1], [0, 0, 1, 1], [], []>} : vector<8x160xf32>, vector<160x80xf32>, vector<8x80xf32> -> vector<8x80xf32>
    %c0_160 = arith.constant 0 : index
    %c0_161 = arith.constant 0 : index
    %188 = vector.load %arg10[%c0_160, %c0_161] : memref<160x80xf32, #tpu.memory_space<vmem>>, vector<160x80xf32>
    %cst_162 = arith.constant dense<0.000000e+00> : vector<8x80xf32>
    %189 = tpu.matmul %185, %188, %cst_162 {dimension_numbers = #tpu.dot_dimension_numbers<[1], [0], [0], [1], [0, 0, 1, 1], [], []>} : vector<8x160xf32>, vector<160x80xf32>, vector<8x80xf32> -> vector<8x80xf32>
    %190 = arith.maximumf %187, %189 : vector<8x80xf32>
    %c0_163 = arith.constant 0 : index
    %c0_164 = arith.constant 0 : index
    %191 = vector.load %arg11[%c0_163, %c0_164] : memref<4x8xf32, #tpu.memory_space<vmem>>, vector<4x8xf32>
    %cst_165 = arith.constant dense<0.000000e+00> : vector<4x80xf32>
    %192 = tpu.matmul %191, %190, %cst_165 {dimension_numbers = #tpu.dot_dimension_numbers<[1], [0], [0], [1], [0, 0, 1, 1], [], []>} : vector<4x8xf32>, vector<8x80xf32>, vector<4x80xf32> -> vector<4x80xf32>
    %c0_166 = arith.constant 0 : index
    %c0_167 = arith.constant 0 : index
    %193 = vector.load %arg12[%c0_166, %c0_167] : memref<4x8xf32, #tpu.memory_space<vmem>>, vector<4x8xf32>
    %cst_168 = arith.constant dense<0.000000e+00> : vector<4x80xf32>
    %194 = tpu.matmul %193, %190, %cst_168 {dimension_numbers = #tpu.dot_dimension_numbers<[1], [0], [0], [1], [0, 0, 1, 1], [], []>} : vector<4x8xf32>, vector<8x80xf32>, vector<4x80xf32> -> vector<4x80xf32>
    %195 = arith.maximumf %192, %194 : vector<4x80xf32>
    %cst_169 = arith.constant 0.000000e+00 : f32
    %196 = vector.broadcast %cst_169 : f32 to vector<4x80xf32>
    %197 = arith.maximumf %195, %196 : vector<4x80xf32>
    %c0_170 = arith.constant 0 : index
    %c0_171 = arith.constant 0 : index
    %198 = vector.load %arg14[%c0_170, %c0_171] : memref<1x50xf32, #tpu.memory_space<vmem>>, vector<1x50xf32>
    %199 = vector.extract_strided_slice %197 {offsets = [0, 0], sizes = [1, 80], strides = [1, 1]} : vector<4x80xf32> to vector<1x80xf32>
    %c0_172 = arith.constant 0 : index
    %c0_173 = arith.constant 0 : index
    %c0_174 = arith.constant 0 : index
    %200 = vector.load %arg13[%c0_172, %c0_173, %c0_174] : memref<4x80x50xf32, #tpu.memory_space<vmem>>, vector<1x80x50xf32>
    %201 = vector.shape_cast %200 : vector<1x80x50xf32> to vector<80x50xf32>
    %cst_175 = arith.constant dense<0.000000e+00> : vector<1x50xf32>
    %202 = tpu.matmul %199, %201, %cst_175 {dimension_numbers = #tpu.dot_dimension_numbers<[1], [0], [0], [1], [0, 0, 1, 1], [], []>} : vector<1x80xf32>, vector<80x50xf32>, vector<1x50xf32> -> vector<1x50xf32>
    %203 = arith.addf %198, %202 : vector<1x50xf32>
    %204 = vector.extract_strided_slice %197 {offsets = [1, 0], sizes = [1, 80], strides = [1, 1]} : vector<4x80xf32> to vector<1x80xf32>
    %c1_176 = arith.constant 1 : index
    %c0_177 = arith.constant 0 : index
    %c0_178 = arith.constant 0 : index
    %205 = vector.load %arg13[%c1_176, %c0_177, %c0_178] : memref<4x80x50xf32, #tpu.memory_space<vmem>>, vector<1x80x50xf32>
    %206 = vector.shape_cast %205 : vector<1x80x50xf32> to vector<80x50xf32>
    %cst_179 = arith.constant dense<0.000000e+00> : vector<1x50xf32>
    %207 = tpu.matmul %204, %206, %cst_179 {dimension_numbers = #tpu.dot_dimension_numbers<[1], [0], [0], [1], [0, 0, 1, 1], [], []>} : vector<1x80xf32>, vector<80x50xf32>, vector<1x50xf32> -> vector<1x50xf32>
    %208 = arith.addf %203, %207 : vector<1x50xf32>
    %209 = vector.extract_strided_slice %197 {offsets = [2, 0], sizes = [1, 80], strides = [1, 1]} : vector<4x80xf32> to vector<1x80xf32>
    %c2_180 = arith.constant 2 : index
    %c0_181 = arith.constant 0 : index
    %c0_182 = arith.constant 0 : index
    %210 = vector.load %arg13[%c2_180, %c0_181, %c0_182] : memref<4x80x50xf32, #tpu.memory_space<vmem>>, vector<1x80x50xf32>
    %211 = vector.shape_cast %210 : vector<1x80x50xf32> to vector<80x50xf32>
    %cst_183 = arith.constant dense<0.000000e+00> : vector<1x50xf32>
    %212 = tpu.matmul %209, %211, %cst_183 {dimension_numbers = #tpu.dot_dimension_numbers<[1], [0], [0], [1], [0, 0, 1, 1], [], []>} : vector<1x80xf32>, vector<80x50xf32>, vector<1x50xf32> -> vector<1x50xf32>
    %213 = arith.addf %208, %212 : vector<1x50xf32>
    %214 = vector.extract_strided_slice %197 {offsets = [3, 0], sizes = [1, 80], strides = [1, 1]} : vector<4x80xf32> to vector<1x80xf32>
    %c3_184 = arith.constant 3 : index
    %c0_185 = arith.constant 0 : index
    %c0_186 = arith.constant 0 : index
    %215 = vector.load %arg13[%c3_184, %c0_185, %c0_186] : memref<4x80x50xf32, #tpu.memory_space<vmem>>, vector<1x80x50xf32>
    %216 = vector.shape_cast %215 : vector<1x80x50xf32> to vector<80x50xf32>
    %cst_187 = arith.constant dense<0.000000e+00> : vector<1x50xf32>
    %217 = tpu.matmul %214, %216, %cst_187 {dimension_numbers = #tpu.dot_dimension_numbers<[1], [0], [0], [1], [0, 0, 1, 1], [], []>} : vector<1x80xf32>, vector<80x50xf32>, vector<1x50xf32> -> vector<1x50xf32>
    %218 = arith.addf %213, %217 : vector<1x50xf32>
    %cst_188 = arith.constant 0.000000e+00 : f32
    %219 = vector.broadcast %cst_188 : f32 to vector<1x50xf32>
    %220 = arith.maximumf %218, %219 : vector<1x50xf32>
    %c0_189 = arith.constant 0 : index
    %c0_190 = arith.constant 0 : index
    %221 = vector.load %arg15[%c0_189, %c0_190] : memref<50x10xf32, #tpu.memory_space<vmem>>, vector<50x10xf32>
    %cst_191 = arith.constant dense<0.000000e+00> : vector<1x10xf32>
    %222 = tpu.matmul %220, %221, %cst_191 {dimension_numbers = #tpu.dot_dimension_numbers<[1], [0], [0], [1], [0, 0, 1, 1], [], []>} : vector<1x50xf32>, vector<50x10xf32>, vector<1x10xf32> -> vector<1x10xf32>
    %c0_192 = arith.constant 0 : index
    %c0_193 = arith.constant 0 : index
    %223 = vector.load %arg16[%c0_192, %c0_193] : memref<1x10xf32, #tpu.memory_space<vmem>>, vector<1x10xf32>
    %224 = arith.addf %222, %223 : vector<1x10xf32>
    %cst_194 = arith.constant dense<0xFF800000> : vector<1xf32>
    %225 = vector.multi_reduction <maximumf>, %224, %cst_194 [1] : vector<1x10xf32> to vector<1xf32>
    %226 = vector.shape_cast %225 : vector<1xf32> to vector<1x1xf32>
    %227 = vector.broadcast %226 : vector<1x1xf32> to vector<1x10xf32>
    %228 = arith.subf %224, %227 : vector<1x10xf32>
    %229 = math.exp %228 : vector<1x10xf32>
    %cst_195 = arith.constant dense<0.000000e+00> : vector<1xf32>
    %230 = vector.multi_reduction <add>, %229, %cst_195 [1] : vector<1x10xf32> to vector<1xf32>
    %231 = vector.shape_cast %230 : vector<1xf32> to vector<1x1xf32>
    %232 = math.log %231 : vector<1x1xf32>
    %233 = vector.broadcast %232 : vector<1x1xf32> to vector<1x10xf32>
    %234 = arith.subf %228, %233 : vector<1x10xf32>
    %c1_196 = arith.constant 1 : index
    %c0_197 = arith.constant 0 : index
    %235 = vector.load %arg17[%c1_196, %c0_197] : memref<2x10xf32, #tpu.memory_space<vmem>>, vector<1x10xf32>
    tpu.vector_store %arg17[%c1_196, %c0_197], %234 {strides = array<i32>} : memref<2x10xf32, #tpu.memory_space<vmem>>, vector<1x10xf32>,
    return
  }
}

</mosaic_0001>

<bundles_post_ra>
// kernel: net_forward.1
= control target key start
LH: loop header
LB: loop body
LE: loop exit
PB: predicated region body
PF: predicated region fallthrough
CT: control target
= control target key end

     0   :  { %s9244_s0 = inlined_call_operand.vmem [shape: f32[2,1,28,28], index: 0, kind: input, shape index: {}]   ;;  %s9245_s1 = inlined_call_operand.vmem [shape: f32[5,28,240], index: 1, kind: input, shape index: {}]   ;;  %s9246_s2 = inlined_call_operand.vmem [shape: f32[1,240], index: 2, kind: input, shape index: {}]   ;;  %s9247_s3 = inlined_call_operand.vmem [shape: f32[240,120], index: 3, kind: input, shape index: {}]   ;;  %s9248_s4 = inlined_call_operand.vmem [shape: f32[240,120], index: 4, kind: input, shape index: {}]   ;;  %s9249_s5 = inlined_call_operand.vmem [shape: f32[12,24], index: 5, kind: input, shape index: {}]   ;;  %s9250_s6 = inlined_call_operand.vmem [shape: f32[12,24], index: 6, kind: input, shape index: {}]   ;;  %s9251_s7 = inlined_call_operand.vmem [shape: f32[5,120,160], index: 7, kind: input, shape index: {}]   ;;  %s9252_s8 = inlined_call_operand.vmem [shape: f32[1,160], index: 8, kind: input, shape index: {}]   ;;  %s9253_s9 = inlined_call_operand.vmem [shape: f32[160,80], index: 9, kind: input, shape index: {}]   ;;  %s9254_s10 = inlined_call_operand.vmem [shape: f32[160,80], index: 10, kind: input, shape index: {}]   ;;  %s9255_s11 = inlined_call_operand.vmem [shape: f32[4,8], index: 11, kind: input, shape index: {}]   ;;  %s9256_s12 = inlined_call_operand.vmem [shape: f32[4,8], index: 12, kind: input, shape index: {}]   ;;  %s9257_s13 = inlined_call_operand.vmem [shape: f32[4,80,50], index: 13, kind: input, shape index: {}]   ;;  %s9258_s14 = inlined_call_operand.vmem [shape: f32[1,50], index: 14, kind: input, shape index: {}]   ;;  %s9259_s15 = inlined_call_operand.vmem [shape: f32[50,10], index: 15, kind: input, shape index: {}]   ;;  %s9260_s16 = inlined_call_operand.vmem [shape: f32[1,10], index: 16, kind: input, shape index: {}]   ;;  %s9261_s17 = inlined_call_operand.hbm [shape: f32[2,10], index: 17, kind: output, shape index: {}]  }
   0x1   :  { %9264 = sst [smem:[#allocation5_spill]] %s9244_s0 }
   0x2   :  { %9265 = sst [smem:[#allocation6_spill]] %s9245_s1 }
   0x3   :  { %s9266_s26 = sld [smem:[#allocation6_spill]]  ;;  %vm97_vm0 = vcmask 1043456   ;;  %v6534_v7 = vmov 0.0   ;;  %vm6535_vm1 = vmmov 1   ;;  %s9269_s29 = sld [smem:[#allocation5_spill]]  ;;  %v6536_v20 = vmov 0.0|0.0  }
   0x4   :  { %168 = vmatprep.mubr.f32.mxu0 %v6534_v7  ;;  %vm6649_vm2 = vmpackc.low %vm97_vm0, %vm6535_vm1  ;;  %5635 = vmatprep.subr.bf16.mxu1 %v6536_v20  ;;  %vm82_vm3 = vcmask 1046528   ;;  %vm90_vm4 = vcmask 228352   ;;  %v653_v40 = vld [vmem:[%s9247_s3] sm:$0xff]  ;;  %v654_v41 = vld [vmem:[%s9247_s3 + $0x8] sm:$0xff]  ;;  %vm291_vm5 = vcmask 1045504  }
   0x5   :  { %v5636_v43 = vpack.c.bf16 %v654_v41, %v653_v40  ;;  %v655_v44 = vld [vmem:[%s9247_s3 + $0x10] sm:$0xff]  ;;  %v656_v45 = vld [vmem:[%s9247_s3 + $0x18] sm:$0xff]  ;;  %v657_v51 = vld [vmem:[%s9247_s3 + $0x20] sm:$0xff] }
   0x6   :  { %v5639_v50 = vpack.c.bf16 %v656_v45, %v655_v44  ;;  %v658_v52 = vld [vmem:[%s9247_s3 + $0x28] sm:$0xff]  ;;  %v659_v60 = vld [vmem:[%s9247_s3 + $0x30] sm:$0xff]  ;;  %v660_v61 = vld [vmem:[%s9247_s3 + $0x38] sm:$0xff] }
   0x7   :  { %5637 = vmatpush1.bf16.msra.mxu1 %v5636_v43  ;;  %v5642_v59 = vpack.c.bf16 %v658_v52, %v657_v51 }
   0x8   :  { %5638 = vmatprep.subr.bf16.mxu1 %v6536_v20 }
   0x9   :  { %v4712_v0 = vld [vmem:[%s9266_s26 + $0x48] sm:$0xff]  ;;  %v4714_v1 = vld [vmem:[%s9266_s26 + $0x58] sm:$0xff]  ;;  %v4711_v2 = vld [vmem:[%s9266_s26 + $0x40] sm:$0xff] }
   0xa   :  { %v5585_v3 = vpack.c.bf16 %v4714_v1, %v4712_v0  ;;  %v4713_v4 = vld [vmem:[%s9266_s26 + $0x50] sm:$0xff]  ;;  %v4716_v5 = vld [vmem:[%s9266_s26 + $0x68] sm:$0xff]  ;;  %v4718_v6 = vld [vmem:[%s9266_s26 + $0x78] sm:$0xf]  ;;  %v5645_v0 = vpack.c.bf16 %v660_v61, %v659_v60 }
   0xb   :  { %v5587_v8 = vpack.c.bf16 %v4713_v4, %v4711_v2  ;;  %v5589_v9 = vpack.c.bf16 %v4718_v6, %v4716_v5  ;;  %v4715_v11 = vld [vmem:[%s9266_s26 + $0x60] sm:$0xff]  ;;  %v4717_v12 = vld [vmem:[%s9266_s26 + $0x70] sm:$0xf]  ;;  %v6667_v14 = vld [vmem:[%s9269_s29 + $0x8] sm:$0xff]  ;;  %5640 = vmatpush1.bf16.msra.mxu1 %v5639_v50 }
   0xc   :  { %5586 = vmatprep.subr.bf16.mxu0 %v5585_v3  ;;  %v6662_v13 = vld [vmem:[%s9269_s29] sm:$0xff]  ;;  %v5592_v15 = vpack.c.bf16 %v4717_v12, %v4715_v11  ;;  %v84_v17 = vrot.slane %v6667_v14, 1  ;;  %v62_v18 = vld [vmem:[%s9266_s26 + $0x8] sm:$0xff]  ;;  %v64_v19 = vld [vmem:[%s9266_s26 + $0x18] sm:$0xff]  ;;  %5641 = vmatprep.subr.bf16.mxu1 %v6536_v20  ;;  %v293_v4 = vrot.slane %v6667_v14, 2 }
   0xd   :  { %5588 = vmatpush1.bf16.msra.mxu0 %v5587_v8  ;;  %v83_v16 = vrot.slane %v6662_v13, 1  ;;  %v6683_v21 = vld [vmem:[%s9269_s29 + $0x10] sm:$0xff]  ;;  %v5595_v22 = vpack.c.bf16 %v64_v19, %v62_v18  ;;  %v61_v23 = vld [vmem:[%s9266_s26] sm:$0xff]  ;;  %v66_v25 = vld [vmem:[%s9266_s26 + $0x28] sm:$0xff]  ;;  %v292_v3 = vrot.slane %v6662_v13, 2 }
   0xe   :  { %5591 = vmatprep.subr.msk.bf16.mxu0 %vm6649_vm2, %v5589_v9  ;;  %v63_v24 = vld [vmem:[%s9266_s26 + $0x10] sm:$0xff]  ;;  %v68_v26 = vld [vmem:[%s9266_s26 + $0x38] sm:$0xf]  ;;  %v86_v28 = vrot.slane %v6683_v21, 1  ;;  %v65_v32 = vld [vmem:[%s9266_s26 + $0x20] sm:$0xff] }
   0xf   :  { %v85_v27 = vsel %vm82_vm3, %v83_v16, %v84_v17  ;;  %v5597_v29 = vpack.c.bf16 %v63_v24, %v61_v23  ;;  %v6704_v30 = vld [vmem:[%s9269_s29 + $0x18] sm:$0xf]  ;;  %v5599_v31 = vpack.c.bf16 %v68_v26, %v66_v25  ;;  %v67_v33 = vld [vmem:[%s9266_s26 + $0x30] sm:$0xf]  ;;  %v4730_v34 = vld [vmem:[%s9266_s26 + $0x88] sm:$0xff]  ;;  %5643 = vmatpush1.bf16.msra.mxu1 %v5642_v59  ;;  %v294_v16 = vsel %vm291_vm5, %v292_v3, %v293_v4 }
  0x10   :  { %v4732_v35 = vld [vmem:[%s9266_s26 + $0x98] sm:$0xff]  ;;  %v87_v36 = vsel %vm82_vm3, %v84_v17, %v86_v28  ;;  %v88_v37 = vrot.slane %v6704_v30, 1  ;;  %v5602_v38 = vpack.c.bf16 %v67_v33, %v65_v32  ;;  %v4729_v46 = vld [vmem:[%s9266_s26 + $0x80] sm:$0xff]  ;;  %v4731_v47 = vld [vmem:[%s9266_s26 + $0x90] sm:$0xff]  ;;  %5644 = vmatprep.subr.bf16.mxu1 %v6536_v20  ;;  %v295_v17 = vrot.slane %v6683_v21, 2 }
  0x11   :  { %5594 = vmatpush1.bf16.msk.msra.mxu0 %vm6649_vm2, %v5592_v15  ;;  %v5605_v39 = vpack.c.bf16 %v4732_v35, %v4730_v34  ;;  %v4734_v48 = vld [vmem:[%s9266_s26 + $0xa8] sm:$0xff]  ;;  %v4736_v49 = vld [vmem:[%s9266_s26 + $0xb8] sm:$0xf]  ;;  %v5607_v53 = vpack.c.bf16 %v4731_v47, %v4729_v46  ;;  %v4733_v55 = vld [vmem:[%s9266_s26 + $0xa0] sm:$0xff] }
  0x12   :  { %5596 = vmatprep.subr.bf16.mxu0 %v5595_v22  ;;  %v89_v42 = vsel %vm82_vm3, %v86_v28, %v88_v37  ;;  %v5609_v54 = vpack.c.bf16 %v4736_v49, %v4734_v48  ;;  %v4735_v56 = vld [vmem:[%s9266_s26 + $0xb0] sm:$0xf]  ;;  %v4743_v57 = vld [vmem:[%s9266_s26 + $0xc8] sm:$0xff]  ;;  %v4745_v58 = vld [vmem:[%s9266_s26 + $0xd8] sm:$0xff] }
  0x13   :  { %v5612_v62 = vpack.c.bf16 %v4735_v56, %v4733_v55  ;;  %v5615_v63 = vpack.c.bf16 %v4745_v58, %v4743_v57  ;;  %v661_v1 = vld [vmem:[%s9247_s3 + $0x40] sm:$0xff]  ;;  %v662_v2 = vld [vmem:[%s9247_s3 + $0x48] sm:$0xff]  ;;  %v4744_v6 = vld [vmem:[%s9266_s26 + $0xd0] sm:$0xff]  ;;  %5646 = vmatpush1.bf16.msra.mxu1 %v5645_v0 }
  0x14   :  { %4721 = vmatmul.mubr.msk.f32.vlgmr.msra.gmra.mrb[0].mxu0 %vm90_vm4, %v85_v27  ;;  %v4742_v5 = vld [vmem:[%s9266_s26 + $0xc0] sm:$0xff]  ;;  %v4747_v8 = vld [vmem:[%s9266_s26 + $0xe8] sm:$0xff]  ;;  %v4749_v9 = vld [vmem:[%s9266_s26 + $0xf8] sm:$0xf]  ;;  %v5648_v11 = vpack.c.bf16 %v662_v2, %v661_v1  ;;  %5647 = vmatprep.subr.bf16.mxu1 %v6536_v20 }
  0x15   :  { %174 = vmatprep.mubr.f32.mxu0 %v6534_v7  ;;  %5598 = vmatpush1.bf16.msra.mxu0 %v5597_v29  ;;  %v663_v12 = vld [vmem:[%s9247_s3 + $0x50] sm:$0xff]  ;;  %v664_v15 = vld [vmem:[%s9247_s3 + $0x58] sm:$0xff]  ;;  %v5617_v18 = vpack.c.bf16 %v4744_v6, %v4742_v5  ;;  %v5619_v19 = vpack.c.bf16 %v4749_v9, %v4747_v8  ;;  %v4746_v22 = vld [vmem:[%s9266_s26 + $0xe0] sm:$0xff] }
  0x16   :  { %5601 = vmatprep.subr.msk.bf16.mxu0 %vm6649_vm2, %v5599_v31  ;;  %v4748_v23 = vld [vmem:[%s9266_s26 + $0xf0] sm:$0xf] }
  0x18   :  { %4722 = vmatmul.mubr.msk.f32.gmra.mrb[2].mxu0 %vm90_vm4, %v87_v36 }
  0x19   :  { %180 = vmatprep.mubr.f32.mxu0 %v6534_v7  ;;  %5604 = vmatpush1.bf16.msk.msra.mxu0 %vm6649_vm2, %v5602_v38 }
  0x1a   :  { %5606 = vmatprep.subr.bf16.mxu0 %v5605_v39 }
  0x1c   :  { %4723 = vmatmul.mubr.msk.f32.gmra.mrb[4].mxu0 %vm90_vm4, %v89_v42 }
  0x1d   :  { %263 = vmatprep.mubr.f32.mxu0 %v6534_v7 }
  0x20   :  { %4726 = vmatmul.mubr.msk.f32.vlgmr.msra.gmra.mrb[0].mxu0 %vm90_vm4, %v6662_v13 }
  0x21   :  { %269 = vmatprep.mubr.f32.mxu0 %v6534_v7  ;;  %5608 = vmatpush1.bf16.msra.mxu0 %v5607_v53 }
  0x22   :  { %5611 = vmatprep.subr.msk.bf16.mxu0 %vm6649_vm2, %v5609_v54 }
  0x24   :  { %4727 = vmatmul.mubr.msk.f32.gmra.mrb[2].mxu0 %vm90_vm4, %v6667_v14 }
  0x25   :  { %275 = vmatprep.mubr.f32.mxu0 %v6534_v7  ;;  %5614 = vmatpush1.bf16.msk.msra.mxu0 %vm6649_vm2, %v5612_v62 }
  0x26   :  { %5616 = vmatprep.subr.bf16.mxu0 %v5615_v63 }
  0x28   :  { %4728 = vmatmul.mubr.msk.f32.gmra.mrb[4].mxu0 %vm90_vm4, %v6683_v21 }
  0x29   :  { %375 = vmatprep.mubr.f32.mxu0 %v6534_v7 }
  0x2a   :  { %22 = vsyncpa [#allocation3], 0  ;;  %v4756_v24 = vld [vmem:[%s9266_s26 + $0x108] sm:$0xff]  ;;  %v4758_v25 = vld [vmem:[%s9266_s26 + $0x118] sm:$0xff]  ;;  %5649 = vmatpush1.bf16.msra.mxu1 %v5648_v11  ;;  %v5651_v26 = vpack.c.bf16 %v664_v15, %v663_v12  ;;  %v296_v29 = vsel %vm291_vm5, %v293_v4, %v295_v17  ;;  %v297_v31 = vrot.slane %v6704_v30, 2  ;;  %v5622_v32 = vpack.c.bf16 %v4748_v23, %v4746_v22 }
  0x2b   :  { %5650 = vmatprep.subr.bf16.mxu1 %v6536_v20  ;;  %v665_v27 = vld [vmem:[%s9247_s3 + $0x60] sm:$0xff]  ;;  %v666_v28 = vld [vmem:[%s9247_s3 + $0x68] sm:$0xff]  ;;  %v5625_v33 = vpack.c.bf16 %v4758_v25, %v4756_v24  ;;  %v667_v35 = vld [vmem:[%s9247_s3 + $0x70] sm:$0xff]  ;;  %v410_v38 = vrot.slane %v6662_v13, 3  ;;  %v411_v39 = vrot.slane %v6667_v14, 3  ;;  %vm409_vm6 = vcmask 1044480  }
  0x2c   :  { %4739 = vmatmul.mubr.msk.f32.vlgmr.msra.gmra.mrb[0].mxu0 %vm90_vm4, %v294_v16  ;;  %v5654_v34 = vpack.c.bf16 %v666_v28, %v665_v27  ;;  %v668_v36 = vld [vmem:[%s9247_s3 + $0x78] sm:$0xff]  ;;  %v298_v37 = vsel %vm291_vm5, %v295_v17, %v297_v31  ;;  %v4755_v40 = vld [vmem:[%s9266_s26 + $0x100] sm:$0xff]  ;;  %v4757_v41 = vld [vmem:[%s9266_s26 + $0x110] sm:$0xff]  ;;  %v413_v48 = vrot.slane %v6683_v21, 3  ;;  %v415_v57 = vrot.slane %v6704_v30, 3 }
  0x2d   :  { %381 = vmatprep.mubr.f32.mxu0 %v6534_v7  ;;  %5618 = vmatpush1.bf16.msra.mxu0 %v5617_v18  ;;  %v4760_v42 = vld [vmem:[%s9266_s26 + $0x128] sm:$0xff]  ;;  %v4762_v43 = vld [vmem:[%s9266_s26 + $0x138] sm:$0xf]  ;;  %v5657_v44 = vpack.c.bf16 %v668_v36, %v667_v35  ;;  %v669_v45 = vld [vmem:[%s9247_s3 + $0x80] sm:$0xff]  ;;  %v412_v47 = vsel %vm409_vm6, %v410_v38, %v411_v39  ;;  %v5627_v49 = vpack.c.bf16 %v4757_v41, %v4755_v40  ;;  %v527_v63 = vrot.slane %v6662_v13, 4 }
  0x2e   :  { %5621 = vmatprep.subr.msk.bf16.mxu0 %vm6649_vm2, %v5619_v19  ;;  %5652 = vmatpush1.bf16.msra.mxu1 %v5651_v26  ;;  %v670_v46 = vld [vmem:[%s9247_s3 + $0x88] sm:$0xff]  ;;  %v5629_v50 = vpack.c.bf16 %v4762_v43, %v4760_v42  ;;  %v4759_v51 = vld [vmem:[%s9266_s26 + $0x120] sm:$0xff]  ;;  %v4761_v52 = vld [vmem:[%s9266_s26 + $0x130] sm:$0xf]  ;;  %v414_v56 = vsel %vm409_vm6, %v411_v39, %v413_v48  ;;  %v416_v62 = vsel %vm409_vm6, %v413_v48, %v415_v57  ;;  %v528_v0 = vrot.slane %v6667_v14, 4 }
  0x2f   :  { %5653 = vmatprep.subr.bf16.mxu1 %v6536_v20  ;;  %v5660_v53 = vpack.c.bf16 %v670_v46, %v669_v45  ;;  %v671_v54 = vld [vmem:[%s9247_s3 + $0x90] sm:$0xff]  ;;  %v672_v55 = vld [vmem:[%s9247_s3 + $0x98] sm:$0xff]  ;;  %v5632_v58 = vpack.c.bf16 %v4761_v52, %v4759_v51  ;;  %v673_v60 = vld [vmem:[%s9247_s3 + $0xa0] sm:$0xff]  ;;  %v530_v5 = vrot.slane %v6683_v21, 4  ;;  %v532_v16 = vrot.slane %v6704_v30, 4 }
  0x30   :  { %4740 = vmatmul.mubr.msk.f32.gmra.mrb[2].mxu0 %vm90_vm4, %v296_v29  ;;  %v5663_v59 = vpack.c.bf16 %v672_v55, %v671_v54  ;;  %v674_v61 = vld [vmem:[%s9247_s3 + $0xa8] sm:$0xff]  ;;  %v773_v1 = vld [vmem:[%s9248_s4] sm:$0xff]  ;;  %v675_v13 = vld [vmem:[%s9247_s3 + $0xb0] sm:$0xff]  ;;  %v529_v4 = vsel %vm97_vm0, %v527_v63, %v528_v0  ;;  %vm683_vm7 = vcmask 916480   ;;  %vm888_vm8 = vcmask 195584  }
  0x31   :  { %387 = vmatprep.mubr.f32.mxu0 %v6534_v7  ;;  %5624 = vmatpush1.bf16.msk.msra.mxu0 %vm6649_vm2, %v5622_v32  ;;  %v774_v2 = vld [vmem:[%s9248_s4 + $0x8] sm:$0xff]  ;;  %v5666_v3 = vpack.c.bf16 %v674_v61, %v673_v60  ;;  %v676_v14 = vld [vmem:[%s9247_s3 + $0xb8] sm:$0xff]  ;;  %v775_v8 = vld [vmem:[%s9248_s4 + $0x10] sm:$0xff]  ;;  %v531_v15 = vsel %vm97_vm0, %v528_v0, %v530_v5  ;;  %v533_v24 = vsel %vm97_vm0, %v530_v5, %v532_v16  ;;  %vm1123_vm9 = vcmask 982016  }
  0x32   :  { %5626 = vmatprep.subr.bf16.mxu0 %v5625_v33  ;;  %5655 = vmatpush1.bf16.msra.mxu1 %v5654_v34  ;;  %v5681_v6 = vpack.c.bf16 %v774_v2, %v773_v1  ;;  %v776_v9 = vld [vmem:[%s9248_s4 + $0x18] sm:$0xff]  ;;  %v5669_v11 = vpack.c.bf16 %v676_v14, %v675_v13  ;;  %v677_v12 = vld [vmem:[%s9247_s3 + $0xc0] sm:$0xff]  ;;  %v678_v21 = vld [vmem:[%s9247_s3 + $0xc8] sm:$0xff]  ;;  %vm1631_vm10 = vcmask 261120   ;;  %vm6537_vm11 = vmmov 0  }
  0x33   :  { %5656 = vmatprep.subr.bf16.mxu1 %v6536_v20  ;;  %v5684_v17 = vpack.c.bf16 %v776_v9, %v775_v8  ;;  %v777_v18 = vld [vmem:[%s9248_s4 + $0x20] sm:$0xff]  ;;  %v778_v19 = vld [vmem:[%s9248_s4 + $0x28] sm:$0xff]  ;;  %v5672_v22 = vpack.c.bf16 %v678_v21, %v677_v12  ;;  %v679_v30 = vld [vmem:[%s9247_s3 + $0xd0] sm:$0xff]  ;;  %vm1797_vm12 = vcmask 64512   ;;  %vm1958_vm13 = vcmask 654336  }
  0x34   :  { %4741 = vmatmul.mubr.msk.f32.gmra.mrb[4].mxu0 %vm90_vm4, %v298_v37  ;;  %v680_v23 = vld [vmem:[%s9247_s3 + $0xd8] sm:$0xff]  ;;  %v5687_v25 = vpack.c.bf16 %v778_v19, %v777_v18  ;;  %v779_v26 = vld [vmem:[%s9248_s4 + $0x30] sm:$0xff]  ;;  %v781_v31 = vld [vmem:[%s9248_s4 + $0x40] sm:$0xff]  ;;  %vm2301_vm14 = vcmask 1041408   ;;  %vm2297_vm15 = vcmask 408576   ;;  %vm2375_vm1 = vcmask 73728  }
  0x35   :  { %493 = vmatprep.mubr.f32.mxu0 %v6534_v7  ;;  %v780_v27 = vld [vmem:[%s9248_s4 + $0x38] sm:$0xff]  ;;  %v5675_v28 = vpack.c.bf16 %v680_v23, %v679_v30  ;;  %v782_v32 = vld [vmem:[%s9248_s4 + $0x48] sm:$0xff]  ;;  %v783_v34 = vld [vmem:[%s9248_s4 + $0x50] sm:$0xff] }
  0x36   :  { %5658 = vmatpush1.bf16.msra.mxu1 %v5657_v44  ;;  %v5690_v29 = vpack.c.bf16 %v780_v27, %v779_v26  ;;  %v5693_v33 = vpack.c.bf16 %v782_v32, %v781_v31  ;;  %v784_v35 = vld [vmem:[%s9248_s4 + $0x58] sm:$0xff]  ;;  %v785_v37 = vld [vmem:[%s9248_s4 + $0x60] sm:$0xff]  ;;  %v786_v38 = vld [vmem:[%s9248_s4 + $0x68] sm:$0xff] }
  0x37   :  { %5659 = vmatprep.subr.bf16.mxu1 %v6536_v20  ;;  %v5696_v36 = vpack.c.bf16 %v784_v35, %v783_v34  ;;  %v5699_v39 = vpack.c.bf16 %v786_v38, %v785_v37  ;;  %v787_v40 = vld [vmem:[%s9248_s4 + $0x70] sm:$0xff]  ;;  %v788_v41 = vld [vmem:[%s9248_s4 + $0x78] sm:$0xff]  ;;  %v789_v43 = vld [vmem:[%s9248_s4 + $0x80] sm:$0xff] }
  0x38   :  { %4752 = vmatmul.mubr.msk.f32.vlgmr.msra.gmra.mrb[0].mxu0 %vm90_vm4, %v412_v47  ;;  %v5702_v42 = vpack.c.bf16 %v788_v41, %v787_v40  ;;  %v790_v44 = vld [vmem:[%s9248_s4 + $0x88] sm:$0xff]  ;;  %v791_v46 = vld [vmem:[%s9248_s4 + $0x90] sm:$0xff]  ;;  %v792_v47 = vld [vmem:[%s9248_s4 + $0x98] sm:$0xff] }
  0x39   :  { %499 = vmatprep.mubr.f32.mxu0 %v6534_v7  ;;  %5628 = vmatpush1.bf16.msra.mxu0 %v5627_v49  ;;  %v5705_v45 = vpack.c.bf16 %v790_v44, %v789_v43  ;;  %v5708_v48 = vpack.c.bf16 %v792_v47, %v791_v46  ;;  %v793_v49 = vld [vmem:[%s9248_s4 + $0xa0] sm:$0xff]  ;;  %v795_v52 = vld [vmem:[%s9248_s4 + $0xb0] sm:$0xff]  ;;  %v802_v1 = vld [vmem:[%s9248_s4 + $0xe8] sm:$0xff] }
  0x3a   :  { %5631 = vmatprep.subr.msk.bf16.mxu0 %vm6649_vm2, %v5629_v50  ;;  %5661 = vmatpush1.bf16.msra.mxu1 %v5660_v53  ;;  %v794_v50 = vld [vmem:[%s9248_s4 + $0xa8] sm:$0xff]  ;;  %v796_v53 = vld [vmem:[%s9248_s4 + $0xb8] sm:$0xff]  ;;  %v797_v55 = vld [vmem:[%s9248_s4 + $0xc0] sm:$0xff] }
  0x3b   :  { %5662 = vmatprep.subr.bf16.mxu1 %v6536_v20  ;;  %v5711_v51 = vpack.c.bf16 %v794_v50, %v793_v49  ;;  %v5714_v54 = vpack.c.bf16 %v796_v53, %v795_v52  ;;  %v681_v61 = vld [vmem:[%s9247_s3 + $0xe0] sm:$0xff]  ;;  %v4779_v44 = vld [vmem:[%s9251_s7 + $0xf8] sm:$0xff]  ;;  %v4778_v46 = vld [vmem:[%s9251_s7 + $0xf0] sm:$0xff] }
  0x3c   :  { %4753 = vmatmul.mubr.msk.f32.gmra.mrb[2].mxu0 %vm90_vm4, %v414_v56  ;;  %v798_v56 = vld [vmem:[%s9248_s4 + $0xc8] sm:$0xff]  ;;  %v801_v63 = vld [vmem:[%s9248_s4 + $0xe0] sm:$0xff] }
  0x3d   :  { %505 = vmatprep.mubr.f32.mxu0 %v6534_v7  ;;  %5634 = vmatpush1.bf16.msk.msra.mxu0 %vm6649_vm2, %v5632_v58  ;;  %v5717_v57 = vpack.c.bf16 %v798_v56, %v797_v55  ;;  %v799_v58 = vld [vmem:[%s9248_s4 + $0xd0] sm:$0xff]  ;;  %v5723_v2 = vpack.c.bf16 %v802_v1, %v801_v63  ;;  %v970_v43 = vld [vmem:[%s9250_s6] sm:$0xff]  ;;  %v4785_v49 = vld [vmem:[%s9251_s7 + $0x128] sm:$0xff] }
  0x3e   :  { %5680 = vmatprep.subr.bf16.mxu0 %v6536_v20  ;;  %5664 = vmatpush1.bf16.msra.mxu1 %v5663_v59  ;;  %v800_v59 = vld [vmem:[%s9248_s4 + $0xd8] sm:$0xff]  ;;  %v4780_v47 = vld [vmem:[%s9251_s7 + $0x100] sm:$0xff]  ;;  %v4793_v63 = vld [vmem:[%s9251_s7 + $0x168] sm:$0xff] }
  0x3f   :  { %5665 = vmatprep.subr.bf16.mxu1 %v6536_v20  ;;  %v5720_v60 = vpack.c.bf16 %v800_v59, %v799_v58  ;;  %v5735_v52 = vpack.c.bf16 %v4780_v47, %v4778_v46  ;;  %v4784_v55 = vld [vmem:[%s9251_s7 + $0x120] sm:$0xff]  ;;  %v4787_v56 = vld [vmem:[%s9251_s7 + $0x138] sm:$0xff]  ;;  %v1062_v47 = vld [vmem:[%s9251_s7 + $0x28] sm:$0xff] }
  0x40   :  { %4754 = vmatmul.mubr.msk.f32.gmra.mrb[4].mxu0 %vm90_vm4, %v416_v62  ;;  %v682_v62 = vld [vmem:[%s9247_s3 + $0xe8] sm:$0xff] }
  0x41   :  { %610 = vmatprep.mubr.f32.mxu0 %v6534_v7  ;;  %v5678_v0 = vpack.c.bf16 %v682_v62, %v681_v61  ;;  %v4788_v61 = vld [vmem:[%s9251_s7 + $0x140] sm:$0xff]  ;;  %v4791_v62 = vld [vmem:[%s9251_s7 + $0x158] sm:$0xff] }
  0x42   :  { %5667 = vmatpush1.bf16.msra.mxu1 %v5666_v3  ;;  %v637_v3 = vlaneseq  ;;  %v5745_v1 = vpack.c.bf16 %v4793_v63, %v4791_v62  ;;  %v1061_v63 = vld [vmem:[%s9251_s7 + $0x20] sm:$0xff] }
  0x43   :  { %5668 = vmatprep.subr.bf16.mxu1 %v6536_v20 }
  0x44   :  { %4765 = vmatmul.mubr.msk.f32.vlgmr.msra.gmra.mrb[0].mxu0 %vm90_vm4, %v529_v4  ;;  %v638_v13 = vshrl.u32 %v637_v3, 7  ;;  %v635_v4 = vld [vmem:[%s9246_s2] sm:$0x3] }
  0x45   :  { %616 = vmatprep.mubr.f32.mxu0 %v6534_v7  ;;  %5682 = vmatpush1.bf16.msra.mxu0 %v5681_v6  ;;  %v4792_v3 = vld [vmem:[%s9251_s7 + $0x160] sm:$0xff] }
  0x46   :  { %5683 = vmatprep.subr.bf16.mxu0 %v6536_v20  ;;  %5670 = vmatpush1.bf16.msra.mxu1 %v5669_v11  ;;  %v7066_v14 = vsub.s32 1, %v638_v13  ;;  %v7071_v5 = vsub.s32 0, %v638_v13 }
  0x47   :  { %5671 = vmatprep.subr.bf16.mxu1 %v6536_v20 }
  0x48   :  { %4766 = vmatmul.mubr.msk.f32.gmra.mrb[2].mxu0 %vm90_vm4, %v531_v15  ;;  %v644_v6 = vrot.slane %v635_v4, %v7066_v14  ;;  %v640_v8 = vrot.slane %v635_v4, %v7071_v5  ;;  %v4795_v4 = vld [vmem:[%s9251_s7 + $0x178] sm:$0xff] }
  0x49   :  { %622 = vmatprep.mubr.f32.mxu0 %v6534_v7  ;;  %5685 = vmatpush1.bf16.msra.mxu0 %v5684_v17 }
  0x4a   :  { %5686 = vmatprep.subr.bf16.mxu0 %v6536_v20  ;;  %5673 = vmatpush1.bf16.msra.mxu1 %v5672_v22 }
  0x4b   :  { %5674 = vmatprep.subr.bf16.mxu1 %v6536_v20 }
  0x4c   :  { %4767 = vmatmul.mubr.msk.f32.gmra.mrb[4].mxu0 %vm90_vm4, %v533_v24  ;;  %v886_v24 = vld [vmem:[%s9249_s5] sm:$0xff] }
  0x4d   :  { %5688 = vmatpush1.bf16.msra.mxu0 %v5687_v25 }
  0x4e   :  { %5689 = vmatprep.subr.bf16.mxu0 %v6536_v20  ;;  %5676 = vmatpush1.bf16.msra.mxu1 %v5675_v28 }
  0x4f   :  { %5677 = vmatprep.subr.bf16.mxu1 %v6536_v20 }
  0x51   :  { %5691 = vmatpush1.bf16.msra.mxu0 %v5690_v29 }
  0x52   :  { %5692 = vmatprep.subr.bf16.mxu0 %v6536_v20  ;;  %5679 = vmatpush1.bf16.msra.mxu1 %v5678_v0 }
  0x55   :  { %5694 = vmatpush1.bf16.msra.mxu0 %v5693_v33 }
  0x56   :  { %5695 = vmatprep.subr.bf16.mxu0 %v6536_v20 }
  0x59   :  { %5697 = vmatpush1.bf16.msra.mxu0 %v5696_v36 }
  0x5a   :  { %5698 = vmatprep.subr.bf16.mxu0 %v6536_v20 }
  0x5d   :  { %5700 = vmatpush1.bf16.msra.mxu0 %v5699_v39 }
  0x5e   :  { %5701 = vmatprep.subr.bf16.mxu0 %v6536_v20 }
  0x61   :  { %5703 = vmatpush1.bf16.msra.mxu0 %v5702_v42  ;;  %v887_v42 = vld [vmem:[%s9249_s5 + $0x8] sm:$0xf] }
  0x62   :  { %5704 = vmatprep.subr.bf16.mxu0 %v6536_v20 }
  0x65   :  { %5706 = vmatpush1.bf16.msra.mxu0 %v5705_v45  ;;  %v4781_v45 = vld [vmem:[%s9251_s7 + $0x108] sm:$0xff] }
  0x66   :  { %5707 = vmatprep.subr.bf16.mxu0 %v6536_v20  ;;  %v5733_v50 = vpack.c.bf16 %v4781_v45, %v4779_v44  ;;  %v1614_v45 = vld [vmem:[%s9253_s9 + $0x18] sm:$0xff] }
  0x69   :  { %5709 = vmatpush1.bf16.msra.mxu0 %v5708_v48  ;;  %v4783_v48 = vld [vmem:[%s9251_s7 + $0x118] sm:$0xff] }
  0x6a   :  { %5710 = vmatprep.subr.bf16.mxu0 %v6536_v20  ;;  %v5737_v53 = vpack.c.bf16 %v4785_v49, %v4783_v48 }
  0x6d   :  { %5712 = vmatpush1.bf16.msra.mxu0 %v5711_v51  ;;  %v971_v51 = vld [vmem:[%s9250_s6 + $0x8] sm:$0xf] }
  0x6e   :  { %5713 = vmatprep.subr.bf16.mxu0 %v6536_v20 }
  0x71   :  { %5715 = vmatpush1.bf16.msra.mxu0 %v5714_v54  ;;  %v4782_v54 = vld [vmem:[%s9251_s7 + $0x110] sm:$0xff] }
  0x72   :  { %5716 = vmatprep.subr.bf16.mxu0 %v6536_v20  ;;  %v5739_v58 = vpack.c.bf16 %v4784_v55, %v4782_v54 }
  0x75   :  { %5718 = vmatpush1.bf16.msra.mxu0 %v5717_v57  ;;  %v4789_v57 = vld [vmem:[%s9251_s7 + $0x148] sm:$0xff] }
  0x76   :  { %5719 = vmatprep.subr.bf16.mxu0 %v6536_v20  ;;  %v5741_v59 = vpack.c.bf16 %v4789_v57, %v4787_v56 }
  0x79   :  { %5721 = vmatpush1.bf16.msra.mxu0 %v5720_v60  ;;  %v4786_v60 = vld [vmem:[%s9251_s7 + $0x130] sm:$0xff] }
  0x7a   :  { %5722 = vmatprep.subr.bf16.mxu0 %v6536_v20  ;;  %v5743_v0 = vpack.c.bf16 %v4788_v61, %v4786_v60 }
  0x7d   :  { %5724 = vmatpush1.bf16.msra.mxu0 %v5723_v2  ;;  %v4790_v2 = vld [vmem:[%s9251_s7 + $0x150] sm:$0xff] }
  0x7e   :  { %5873 = vmatprep.subr.bf16.mxu0 %v6536_v20  ;;  %v5747_v13 = vpack.c.bf16 %v4792_v3, %v4790_v2  ;;  %v1066_v3 = vld [vmem:[%s9251_s7 + $0x48] sm:$0xff] }
 0x117   :  { %v612_v9 = vpop.f32.mrb[0].mxu0 }
 0x118   :  { %v614_v11 = vpop.f32.mrb[1].mxu0  ;;  %v647_v21 = vadd.f32 %v640_v8, %v612_v9  ;;  %v4794_v9 = vld [vmem:[%s9251_s7 + $0x170] sm:$0xff] }
 0x119   :  { %v648_v12 = vadd.f32 %v644_v6, %v614_v11  ;;  %v4796_v11 = vld [vmem:[%s9251_s7 + $0x180] sm:$0xff] }
 0x11b   :  { %v618_v15 = vpop.f32.mrb[2].mxu0  ;;  %4768 = vmatprep.mubr.msk.f32.mxu1 %vm683_vm7, %v648_v12  ;;  %4771 = vmatprep.mubr.msk.f32.mxu0 %vm683_vm7, %v648_v12  ;;  %v5751_v12 = vpack.c.bf16 %v4796_v11, %v4794_v9  ;;  %v1617_v9 = vld [vmem:[%s9253_s9 + $0x30] sm:$0xff]  ;;  %v1618_v11 = vld [vmem:[%s9253_s9 + $0x38] sm:$0xff] }
 0x11c   :  { %v620_v16 = vpop.f32.mrb[3].mxu0  ;;  %758 = vmatmul.mubr.f32.vlgmr.msra.gmra.mrb[0].mxu1 %v647_v21  ;;  %868 = vmatmul.mubr.f32.vlgmr.msra.gmra.mrb[6].mxu0 %v647_v21  ;;  %v649_v18 = vadd.f32 %v640_v8, %v618_v15  ;;  %v4799_v21 = vld [vmem:[%s9251_s7 + $0x198] sm:$0xff]  ;;  %v4801_v15 = vld [vmem:[%s9251_s7 + $0x1a8] sm:$0xff] }
 0x11d   :  { %v650_v17 = vadd.f32 %v644_v6, %v620_v16  ;;  %v4798_v16 = vld [vmem:[%s9251_s7 + $0x190] sm:$0xff] }
 0x11f   :  { %v624_v19 = vpop.f32.mrb[4].mxu0  ;;  %4769 = vmatprep.mubr.msk.f32.mxu1 %vm683_vm7, %v650_v17  ;;  %4772 = vmatprep.mubr.msk.f32.mxu0 %vm683_vm7, %v650_v17  ;;  %v5753_v17 = vpack.c.bf16 %v4801_v15, %v4799_v21  ;;  %v1065_v15 = vld [vmem:[%s9251_s7 + $0x40] sm:$0xff] }
 0x120   :  { %v626_v22 = vpop.f32.mrb[5].mxu0  ;;  %763 = vmatmul.mubr.f32.gmra.mrb[2].mxu1 %v649_v18  ;;  %873 = vmatmul.mubr.f32.gmra.mrb[8].mxu0 %v649_v18  ;;  %v651_v23 = vadd.f32 %v640_v8, %v624_v19  ;;  %v4800_v18 = vld [vmem:[%s9251_s7 + $0x1a0] sm:$0xff] }
 0x121   :  { %v652_v30 = vadd.f32 %v644_v6, %v626_v22  ;;  %v4797_v6 = vld [vmem:[%s9251_s7 + $0x188] sm:$0xff]  ;;  %v5755_v19 = vpack.c.bf16 %v4800_v18, %v4798_v16  ;;  %v4803_v22 = vld [vmem:[%s9251_s7 + $0x1b8] sm:$0xff]  ;;  %v1067_v16 = vld [vmem:[%s9251_s7 + $0x50] sm:$0xff] }
 0x122   :  { %v5749_v8 = vpack.c.bf16 %v4797_v6, %v4795_v4  ;;  %v1072_v18 = vld [vmem:[%s9251_s7 + $0x78] sm:$0xff] }
 0x123   :  { %4770 = vmatprep.mubr.msk.f32.mxu1 %vm683_vm7, %v652_v30  ;;  %4773 = vmatprep.mubr.msk.f32.mxu0 %vm683_vm7, %v652_v30  ;;  %v4805_v30 = vld [vmem:[%s9251_s7 + $0x1c8] sm:$0xff] }
 0x124   :  { %768 = vmatmul.mubr.f32.gmra.mrb[4].mxu1 %v651_v23  ;;  %878 = vmatmul.mubr.f32.gmra.mrb[10].mxu0 %v651_v23  ;;  %v5757_v23 = vpack.c.bf16 %v4805_v30, %v4803_v22  ;;  %v1619_v22 = vld [vmem:[%s9253_s9 + $0x40] sm:$0xff]  ;;  %v1620_v30 = vld [vmem:[%s9253_s9 + $0x48] sm:$0xff] }
 0x125   :  { %5317 = vmatprep.mubr.msk.f32.mxu1 %vm888_vm8, %v886_v24  ;;  %v4802_v24 = vld [vmem:[%s9251_s7 + $0x1b0] sm:$0xff] }
 0x1ef   :  { %v759_v25 = vpop.f32.mrb[0].mxu1  ;;  %v869_v26 = vpop.f32.mrb[6].mxu0 }
 0x1f0   :  { %v883_v27 = vmax.f32 %v759_v25, %v869_v26  ;;  %v761_v28 = vpop.f32.mrb[1].mxu1  ;;  %v871_v29 = vpop.f32.mrb[7].mxu0  ;;  %v4804_v25 = vld [vmem:[%s9251_s7 + $0x1c0] sm:$0xff] }
 0x1f1   :  { %v5759_v26 = vpack.c.bf16 %v4804_v25, %v4802_v24  ;;  %v4806_v28 = vld [vmem:[%s9251_s7 + $0x1d0] sm:$0xff]  ;;  %v1058_v29 = vld [vmem:[%s9251_s7 + $0x8] sm:$0xff]  ;;  %v1069_v25 = vld [vmem:[%s9251_s7 + $0x60] sm:$0xff] }
 0x1f3   :  { %v764_v31 = vpop.f32.mrb[2].mxu1  ;;  %v874_v32 = vpop.f32.mrb[8].mxu0 }
 0x1f4   :  { %v884_v33 = vmax.f32 %v764_v31, %v874_v32  ;;  %v766_v34 = vpop.f32.mrb[3].mxu1  ;;  %v876_v35 = vpop.f32.mrb[9].mxu0  ;;  %v1060_v31 = vld [vmem:[%s9251_s7 + $0x18] sm:$0xff] }
 0x1f5   :  { %v5761_v32 = vpack.c.bf16 %v1060_v31, %v1058_v29  ;;  %v5886_v29 = vpack.c.bf16 %v1620_v30, %v1619_v22  ;;  %v1621_v31 = vld [vmem:[%s9253_s9 + $0x50] sm:$0xff]  ;;  %v4818_v22 = vld [vmem:[%s9251_s7 + $0x220] sm:$0xff] }
 0x1f6   :  { %v5725_v36 = vpack.c.bf16 %v884_v33, %v883_v27  ;;  %v4807_v27 = vld [vmem:[%s9251_s7 + $0x1d8] sm:$0xff]  ;;  %v4820_v30 = vld [vmem:[%s9251_s7 + $0x230] sm:$0xff] }
 0x1f7   :  { %v769_v37 = vpop.f32.mrb[4].mxu1  ;;  %v879_v38 = vpop.f32.mrb[10].mxu0 }
 0x1f8   :  { %v885_v39 = vmax.f32 %v769_v37, %v879_v38  ;;  %v771_v40 = vpop.f32.mrb[5].mxu1  ;;  %v881_v41 = vpop.f32.mrb[11].mxu0  ;;  %5726 = vmatprep.subr.bf16.mxu1 %v5725_v36  ;;  %v1059_v37 = vld [vmem:[%s9251_s7 + $0x10] sm:$0xff] }
 0x1f9   :  { %5728 = vmatpush3.bf16.msra.mxu1 %v5725_v36  ;;  %v1611_v40 = vld [vmem:[%s9253_s9] sm:$0xff]  ;;  %v1612_v41 = vld [vmem:[%s9253_s9 + $0x8] sm:$0xff] }
 0x1fa   :  { %5315 = vmatprep.subr.mxu1 %v885_v39  ;;  %v5874_v44 = vpack.c.bf16 %v1612_v41, %v1611_v40  ;;  %v1623_v40 = vld [vmem:[%s9253_s9 + $0x60] sm:$0xff]  ;;  %v1624_v41 = vld [vmem:[%s9253_s9 + $0x68] sm:$0xff] }
 0x1fc   :  { %5875 = vmatpush1.bf16.msra.mxu0 %v5874_v44  ;;  %v1077_v44 = vld [vmem:[%s9251_s7 + $0xa0] sm:$0xff] }
 0x1fd   :  { %5316 = vmatpush3.msra.mxu1 %v885_v39  ;;  %5876 = vmatprep.subr.bf16.mxu0 %v6536_v20 }
 0x1fe   :  { %5318 = vmatmul.mubr.msk.f32.vlgmr.msra.gmra.mrb[6].mxu1 %vm888_vm8, %v887_v42  ;;  %5730 = vmatprep.subr.bf16.mxu1 %v5725_v36  ;;  %v1613_v42 = vld [vmem:[%s9253_s9 + $0x10] sm:$0xff] }
 0x1ff   :  { %5732 = vmatpush3.bf16.msra.mxu1 %v5725_v36  ;;  %5326 = vmatprep.mubr.msk.f32.mxu1 %vm888_vm8, %v970_v43  ;;  %v1057_v36 = vld [vmem:[%s9251_s7] sm:$0xff] }
 0x200   :  { %5324 = vmatprep.subr.mxu1 %v885_v39  ;;  %v5763_v49 = vpack.c.bf16 %v1059_v37, %v1057_v36  ;;  %v1075_v36 = vld [vmem:[%s9251_s7 + $0x90] sm:$0xff]  ;;  %v1078_v37 = vld [vmem:[%s9251_s7 + $0xa8] sm:$0xff] }
 0x203   :  { %5325 = vmatpush3.msra.mxu1 %v885_v39 }
 0x204   :  { %5327 = vmatmul.mubr.msk.f32.vlgmr.msra.gmra.mrb[8].mxu1 %vm888_vm8, %v971_v51  ;;  %5734 = vmatprep.subr.bf16.mxu1 %v5733_v50  ;;  %v1064_v50 = vld [vmem:[%s9251_s7 + $0x38] sm:$0xff]  ;;  %v5877_v51 = vpack.c.bf16 %v1614_v45, %v1613_v42  ;;  %v1079_v45 = vld [vmem:[%s9251_s7 + $0xb0] sm:$0xff] }
 0x205   :  { %5736 = vmatpush1.bf16.msra.mxu1 %v5735_v52  ;;  %1190 = vmatprep.mubr.f32.mxu1 %v6534_v7  ;;  %v1615_v52 = vld [vmem:[%s9253_s9 + $0x20] sm:$0xff]  ;;  %v5765_v62 = vpack.c.bf16 %v1064_v50, %v1062_v47  ;;  %v1084_v47 = vld [vmem:[%s9251_s7 + $0xd8] sm:$0xff]  ;;  %v1625_v50 = vld [vmem:[%s9253_s9 + $0x70] sm:$0xff] }
 0x206   :  { %5738 = vmatprep.subr.bf16.mxu1 %v5737_v53  ;;  %v1616_v53 = vld [vmem:[%s9253_s9 + $0x28] sm:$0xff]  ;;  %5878 = vmatpush1.bf16.msra.mxu0 %v5877_v51  ;;  %v1626_v51 = vld [vmem:[%s9253_s9 + $0x78] sm:$0xff] }
 0x207   :  { %5879 = vmatprep.subr.bf16.mxu0 %v6536_v20 }
 0x209   :  { %5740 = vmatpush1.bf16.msra.mxu1 %v5739_v58 }
 0x20a   :  { %5742 = vmatprep.subr.bf16.mxu1 %v5741_v59 }
 0x20d   :  { %5744 = vmatpush1.bf16.msra.mxu1 %v5743_v0  ;;  %v1063_v0 = vld [vmem:[%s9251_s7 + $0x30] sm:$0xff] }
 0x20e   :  { %5746 = vmatprep.subr.bf16.mxu1 %v5745_v1  ;;  %v5880_v1 = vpack.c.bf16 %v1616_v53, %v1615_v52  ;;  %v5783_v52 = vpack.c.bf16 %v1079_v45, %v1077_v44  ;;  %v4834_v45 = vld [vmem:[%s9251_s7 + $0x2a0] sm:$0xff] }
 0x210   :  { %5881 = vmatpush1.bf16.msra.mxu0 %v5880_v1  ;;  %v4812_v1 = vld [vmem:[%s9251_s7 + $0x1f0] sm:$0xff] }
 0x211   :  { %5748 = vmatpush1.bf16.msra.mxu1 %v5747_v13  ;;  %v1068_v13 = vld [vmem:[%s9251_s7 + $0x58] sm:$0xff]  ;;  %5882 = vmatprep.subr.bf16.mxu0 %v6536_v20 }
 0x212   :  { %5750 = vmatprep.subr.bf16.mxu1 %v5749_v8  ;;  %v5769_v21 = vpack.c.bf16 %v1068_v13, %v1066_v3  ;;  %v4817_v3 = vld [vmem:[%s9251_s7 + $0x218] sm:$0xff]  ;;  %v1085_v13 = vld [vmem:[%s9251_s7 + $0xe0] sm:$0xff] }
 0x215   :  { %5752 = vmatpush1.bf16.msra.mxu1 %v5751_v12  ;;  %v5767_v12 = vpack.c.bf16 %v1063_v0, %v1061_v63  ;;  %v4810_v0 = vld [vmem:[%s9251_s7 + $0x1e0] sm:$0xff] }
 0x216   :  { %5754 = vmatprep.subr.bf16.mxu1 %v5753_v17  ;;  %v1070_v17 = vld [vmem:[%s9251_s7 + $0x68] sm:$0xff] }
 0x217   :  { %v5773_v24 = vpack.c.bf16 %v1072_v18, %v1070_v17  ;;  %v4821_v17 = vld [vmem:[%s9251_s7 + $0x238] sm:$0xff] }
 0x219   :  { %5756 = vmatpush1.bf16.msra.mxu1 %v5755_v19  ;;  %v5883_v19 = vpack.c.bf16 %v1618_v11, %v1617_v9  ;;  %v5791_v11 = vpack.c.bf16 %v4812_v1, %v4810_v0 }
 0x21a   :  { %5758 = vmatprep.subr.bf16.mxu1 %v5757_v23  ;;  %v5771_v23 = vpack.c.bf16 %v1067_v16, %v1065_v15  ;;  %v4816_v15 = vld [vmem:[%s9251_s7 + $0x210] sm:$0xff]  ;;  %v4819_v16 = vld [vmem:[%s9251_s7 + $0x228] sm:$0xff] }
 0x21b   :  { %5884 = vmatpush1.bf16.msra.mxu0 %v5883_v19  ;;  %v5797_v19 = vpack.c.bf16 %v4821_v17, %v4819_v16  ;;  %v4860_v16 = vld [vmem:[%s9251_s7 + $0x368] sm:$0xff] }
 0x21c   :  { %5885 = vmatprep.subr.bf16.mxu0 %v6536_v20 }
 0x21d   :  { %5760 = vmatpush1.bf16.msra.mxu1 %v5759_v26  ;;  %v1071_v26 = vld [vmem:[%s9251_s7 + $0x70] sm:$0xff] }
 0x21e   :  { %1154 = vmatprep.subr.mxu1 %v4807_v27  ;;  %v1074_v27 = vld [vmem:[%s9251_s7 + $0x88] sm:$0xff] }
 0x21f   :  { %5887 = vmatpush1.bf16.msra.mxu0 %v5886_v29  ;;  %v4829_v29 = vld [vmem:[%s9251_s7 + $0x278] sm:$0xff] }
 0x220   :  { %5888 = vmatprep.subr.bf16.mxu0 %v6536_v20 }
 0x221   :  { %1155 = vmatpush1.msra.mxu1 %v4806_v28  ;;  %v1076_v28 = vld [vmem:[%s9251_s7 + $0x98] sm:$0xff] }
 0x222   :  { %5762 = vmatprep.subr.bf16.mxu1 %v5761_v32  ;;  %v1622_v32 = vld [vmem:[%s9253_s9 + $0x58] sm:$0xff] }
 0x2d1   :  { %v5319_v33 = vpop.f32.mrb[6].mxu1 }
 0x2d2   :  { %v961_v34 = vpop.f32.mrb[7].mxu1 }
 0x2d7   :  { %v5328_v35 = vpop.f32.mrb[8].mxu1 }
 0x2d8   :  { %v1054_v38 = vmax.f32 %v5319_v33, %v5328_v35  ;;  %v1044_v39 = vpop.f32.mrb[9].mxu1  ;;  %v5775_v33 = vpack.c.bf16 %v1071_v26, %v1069_v25  ;;  %v1073_v35 = vld [vmem:[%s9251_s7 + $0x80] sm:$0xff] }
 0x2d9   :  { %v1053_v43 = vmax.f32 %v961_v34, %v1044_v39  ;;  %v5777_v34 = vpack.c.bf16 %v1076_v28, %v1074_v27  ;;  %v5889_v39 = vpack.c.bf16 %v1622_v32, %v1621_v31  ;;  %v5779_v42 = vpack.c.bf16 %v1075_v36, %v1073_v35  ;;  %v4822_v26 = vld [vmem:[%s9251_s7 + $0x240] sm:$0xff]  ;;  %v4824_v27 = vld [vmem:[%s9251_s7 + $0x250] sm:$0xff]  ;;  %v4827_v28 = vld [vmem:[%s9251_s7 + $0x268] sm:$0xff] }
 0x2da   :  { %v1056_v46 = vmax.f32 %v1054_v38, 0.0  ;;  %v1080_v38 = vld [vmem:[%s9251_s7 + $0xb8] sm:$0xff]  ;;  %v5803_v31 = vpack.c.bf16 %v4824_v27, %v4822_v26  ;;  %v5805_v32 = vpack.c.bf16 %v4829_v29, %v4827_v28  ;;  %v4831_v35 = vld [vmem:[%s9251_s7 + $0x288] sm:$0xff]  ;;  %v4863_v26 = vld [vmem:[%s9251_s7 + $0x380] sm:$0xff] }
 0x2db   :  { %v7215_v48 = vmax.f32 %v1053_v43, 0.0  ;;  %v5781_v43 = vpack.c.bf16 %v1080_v38, %v1078_v37  ;;  %5890 = vmatpush1.bf16.msra.mxu0 %v5889_v39  ;;  %v4833_v36 = vld [vmem:[%s9251_s7 + $0x298] sm:$0xff]  ;;  %v4830_v39 = vld [vmem:[%s9251_s7 + $0x280] sm:$0xff]  ;;  %v4868_v28 = vld [vmem:[%s9251_s7 + $0x3a8] sm:$0xff] }
 0x2dc   :  { %v1121_v54 = vrot.slane %v1056_v46, 1  ;;  %v1302_v55 = vrot.slane %v1056_v46, 2  ;;  %v1411_v56 = vrot.slane %v1056_v46, 3  ;;  %v1520_v57 = vrot.slane %v1056_v46, 4  ;;  %v1082_v46 = vld [vmem:[%s9251_s7 + $0xc8] sm:$0xff]  ;;  %5891 = vmatprep.subr.bf16.mxu0 %v6536_v20  ;;  %v4866_v27 = vld [vmem:[%s9251_s7 + $0x398] sm:$0xff] }
 0x2dd   :  { %v1120_v58 = vrot.slane %v7215_v48, 1  ;;  %v1301_v59 = vrot.slane %v7215_v48, 2  ;;  %v1410_v60 = vrot.slane %v7215_v48, 3  ;;  %v1519_v61 = vrot.slane %v7215_v48, 4 }
 0x2de   :  { %v5785_v53 = vpack.c.bf16 %v1084_v47, %v1082_v46  ;;  %v5809_v38 = vpack.c.bf16 %v4833_v36, %v4831_v35  ;;  %v4836_v46 = vld [vmem:[%s9251_s7 + $0x2b0] sm:$0xff]  ;;  %v4870_v35 = vld [vmem:[%s9251_s7 + $0x3b8] sm:$0xff]  ;;  %v4873_v36 = vld [vmem:[%s9251_s7 + $0x3c8] sm:$0xff] }
 0x2df   :  { %v1122_v2 = vsel %vm82_vm3, %v1120_v58, %v1121_v54  ;;  %v7245_v4 = vsel %vm291_vm5, %v1301_v59, %v1302_v55  ;;  %v7248_v6 = vsel %vm409_vm6, %v1410_v60, %v1411_v56  ;;  %v7251_v8 = vsel %vm97_vm0, %v1519_v61, %v1520_v57  ;;  %v1081_v54 = vld [vmem:[%s9251_s7 + $0xc0] sm:$0xff]  ;;  %v1083_v55 = vld [vmem:[%s9251_s7 + $0xd0] sm:$0xff]  ;;  %v1628_v58 = vld [vmem:[%s9253_s9 + $0x88] sm:$0xff] }
 0x2e0   :  { %4808 = vmatmul.mubr.msk.f32.vlgmr.msra.gmra.mrb[10].mxu1 %vm1123_vm9, %v1122_v2  ;;  %v5895_v56 = vpack.c.bf16 %v1626_v51, %v1625_v50  ;;  %v1627_v57 = vld [vmem:[%s9253_s9 + $0x80] sm:$0xff]  ;;  %v5787_v59 = vpack.c.bf16 %v1083_v55, %v1081_v54  ;;  %v1086_v60 = vld [vmem:[%s9251_s7 + $0xe8] sm:$0xff]  ;;  %v5815_v47 = vpack.c.bf16 %v4836_v46, %v4834_v45  ;;  %v4842_v50 = vld [vmem:[%s9251_s7 + $0x2d8] sm:$0xff] }
 0x2e1   :  { %5764 = vmatpush1.bf16.msra.mxu1 %v5763_v49  ;;  %1263 = vmatprep.mubr.f32.mxu1 %v6534_v7  ;;  %v5892_v49 = vpack.c.bf16 %v1624_v41, %v1623_v40  ;;  %v4811_v61 = vld [vmem:[%s9251_s7 + $0x1e8] sm:$0xff]  ;;  %v5898_v63 = vpack.c.bf16 %v1628_v58, %v1627_v57  ;;  %v4832_v40 = vld [vmem:[%s9251_s7 + $0x290] sm:$0xff]  ;;  %v4846_v54 = vld [vmem:[%s9251_s7 + $0x2f8] sm:$0xff] }
 0x2e2   :  { %5766 = vmatprep.subr.bf16.mxu1 %v5765_v62  ;;  %v4813_v62 = vld [vmem:[%s9251_s7 + $0x1f8] sm:$0xff]  ;;  %v4815_v2 = vld [vmem:[%s9251_s7 + $0x208] sm:$0xff]  ;;  %v4876_v46 = vld [vmem:[%s9251_s7 + $0x3e0] sm:$0xff] }
 0x2e3   :  { %5893 = vmatpush1.bf16.msra.mxu0 %v5892_v49  ;;  %v5789_v9 = vpack.c.bf16 %v4813_v62, %v4811_v61  ;;  %v4835_v41 = vld [vmem:[%s9251_s7 + $0x2a8] sm:$0xff]  ;;  %v4847_v61 = vld [vmem:[%s9251_s7 + $0x300] sm:$0xff]  ;;  %v4850_v62 = vld [vmem:[%s9251_s7 + $0x318] sm:$0xff] }
 0x2e4   :  { %5894 = vmatprep.subr.bf16.mxu0 %v6536_v20  ;;  %v4839_v49 = vld [vmem:[%s9251_s7 + $0x2c8] sm:$0xff] }
 0x2e5   :  { %5768 = vmatpush1.bf16.msra.mxu1 %v5767_v12  ;;  %v5793_v12 = vpack.c.bf16 %v4817_v3, %v4815_v2  ;;  %v4844_v51 = vld [vmem:[%s9251_s7 + $0x2e8] sm:$0xff]  ;;  %v4849_v2 = vld [vmem:[%s9251_s7 + $0x310] sm:$0xff]  ;;  %v4851_v3 = vld [vmem:[%s9251_s7 + $0x320] sm:$0xff] }
 0x2e6   :  { %5770 = vmatprep.subr.bf16.mxu1 %v5769_v21  ;;  %v4814_v21 = vld [vmem:[%s9251_s7 + $0x200] sm:$0xff]  ;;  %v4848_v55 = vld [vmem:[%s9251_s7 + $0x308] sm:$0xff]  ;;  %v5817_v57 = vpack.c.bf16 %v4844_v51, %v4842_v50  ;;  %v4883_v50 = vld [vmem:[%s9251_s7 + $0x418] sm:$0xff] }
 0x2e7   :  { %5896 = vmatpush1.bf16.msra.mxu0 %v5895_v56  ;;  %v5795_v18 = vpack.c.bf16 %v4816_v15, %v4814_v21  ;;  %v4838_v56 = vld [vmem:[%s9251_s7 + $0x2c0] sm:$0xff]  ;;  %v4858_v15 = vld [vmem:[%s9251_s7 + $0x358] sm:$0xff] }
 0x2e8   :  { %5897 = vmatprep.subr.bf16.mxu0 %v6536_v20  ;;  %v4855_v21 = vld [vmem:[%s9251_s7 + $0x340] sm:$0xff] }
 0x2e9   :  { %5772 = vmatpush1.bf16.msra.mxu1 %v5771_v23  ;;  %v4823_v23 = vld [vmem:[%s9251_s7 + $0x248] sm:$0xff] }
 0x2ea   :  { %5774 = vmatprep.subr.bf16.mxu1 %v5773_v24  ;;  %v5799_v24 = vpack.c.bf16 %v4820_v30, %v4818_v22  ;;  %v4859_v22 = vld [vmem:[%s9251_s7 + $0x360] sm:$0xff]  ;;  %v4862_v30 = vld [vmem:[%s9251_s7 + $0x378] sm:$0xff] }
 0x2eb   :  { %5899 = vmatpush1.bf16.msra.mxu0 %v5898_v63  ;;  %v4852_v63 = vld [vmem:[%s9251_s7 + $0x328] sm:$0xff] }
 0x2ec   :  { %5900 = vmatprep.subr.bf16.mxu0 %v6536_v20  ;;  %v5825_v1 = vpack.c.bf16 %v4852_v63, %v4850_v62 }
 0x2ed   :  { %5776 = vmatpush1.bf16.msra.mxu1 %v5775_v33  ;;  %v4826_v33 = vld [vmem:[%s9251_s7 + $0x260] sm:$0xff] }
 0x2ee   :  { %5778 = vmatprep.subr.bf16.mxu1 %v5777_v34  ;;  %v4828_v34 = vld [vmem:[%s9251_s7 + $0x270] sm:$0xff] }
 0x2ef   :  { %v5807_v37 = vpack.c.bf16 %v4828_v34, %v4826_v33  ;;  %v4867_v33 = vld [vmem:[%s9251_s7 + $0x3a0] sm:$0xff] }
 0x2f1   :  { %5780 = vmatpush1.bf16.msra.mxu1 %v5779_v42  ;;  %v4837_v42 = vld [vmem:[%s9251_s7 + $0x2b8] sm:$0xff] }
 0x2f2   :  { %5782 = vmatprep.subr.bf16.mxu1 %v5781_v43  ;;  %v5811_v43 = vpack.c.bf16 %v4832_v40, %v4830_v39  ;;  %v5813_v44 = vpack.c.bf16 %v4837_v42, %v4835_v41  ;;  %v4874_v39 = vld [vmem:[%s9251_s7 + $0x3d0] sm:$0xff]  ;;  %v4877_v40 = vld [vmem:[%s9251_s7 + $0x3e8] sm:$0xff]  ;;  %v4879_v41 = vld [vmem:[%s9251_s7 + $0x3f8] sm:$0xff] }
 0x2f3   :  { %v4869_v42 = vld [vmem:[%s9251_s7 + $0x3b0] sm:$0xff]  ;;  %v5849_v45 = vpack.c.bf16 %v4879_v41, %v4877_v40 }
 0x2f4   :  { %v1711_v41 = vld [vmem:[%s9254_s10 + $0x30] sm:$0xff] }
 0x2f5   :  { %5784 = vmatpush1.bf16.msra.mxu1 %v5783_v52  ;;  %v4841_v52 = vld [vmem:[%s9251_s7 + $0x2d0] sm:$0xff] }
 0x2f6   :  { %5786 = vmatprep.subr.bf16.mxu1 %v5785_v53  ;;  %v4843_v53 = vld [vmem:[%s9251_s7 + $0x2e0] sm:$0xff] }
 0x2f7   :  { %v5819_v58 = vpack.c.bf16 %v4843_v53, %v4841_v52  ;;  %v4880_v53 = vld [vmem:[%s9251_s7 + $0x400] sm:$0xff] }
 0x2f9   :  { %5788 = vmatpush1.bf16.msra.mxu1 %v5787_v59  ;;  %v5821_v59 = vpack.c.bf16 %v4848_v55, %v4846_v54  ;;  %v4882_v54 = vld [vmem:[%s9251_s7 + $0x410] sm:$0xff]  ;;  %v4885_v55 = vld [vmem:[%s9251_s7 + $0x428] sm:$0xff] }
 0x2fa   :  { %1227 = vmatprep.subr.mxu1 %v1086_v60  ;;  %v4845_v60 = vld [vmem:[%s9251_s7 + $0x2f0] sm:$0xff] }
 0x2fb   :  { %v5823_v0 = vpack.c.bf16 %v4847_v61, %v4845_v60  ;;  %v4889_v60 = vld [vmem:[%s9251_s7 + $0x448] sm:$0xff]  ;;  %v4891_v61 = vld [vmem:[%s9251_s7 + $0x458] sm:$0xff] }
 0x2fc   :  { %v5861_v63 = vpack.c.bf16 %v4891_v61, %v4889_v60  ;;  %v1724_v60 = vld [vmem:[%s9254_s10 + $0x98] sm:$0xff] }
 0x2fd   :  { %1228 = vmatpush1.msra.mxu1 %v1085_v13  ;;  %v4854_v13 = vld [vmem:[%s9251_s7 + $0x338] sm:$0xff] }
 0x2fe   :  { %4809 = vmatmul.mubr.msk.f32.vlgmr.msra.gmra.mrb[10].mxu1 %vm1123_vm9, %v7215_v48  ;;  %5790 = vmatprep.subr.bf16.mxu1 %v5789_v9  ;;  %v4825_v48 = vld [vmem:[%s9251_s7 + $0x258] sm:$0xff]  ;;  %v5827_v9 = vpack.c.bf16 %v4851_v3, %v4849_v2  ;;  %v4893_v2 = vld [vmem:[%s9251_s7 + $0x468] sm:$0xff] }
 0x2ff   :  { %5792 = vmatpush1.bf16.msra.mxu1 %v5791_v11  ;;  %1370 = vmatprep.mubr.f32.mxu1 %v6534_v7  ;;  %v5801_v25 = vpack.c.bf16 %v4825_v48, %v4823_v23  ;;  %v4864_v23 = vld [vmem:[%s9251_s7 + $0x388] sm:$0xff]  ;;  %v4895_v3 = vld [vmem:[%s9251_s7 + $0x478] sm:$0xff] }
 0x300   :  { %5794 = vmatprep.subr.bf16.mxu1 %v5793_v12  ;;  %v4853_v12 = vld [vmem:[%s9251_s7 + $0x330] sm:$0xff] }
 0x301   :  { %v5831_v17 = vpack.c.bf16 %v4855_v21, %v4853_v12  ;;  %v4897_v12 = vld [vmem:[%s9251_s7 + $0x488] sm:$0xff]  ;;  %v4899_v21 = vld [vmem:[%s9251_s7 + $0x498] sm:$0xff] }
 0x303   :  { %5796 = vmatpush1.bf16.msra.mxu1 %v5795_v18  ;;  %v5833_v18 = vpack.c.bf16 %v4860_v16, %v4858_v15  ;;  %v5869_v16 = vpack.c.bf16 %v4899_v21, %v4897_v12  ;;  %v1950_v12 = vld [vmem:[%s9257_s13 + $0x10] sm:$0xff]  ;;  %v1951_v21 = vld [vmem:[%s9257_s13 + $0x18] sm:$0xff] }
 0x304   :  { %5798 = vmatprep.subr.bf16.mxu1 %v5797_v19  ;;  %v4857_v19 = vld [vmem:[%s9251_s7 + $0x350] sm:$0xff] }
 0x305   :  { %v5835_v48 = vpack.c.bf16 %v4859_v22, %v4857_v19  ;;  %v4901_v22 = vld [vmem:[%s9251_s7 + $0x4a8] sm:$0xff] }
 0x307   :  { %5800 = vmatpush1.bf16.msra.mxu1 %v5799_v24  ;;  %v5837_v24 = vpack.c.bf16 %v4864_v23, %v4862_v30  ;;  %v4900_v30 = vld [vmem:[%s9251_s7 + $0x4a0] sm:$0xff]  ;;  %v1629_v23 = vld [vmem:[%s9253_s9 + $0x90] sm:$0xff] }
 0x308   :  { %5802 = vmatprep.subr.bf16.mxu1 %v5801_v25  ;;  %v4861_v25 = vld [vmem:[%s9251_s7 + $0x370] sm:$0xff] }
 0x309   :  { %v5839_v29 = vpack.c.bf16 %v4863_v26, %v4861_v25  ;;  %v1597_v25 = vld [vmem:[%s9252_s8] sm:$0x3] }
 0x30a   :  { %v1602_v26 = vrot.slane %v1597_v25, %v7071_v5 }
 0x30b   :  { %5804 = vmatpush1.bf16.msra.mxu1 %v5803_v31  ;;  %v5841_v31 = vpack.c.bf16 %v4868_v28, %v4866_v27  ;;  %v1705_v27 = vld [vmem:[%s9254_s10] sm:$0xff]  ;;  %v1706_v28 = vld [vmem:[%s9254_s10 + $0x8] sm:$0xff] }
 0x30c   :  { %5806 = vmatprep.subr.bf16.mxu1 %v5805_v32  ;;  %v4865_v32 = vld [vmem:[%s9251_s7 + $0x390] sm:$0xff] }
 0x30d   :  { %v5843_v34 = vpack.c.bf16 %v4867_v33, %v4865_v32  ;;  %v5904_v33 = vpack.c.bf16 %v1706_v28, %v1705_v27  ;;  %v2292_v28 = vld [vmem:[%s9259_s15 + $0x18] sm:$0xff] }
 0x30f   :  { %5808 = vmatpush1.bf16.msra.mxu1 %v5807_v37  ;;  %v4875_v37 = vld [vmem:[%s9251_s7 + $0x3d8] sm:$0xff] }
 0x310   :  { %5810 = vmatprep.subr.bf16.mxu1 %v5809_v38  ;;  %v4872_v38 = vld [vmem:[%s9251_s7 + $0x3c0] sm:$0xff] }
 0x313   :  { %5812 = vmatpush1.bf16.msra.mxu1 %v5811_v43  ;;  %v5845_v43 = vpack.c.bf16 %v4875_v37, %v4873_v36  ;;  %v1708_v36 = vld [vmem:[%s9254_s10 + $0x18] sm:$0xff] }
 0x314   :  { %5814 = vmatprep.subr.bf16.mxu1 %v5813_v44  ;;  %v5847_v44 = vpack.c.bf16 %v4874_v39, %v4872_v38  ;;  %v1709_v38 = vld [vmem:[%s9254_s10 + $0x20] sm:$0xff]  ;;  %v1710_v39 = vld [vmem:[%s9254_s10 + $0x28] sm:$0xff] }
 0x315   :  { %v5910_v40 = vpack.c.bf16 %v1710_v39, %v1709_v38 }
 0x317   :  { %5816 = vmatpush1.bf16.msra.mxu1 %v5815_v47  ;;  %v4878_v47 = vld [vmem:[%s9251_s7 + $0x3f0] sm:$0xff] }
 0x318   :  { %1334 = vmatprep.subr.mxu1 %v4839_v49  ;;  %v4881_v49 = vld [vmem:[%s9251_s7 + $0x408] sm:$0xff]  ;;  %v5851_v51 = vpack.c.bf16 %v4878_v47, %v4876_v46  ;;  %v1715_v47 = vld [vmem:[%s9254_s10 + $0x50] sm:$0xff] }
 0x319   :  { %v5853_v52 = vpack.c.bf16 %v4883_v50, %v4881_v49  ;;  %v1716_v49 = vld [vmem:[%s9254_s10 + $0x58] sm:$0xff] }
 0x31a   :  { %v5919_v50 = vpack.c.bf16 %v1716_v49, %v1715_v47  ;;  %v4913_v47 = vld [vmem:[%s9257_s13 + $0x78] sm:$0xff] }
 0x31b   :  { %1335 = vmatpush1.msra.mxu1 %v4838_v56  ;;  %v5855_v56 = vpack.c.bf16 %v4882_v54, %v4880_v53  ;;  %v1719_v54 = vld [vmem:[%s9254_s10 + $0x70] sm:$0xff] }
 0x31c   :  { %4840 = vmatmul.mubr.msk.f32.vlgmr.msra.gmra.mrb[10].mxu1 %vm1123_vm9, %v7245_v4  ;;  %5818 = vmatprep.subr.bf16.mxu1 %v5817_v57  ;;  %v4856_v4 = vld [vmem:[%s9251_s7 + $0x348] sm:$0xff] }
 0x31d   :  { %5820 = vmatpush1.bf16.msra.mxu1 %v5819_v58  ;;  %1479 = vmatprep.mubr.f32.mxu1 %v6534_v7  ;;  %v5829_v11 = vpack.c.bf16 %v4856_v4, %v4854_v13  ;;  %v4884_v58 = vld [vmem:[%s9251_s7 + $0x420] sm:$0xff]  ;;  %v5865_v4 = vpack.c.bf16 %v4895_v3, %v4893_v2 }
 0x31e   :  { %5822 = vmatprep.subr.bf16.mxu1 %v5821_v59  ;;  %v4886_v59 = vld [vmem:[%s9251_s7 + $0x430] sm:$0xff] }
 0x31f   :  { %v5859_v62 = vpack.c.bf16 %v4886_v59, %v4884_v58  ;;  %v1723_v59 = vld [vmem:[%s9254_s10 + $0x90] sm:$0xff] }
 0x320   :  { %v5931_v61 = vpack.c.bf16 %v1724_v60, %v1723_v59  ;;  %v4921_v59 = vld [vmem:[%s9257_s13 + $0xb0] sm:$0xff]  ;;  %v4922_v60 = vld [vmem:[%s9257_s13 + $0xb8] sm:$0xff] }
 0x321   :  { %5824 = vmatpush1.bf16.msra.mxu1 %v5823_v0  ;;  %v4888_v0 = vld [vmem:[%s9251_s7 + $0x440] sm:$0xff] }
 0x322   :  { %5826 = vmatprep.subr.bf16.mxu1 %v5825_v1  ;;  %v4890_v1 = vld [vmem:[%s9251_s7 + $0x450] sm:$0xff] }
 0x323   :  { %v5863_v13 = vpack.c.bf16 %v4890_v1, %v4888_v0  ;;  %v1948_v0 = vld [vmem:[%s9257_s13] sm:$0xff]  ;;  %v1949_v1 = vld [vmem:[%s9257_s13 + $0x8] sm:$0xff] }
 0x325   :  { %5828 = vmatpush1.bf16.msra.mxu1 %v5827_v9  ;;  %v4892_v9 = vld [vmem:[%s9251_s7 + $0x460] sm:$0xff] }
 0x326   :  { %5830 = vmatprep.subr.bf16.mxu1 %v5829_v11  ;;  %v4894_v11 = vld [vmem:[%s9251_s7 + $0x470] sm:$0xff] }
 0x327   :  { %v5867_v15 = vpack.c.bf16 %v4894_v11, %v4892_v9  ;;  %v1871_v9 = vld [vmem:[%s9256_s12] sm:$0xf]  ;;  %v5934_v11 = vpack.c.bf16 %v1949_v1, %v1948_v0  ;;  %v4925_v1 = vld [vmem:[%s9257_s13 + $0xd0] sm:$0xff] }
 0x329   :  { %5832 = vmatpush1.bf16.msra.mxu1 %v5831_v17  ;;  %v4896_v17 = vld [vmem:[%s9251_s7 + $0x480] sm:$0xff] }
 0x32a   :  { %5834 = vmatprep.subr.bf16.mxu1 %v5833_v18  ;;  %v4898_v18 = vld [vmem:[%s9251_s7 + $0x490] sm:$0xff] }
 0x32b   :  { %v5871_v19 = vpack.c.bf16 %v4898_v18, %v4896_v17  ;;  %v1953_v17 = vld [vmem:[%s9257_s13 + $0x28] sm:$0xff] }
 0x32d   :  { %5836 = vmatpush1.bf16.msra.mxu1 %v5835_v48  ;;  %v1630_v48 = vld [vmem:[%s9253_s9 + $0x98] sm:$0xff] }
 0x32e   :  { %5838 = vmatprep.subr.bf16.mxu1 %v5837_v24  ;;  %v5901_v24 = vpack.c.bf16 %v1630_v48, %v1629_v23  ;;  %v1956_v23 = vld [vmem:[%s9257_s13 + $0x40] sm:$0xff]  ;;  %v1957_v48 = vld [vmem:[%s9257_s13 + $0x48] sm:$0xff] }
 0x330   :  { %5902 = vmatpush1.bf16.msra.mxu0 %v5901_v24  ;;  %v5946_v24 = vpack.c.bf16 %v1957_v48, %v1956_v23  ;;  %v4936_v23 = vld [vmem:[%s9257_s13 + $0x120] sm:$0xff]  ;;  %v4937_v48 = vld [vmem:[%s9257_s13 + $0x128] sm:$0xff] }
 0x331   :  { %5840 = vmatpush1.bf16.msra.mxu1 %v5839_v29  ;;  %5903 = vmatprep.subr.bf16.mxu0 %v6536_v20 }
 0x332   :  { %5842 = vmatprep.subr.bf16.mxu1 %v5841_v31 }
 0x335   :  { %5844 = vmatpush1.bf16.msra.mxu1 %v5843_v34 }
 0x336   :  { %1443 = vmatprep.subr.mxu1 %v4870_v35  ;;  %v1707_v35 = vld [vmem:[%s9254_s10 + $0x10] sm:$0xff] }
 0x337   :  { %v5907_v37 = vpack.c.bf16 %v1708_v36, %v1707_v35  ;;  %v4909_v35 = vld [vmem:[%s9257_s13 + $0x58] sm:$0xff] }
 0x339   :  { %1444 = vmatpush1.msra.mxu1 %v4869_v42  ;;  %v1712_v42 = vld [vmem:[%s9254_s10 + $0x38] sm:$0xff] }
 0x33a   :  { %4871 = vmatmul.mubr.msk.f32.vlgmr.msra.gmra.mrb[10].mxu1 %vm1123_vm9, %v7248_v6  ;;  %5846 = vmatprep.subr.bf16.mxu1 %v5845_v43  ;;  %v4887_v6 = vld [vmem:[%s9251_s7 + $0x438] sm:$0xff]  ;;  %v5913_v43 = vpack.c.bf16 %v1712_v42, %v1711_v41 }
 0x33b   :  { %5848 = vmatpush1.bf16.msra.mxu1 %v5847_v44  ;;  %1588 = vmatprep.mubr.f32.mxu1 %v6534_v7  ;;  %v5857_v57 = vpack.c.bf16 %v4887_v6, %v4885_v55  ;;  %v1713_v44 = vld [vmem:[%s9254_s10 + $0x40] sm:$0xff]  ;;  %v1720_v55 = vld [vmem:[%s9254_s10 + $0x78] sm:$0xff] }
 0x33c   :  { %5850 = vmatprep.subr.bf16.mxu1 %v5849_v45  ;;  %v1714_v45 = vld [vmem:[%s9254_s10 + $0x48] sm:$0xff]  ;;  %v5925_v6 = vpack.c.bf16 %v1720_v55, %v1719_v54  ;;  %v4917_v54 = vld [vmem:[%s9257_s13 + $0x98] sm:$0xff] }
 0x33d   :  { %v5916_v46 = vpack.c.bf16 %v1714_v45, %v1713_v44  ;;  %v4911_v44 = vld [vmem:[%s9257_s13 + $0x68] sm:$0xff] }
 0x33f   :  { %5852 = vmatpush1.bf16.msra.mxu1 %v5851_v51  ;;  %v1717_v51 = vld [vmem:[%s9254_s10 + $0x60] sm:$0xff] }
 0x340   :  { %5854 = vmatprep.subr.bf16.mxu1 %v5853_v52  ;;  %v1718_v52 = vld [vmem:[%s9254_s10 + $0x68] sm:$0xff] }
 0x341   :  { %v5922_v53 = vpack.c.bf16 %v1718_v52, %v1717_v51  ;;  %v4915_v51 = vld [vmem:[%s9257_s13 + $0x88] sm:$0xff] }
 0x343   :  { %5856 = vmatpush1.bf16.msra.mxu1 %v5855_v56  ;;  %v1721_v56 = vld [vmem:[%s9254_s10 + $0x80] sm:$0xff] }
 0x344   :  { %5858 = vmatprep.subr.bf16.mxu1 %v5857_v57  ;;  %v1722_v57 = vld [vmem:[%s9254_s10 + $0x88] sm:$0xff] }
 0x345   :  { %v5928_v58 = vpack.c.bf16 %v1722_v57, %v1721_v56  ;;  %v4920_v56 = vld [vmem:[%s9257_s13 + $0xa8] sm:$0xff] }
 0x347   :  { %5860 = vmatpush1.bf16.msra.mxu1 %v5859_v62 }
 0x348   :  { %5862 = vmatprep.subr.bf16.mxu1 %v5861_v63 }
 0x34b   :  { %5864 = vmatpush1.bf16.msra.mxu1 %v5863_v13 }
 0x34c   :  { %5866 = vmatprep.subr.bf16.mxu1 %v5865_v4  ;;  %v1796_v4 = vld [vmem:[%s9255_s11] sm:$0xf] }
 0x34f   :  { %5868 = vmatpush1.bf16.msra.mxu1 %v5867_v15  ;;  %v5937_v15 = vpack.c.bf16 %v1951_v21, %v1950_v12  ;;  %v4931_v12 = vld [vmem:[%s9257_s13 + $0xf8] sm:$0xff] }
 0x350   :  { %5870 = vmatprep.subr.bf16.mxu1 %v5869_v16  ;;  %v1952_v16 = vld [vmem:[%s9257_s13 + $0x20] sm:$0xff] }
 0x351   :  { %v5940_v18 = vpack.c.bf16 %v1953_v17, %v1952_v16  ;;  %v4932_v16 = vld [vmem:[%s9257_s13 + $0x100] sm:$0xff]  ;;  %v4933_v17 = vld [vmem:[%s9257_s13 + $0x108] sm:$0xff] }
 0x353   :  { %5872 = vmatpush1.bf16.msra.mxu1 %v5871_v19  ;;  %v1954_v19 = vld [vmem:[%s9257_s13 + $0x30] sm:$0xff] }
 0x354   :  { %1552 = vmatprep.subr.mxu1 %v4901_v22  ;;  %v1955_v22 = vld [vmem:[%s9257_s13 + $0x38] sm:$0xff] }
 0x357   :  { %1553 = vmatpush1.msra.mxu1 %v4900_v30  ;;  %v5943_v30 = vpack.c.bf16 %v1955_v22, %v1954_v19  ;;  %v4934_v19 = vld [vmem:[%s9257_s13 + $0x110] sm:$0xff]  ;;  %v4935_v22 = vld [vmem:[%s9257_s13 + $0x118] sm:$0xff] }
 0x358   :  { %4902 = vmatmul.mubr.msk.f32.vlgmr.msra.gmra.mrb[10].mxu1 %vm1123_vm9, %v7251_v8  ;;  %5329 = vmatprep.subr.mxu1 %v6534_v7  ;;  %v1606_v8 = vrot.slane %v1597_v25, %v7066_v14  ;;  %v2289_v25 = vld [vmem:[%s9259_s15] sm:$0xff] }
 0x359   :  { %5331 = vmatprep.mubr.msk.f32.mxu1 %vm6537_vm11, %v6534_v7 }
 0x42b   :  { %v1590_v29 = vpop.f32.mrb[10].mxu1 }
 0x42c   :  { %v1592_v31 = vpop.f32.mrb[11].mxu1  ;;  %v1609_v34 = vadd.f32 %v1602_v26, %v1590_v29  ;;  %v2291_v26 = vld [vmem:[%s9259_s15 + $0x10] sm:$0xff] }
 0x42d   :  { %v1610_v32 = vadd.f32 %v1606_v8, %v1592_v31  ;;  %v2290_v8 = vld [vmem:[%s9259_s15 + $0x8] sm:$0xff]  ;;  %v5997_v29 = vpack.c.bf16 %v2292_v28, %v2291_v26  ;;  %v2293_v31 = vld [vmem:[%s9259_s15 + $0x20] sm:$0xff] }
 0x42e   :  { %v5994_v27 = vpack.c.bf16 %v2290_v8, %v2289_v25  ;;  %v4938_v25 = vld [vmem:[%s9257_s13 + $0x130] sm:$0xff]  ;;  %v4939_v8 = vld [vmem:[%s9257_s13 + $0x138] sm:$0xff]  ;;  %v4948_v28 = vld [vmem:[%s9266_s26 + $0x48] sm:$0xff] }
 0x42f   :  { %4903 = vmatprep.mubr.msk.f32.mxu0 %vm1631_vm10, %v1610_v32  ;;  %v5991_v26 = vpack.c.bf16 %v4939_v8, %v4938_v25 }
 0x430   :  { %1700 = vmatmul.mubr.f32.vlgmr.msra.gmra.mrb[12].mxu0 %v1609_v34 }
 0x431   :  { %5905 = vmatpush1.bf16.msra.mxu0 %v5904_v33  ;;  %4904 = vmatprep.mubr.msk.f32.mxu0 %vm1631_vm10, %v1610_v32  ;;  %v2294_v32 = vld [vmem:[%s9259_s15 + $0x28] sm:$0xff] }
 0x432   :  { %5906 = vmatprep.subr.bf16.mxu0 %v6536_v20  ;;  %v6000_v33 = vpack.c.bf16 %v2294_v32, %v2293_v31  ;;  %v2295_v31 = vld [vmem:[%s9259_s15 + $0x30] sm:$0x3] }
 0x435   :  { %5908 = vmatpush1.bf16.msra.mxu0 %v5907_v37 }
 0x436   :  { %5909 = vmatprep.subr.bf16.mxu0 %v6536_v20 }
 0x439   :  { %5911 = vmatpush1.bf16.msra.mxu0 %v5910_v40 }
 0x43a   :  { %5912 = vmatprep.subr.bf16.mxu0 %v6536_v20 }
 0x43d   :  { %5914 = vmatpush1.bf16.msra.mxu0 %v5913_v43  ;;  %v4910_v43 = vld [vmem:[%s9257_s13 + $0x60] sm:$0xff] }
 0x43e   :  { %5915 = vmatprep.subr.bf16.mxu0 %v6536_v20  ;;  %v5952_v45 = vpack.c.bf16 %v4911_v44, %v4910_v43 }
 0x441   :  { %5917 = vmatpush1.bf16.msra.mxu0 %v5916_v46  ;;  %v4912_v46 = vld [vmem:[%s9257_s13 + $0x70] sm:$0xff] }
 0x442   :  { %5918 = vmatprep.subr.bf16.mxu0 %v6536_v20  ;;  %v5955_v49 = vpack.c.bf16 %v4913_v47, %v4912_v46  ;;  %v7954_v46 = vld [vmem:[%s9269_s29 + $0x20] sm:$0xff]  ;;  %v7959_v47 = vld [vmem:[%s9269_s29 + $0x28] sm:$0xff] }
 0x443   :  { %v2619_v8 = vrot.slane %v7954_v46, 2 }
 0x445   :  { %5920 = vmatpush1.bf16.msra.mxu0 %v5919_v50  ;;  %v4914_v50 = vld [vmem:[%s9257_s13 + $0x80] sm:$0xff] }
 0x446   :  { %5921 = vmatprep.subr.bf16.mxu0 %v6536_v20  ;;  %v5958_v52 = vpack.c.bf16 %v4915_v51, %v4914_v50  ;;  %v2397_v50 = vld [vmem:[%s9266_s26 + $0x18] sm:$0xff] }
 0x449   :  { %5923 = vmatpush1.bf16.msra.mxu0 %v5922_v53  ;;  %v4916_v53 = vld [vmem:[%s9257_s13 + $0x90] sm:$0xff] }
 0x44a   :  { %5924 = vmatprep.subr.bf16.mxu0 %v6536_v20  ;;  %v5961_v55 = vpack.c.bf16 %v4917_v54, %v4916_v53  ;;  %v2415_v53 = vrot.slane %v7959_v47, 1  ;;  %v7976_v54 = vld [vmem:[%s9269_s29 + $0x30] sm:$0xff] }
 0x44d   :  { %5926 = vmatpush1.bf16.msra.mxu0 %v5925_v6  ;;  %v4919_v6 = vld [vmem:[%s9257_s13 + $0xa0] sm:$0xff] }
 0x44e   :  { %5927 = vmatprep.subr.bf16.mxu0 %v6536_v20  ;;  %v5964_v57 = vpack.c.bf16 %v4920_v56, %v4919_v6  ;;  %v2394_v6 = vld [vmem:[%s9266_s26] sm:$0xff]  ;;  %v2396_v56 = vld [vmem:[%s9266_s26 + $0x10] sm:$0xff] }
 0x451   :  { %5929 = vmatpush1.bf16.msra.mxu0 %v5928_v58 }
 0x452   :  { %5930 = vmatprep.subr.bf16.mxu0 %v6536_v20 }
 0x455   :  { %5932 = vmatpush1.bf16.msra.mxu0 %v5931_v61  ;;  %v5967_v61 = vpack.c.bf16 %v4922_v60, %v4921_v59  ;;  %v2417_v60 = vrot.slane %v7976_v54, 1 }
 0x456   :  { %5334 = vmatprep.subr.mxu0 %v6534_v7 }
 0x458   :  { %1790 = vmatmul.mubr.f32.vlgmr.msra.gmra.mrb[14].mxu0 %v1609_v34  ;;  %v4908_v34 = vld [vmem:[%s9257_s13 + $0x50] sm:$0xff] }
 0x459   :  { %5336 = vmatprep.mubr.msk.f32.mxu0 %vm6537_vm11, %v6534_v7  ;;  %v5949_v41 = vpack.c.bf16 %v4909_v35, %v4908_v34  ;;  %v4947_v34 = vld [vmem:[%s9266_s26 + $0x40] sm:$0xff]  ;;  %v4949_v35 = vld [vmem:[%s9266_s26 + $0x50] sm:$0xff] }
 0x503   :  { %v1701_v62 = vpop.f32.mrb[12].mxu0 }
 0x504   :  { %v1703_v63 = vpop.f32.mrb[13].mxu0 }
 0x505   :  { %v4924_v63 = vld [vmem:[%s9257_s13 + $0xc8] sm:$0xff] }
 0x52b   :  { %v1791_v2 = vpop.f32.mrb[14].mxu0 }
 0x52c   :  { %v1795_v3 = vmax.f32 %v1701_v62, %v1791_v2  ;;  %v1793_v13 = vpop.f32.mrb[15].mxu0  ;;  %v4923_v62 = vld [vmem:[%s9257_s13 + $0xc0] sm:$0xff]  ;;  %v4926_v2 = vld [vmem:[%s9257_s13 + $0xd8] sm:$0xff] }
 0x52d   :  { %v5970_v0 = vpack.c.bf16 %v4924_v63, %v4923_v62  ;;  %v4927_v13 = vld [vmem:[%s9257_s13 + $0xe0] sm:$0xff]  ;;  %v7997_v62 = vld [vmem:[%s9269_s29 + $0x38] sm:$0xf] }
 0x52e   :  { %5330 = vmatpush3.msra.mxu1 %v1795_v3  ;;  %5335 = vmatpush3.msra.mxu0 %v1795_v3  ;;  %v5973_v3 = vpack.c.bf16 %v4926_v2, %v4925_v1  ;;  %v2400_v1 = vld [vmem:[%s9266_s26 + $0x30] sm:$0xf]  ;;  %v4966_v2 = vld [vmem:[%s9266_s26 + $0x88] sm:$0xff] }
 0x52f   :  { %5332 = vmatmul.mubr.msk.f32.vlgmr.msra.gmra.mrb[12].mxu1 %vm1797_vm12, %v1796_v4  ;;  %5337 = vmatmul.mubr.msk.f32.vlgmr.msra.gmra.mrb[16].mxu0 %vm1797_vm12, %v1871_v9  ;;  %v4928_v4 = vld [vmem:[%s9257_s13 + $0xe8] sm:$0xff] }
 0x530   :  { %5933 = vmatprep.subr.bf16.mxu0 %v6536_v20  ;;  %5359 = vmatprep.mubr.msk.f32.mxu0 %vm6537_vm11, %v6534_v7  ;;  %v5976_v9 = vpack.c.bf16 %v4928_v4, %v4927_v13  ;;  %v2418_v13 = vsel %vm82_vm3, %v2415_v53, %v2417_v60  ;;  %v2419_v4 = vrot.slane %v7997_v62, 1 }
 0x531   :  { %5935 = vmatpush3.bf16.msra.mxu0 %v5934_v11  ;;  %5993 = vmatprep.subr.bf16.mxu1 %v6536_v20  ;;  %v4930_v11 = vld [vmem:[%s9257_s13 + $0xf0] sm:$0xff] }
 0x532   :  { %5936 = vmatprep.subr.bf16.mxu0 %v6536_v20  ;;  %5445 = vmatprep.mubr.msk.f32.mxu1 %vm6537_vm11, %v6534_v7  ;;  %v5979_v21 = vpack.c.bf16 %v4931_v12, %v4930_v11  ;;  %v2420_v12 = vsel %vm82_vm3, %v2417_v60, %v2419_v4  ;;  %v2978_v4 = vld [vmem:[%s9247_s3 + $0x8] sm:$0xff] }
 0x533   :  { %5995 = vmatpush3.bf16.msra.mxu1 %v5994_v27 }
 0x534   :  { %5996 = vmatprep.subr.bf16.mxu1 %v6536_v20 }
 0x535   :  { %5938 = vmatpush3.bf16.msra.mxu0 %v5937_v15 }
 0x536   :  { %5939 = vmatprep.subr.bf16.mxu0 %v6536_v20 }
 0x537   :  { %5998 = vmatpush3.bf16.msra.mxu1 %v5997_v29  ;;  %v4950_v29 = vld [vmem:[%s9266_s26 + $0x58] sm:$0xff] }
 0x538   :  { %5999 = vmatprep.subr.bf16.mxu1 %v6536_v20  ;;  %v6002_v32 = vpack.c.bf16 %v4950_v29, %v4948_v28  ;;  %v4980_v28 = vld [vmem:[%s9266_s26 + $0xd0] sm:$0xff]  ;;  %v4983_v29 = vld [vmem:[%s9266_s26 + $0xe8] sm:$0xff] }
 0x539   :  { %5941 = vmatpush3.bf16.msra.mxu0 %v5940_v18  ;;  %v5982_v18 = vpack.c.bf16 %v4933_v17, %v4932_v16  ;;  %v4970_v16 = vld [vmem:[%s9266_s26 + $0xa8] sm:$0xff]  ;;  %v4972_v17 = vld [vmem:[%s9266_s26 + $0xb8] sm:$0xf] }
 0x53a   :  { %5942 = vmatprep.subr.bf16.mxu0 %v6536_v20 }
 0x53b   :  { %6001 = vmatpush3.bf16.msra.mxu1 %v6000_v33  ;;  %v1947_v33 = vld [vmem:[%s9258_s14] sm:$0x1] }
 0x53c   :  { %5443 = vmatprep.subr.mxu1 %v6534_v7 }
 0x53d   :  { %5944 = vmatpush3.bf16.msra.mxu0 %v5943_v30  ;;  %v5985_v30 = vpack.c.bf16 %v4935_v22, %v4934_v19  ;;  %v6026_v19 = vpack.c.bf16 %v4972_v17, %v4970_v16  ;;  %v4969_v22 = vld [vmem:[%s9266_s26 + $0xa0] sm:$0xff]  ;;  %v3098_v16 = vld [vmem:[%s9248_s4 + $0x10] sm:$0xff] }
 0x53e   :  { %5945 = vmatprep.subr.bf16.mxu0 %v6536_v20 }
 0x53f   :  { %5444 = vmatpush3.msk.msra.mxu1 %vm2301_vm14, %v2295_v31  ;;  %v4985_v31 = vld [vmem:[%s9266_s26 + $0xf8] sm:$0xf] }
 0x540   :  { %6003 = vmatprep.subr.bf16.mxu1 %v6002_v32 }
 0x541   :  { %5947 = vmatpush3.bf16.msra.mxu0 %v5946_v24  ;;  %v5988_v24 = vpack.c.bf16 %v4937_v48, %v4936_v23  ;;  %v4979_v23 = vld [vmem:[%s9266_s26 + $0xc8] sm:$0xff]  ;;  %v4981_v48 = vld [vmem:[%s9266_s26 + $0xd8] sm:$0xff] }
 0x542   :  { %5948 = vmatprep.subr.bf16.mxu0 %v6536_v20  ;;  %v6032_v25 = vpack.c.bf16 %v4981_v48, %v4979_v23  ;;  %v3100_v23 = vld [vmem:[%s9248_s4 + $0x20] sm:$0xff]  ;;  %v3101_v48 = vld [vmem:[%s9248_s4 + $0x28] sm:$0xff] }
 0x602   :  { %v1867_v36 = vpop.f32.mrb[12].mxu1  ;;  %v1941_v37 = vpop.f32.mrb[16].mxu0 }
 0x603   :  { %v1945_v38 = vmax.f32 %v1867_v36, %v1941_v37  ;;  %v5333_v39 = vpop.f32.mrb[13].mxu1  ;;  %v5338_v40 = vpop.f32.mrb[17].mxu0  ;;  %v4952_v37 = vld [vmem:[%s9266_s26 + $0x68] sm:$0xff] }
 0x605   :  { %v7805_v42 = vmax.f32 %v1945_v38, 0.0  ;;  %v4954_v38 = vld [vmem:[%s9266_s26 + $0x78] sm:$0xf] }
 0x606   :  { %v6006_v44 = vpack.c.bf16 %v4954_v38, %v4952_v37  ;;  %v4984_v37 = vld [vmem:[%s9266_s26 + $0xf0] sm:$0xf]  ;;  %v4992_v38 = vld [vmem:[%s9266_s26 + $0x108] sm:$0xff] }
 0x607   :  { %5360 = vmatmul.mubr.msk.f32.vlgmr.msra.gmra.mrb[18].mxu0 %vm1958_vm13, %v7805_v42  ;;  %v2044_v58 = vrot.slane %v7805_v42, 1  ;;  %v2129_v15 = vrot.slane %v7805_v42, 2  ;;  %v2214_v27 = vrot.slane %v7805_v42, 3  ;;  %v4951_v42 = vld [vmem:[%s9266_s26 + $0x60] sm:$0xff] }
 0x608   :  { %5950 = vmatpush3.bf16.msra.mxu0 %v5949_v41  ;;  %5382 = vmatprep.mubr.msk.f32.mxu0 %vm6537_vm11, %v6534_v7  ;;  %v6004_v41 = vpack.c.bf16 %v4949_v35, %v4947_v34  ;;  %v6036_v35 = vpack.c.bf16 %v4985_v31, %v4983_v29 }
 0x609   :  { %5951 = vmatprep.subr.bf16.mxu0 %v6536_v20 }
 0x60c   :  { %5953 = vmatpush3.bf16.msra.mxu0 %v5952_v45  ;;  %v4953_v45 = vld [vmem:[%s9266_s26 + $0x70] sm:$0xf] }
 0x60d   :  { %5954 = vmatprep.subr.bf16.mxu0 %v6536_v20  ;;  %v6009_v51 = vpack.c.bf16 %v4953_v45, %v4951_v42  ;;  %v2735_v45 = vrot.slane %v7954_v46, 3 }
 0x610   :  { %5956 = vmatpush3.bf16.msra.mxu0 %v5955_v49  ;;  %v2395_v49 = vld [vmem:[%s9266_s26 + $0x8] sm:$0xff] }
 0x611   :  { %5957 = vmatprep.subr.bf16.mxu0 %v6536_v20 }
 0x614   :  { %5959 = vmatpush3.bf16.msra.mxu0 %v5958_v52  ;;  %v2414_v52 = vrot.slane %v7954_v46, 1 }
 0x615   :  { %5960 = vmatprep.subr.bf16.mxu0 %v6536_v20 }
 0x616   :  { %v2416_v59 = vsel %vm82_vm3, %v2414_v52, %v2415_v53  ;;  %v4996_v52 = vld [vmem:[%s9266_s26 + $0x128] sm:$0xff]  ;;  %v4998_v53 = vld [vmem:[%s9266_s26 + $0x138] sm:$0xf] }
 0x618   :  { %5962 = vmatpush3.bf16.msra.mxu0 %v5961_v55  ;;  %v6012_v55 = vpack.c.bf16 %v2397_v50, %v2395_v49  ;;  %v2736_v49 = vrot.slane %v7959_v47, 3  ;;  %v4991_v50 = vld [vmem:[%s9266_s26 + $0x100] sm:$0xff] }
 0x619   :  { %5963 = vmatprep.subr.bf16.mxu0 %v6536_v20 }
 0x61b   :  { %5383 = vmatmul.mubr.msk.f32.vlgmr.msra.gmra.mrb[18].mxu0 %vm1958_vm13, %v2044_v58  ;;  %v2401_v58 = vld [vmem:[%s9266_s26 + $0x38] sm:$0xf] }
 0x61c   :  { %5965 = vmatpush3.bf16.msra.mxu0 %v5964_v57  ;;  %5405 = vmatprep.mubr.msk.f32.mxu0 %vm6537_vm11, %v6534_v7  ;;  %v2399_v57 = vld [vmem:[%s9266_s26 + $0x28] sm:$0xff] }
 0x61d   :  { %5966 = vmatprep.subr.bf16.mxu0 %v6536_v20  ;;  %v6016_v63 = vpack.c.bf16 %v2401_v58, %v2399_v57  ;;  %v6046_v57 = vpack.c.bf16 %v4998_v53, %v4996_v52  ;;  %v4995_v58 = vld [vmem:[%s9266_s26 + $0x120] sm:$0xff]  ;;  %v2991_v53 = vld [vmem:[%s9247_s3 + $0x70] sm:$0xff] }
 0x620   :  { %5968 = vmatpush3.bf16.msra.mxu0 %v5967_v61  ;;  %v6014_v61 = vpack.c.bf16 %v2396_v56, %v2394_v6  ;;  %v2738_v6 = vrot.slane %v7976_v54, 3 }
 0x621   :  { %5969 = vmatprep.subr.bf16.mxu0 %v6536_v20 }
 0x622   :  { %v2739_v60 = vsel %vm409_vm6, %v2736_v49, %v2738_v6 }
 0x624   :  { %5971 = vmatpush3.bf16.msra.mxu0 %v5970_v0  ;;  %v2398_v0 = vld [vmem:[%s9266_s26 + $0x20] sm:$0xff] }
 0x625   :  { %5972 = vmatprep.subr.bf16.mxu0 %v6536_v20 }
 0x628   :  { %5974 = vmatpush3.bf16.msra.mxu0 %v5973_v3  ;;  %v4968_v3 = vld [vmem:[%s9266_s26 + $0x98] sm:$0xff] }
 0x629   :  { %5975 = vmatprep.subr.bf16.mxu0 %v6536_v20  ;;  %v6022_v11 = vpack.c.bf16 %v4968_v3, %v4966_v2  ;;  %v2852_v2 = vrot.slane %v7959_v47, 4 }
 0x62c   :  { %5977 = vmatpush3.bf16.msra.mxu0 %v5976_v9  ;;  %v6019_v9 = vpack.c.bf16 %v2400_v1, %v2398_v0  ;;  %v2851_v1 = vrot.slane %v7954_v46, 4 }
 0x62d   :  { %5978 = vmatprep.subr.bf16.mxu0 %v6536_v20 }
 0x62e   :  { %v2853_v3 = vsel %vm97_vm0, %v2851_v1, %v2852_v2 }
 0x62f   :  { %5406 = vmatmul.mubr.msk.f32.vlgmr.msra.gmra.mrb[18].mxu0 %vm1958_vm13, %v2129_v15  ;;  %v4967_v15 = vld [vmem:[%s9266_s26 + $0x90] sm:$0xff] }
 0x630   :  { %5980 = vmatpush3.bf16.msra.mxu0 %v5979_v21  ;;  %5428 = vmatprep.mubr.msk.f32.mxu0 %vm6537_vm11, %v6534_v7  ;;  %v4965_v21 = vld [vmem:[%s9266_s26 + $0x80] sm:$0xff] }
 0x631   :  { %5981 = vmatprep.subr.bf16.mxu0 %v6536_v20 }
 0x634   :  { %5983 = vmatpush3.bf16.msra.mxu0 %v5982_v18  ;;  %v6024_v18 = vpack.c.bf16 %v4967_v15, %v4965_v21  ;;  %v2979_v21 = vld [vmem:[%s9247_s3 + $0x10] sm:$0xff]  ;;  %v2980_v15 = vld [vmem:[%s9247_s3 + $0x18] sm:$0xff] }
 0x635   :  { %5984 = vmatprep.subr.bf16.mxu0 %v6536_v20  ;;  %v6056_v17 = vpack.c.bf16 %v2980_v15, %v2979_v21  ;;  %v2999_v21 = vld [vmem:[%s9247_s3 + $0xb0] sm:$0xff]  ;;  %v3000_v15 = vld [vmem:[%s9247_s3 + $0xb8] sm:$0xff] }
 0x638   :  { %5986 = vmatpush3.bf16.msra.mxu0 %v5985_v30  ;;  %v4971_v30 = vld [vmem:[%s9266_s26 + $0xb0] sm:$0xf] }
 0x639   :  { %5987 = vmatprep.subr.bf16.mxu0 %v6536_v20 }
 0x63c   :  { %5989 = vmatpush3.bf16.msra.mxu0 %v5988_v24  ;;  %v6029_v24 = vpack.c.bf16 %v4971_v30, %v4969_v22  ;;  %v2982_v22 = vld [vmem:[%s9247_s3 + $0x28] sm:$0xff] }
 0x63d   :  { %5990 = vmatprep.subr.bf16.mxu0 %v6536_v20 }
 0x640   :  { %5992 = vmatpush3.bf16.msra.mxu0 %v5991_v26  ;;  %v2620_v26 = vrot.slane %v7959_v47, 2 }
 0x641   :  { %6052 = vmatprep.subr.bf16.mxu0 %v6536_v20 }
 0x642   :  { %v2621_v32 = vsel %vm291_vm5, %v2619_v8, %v2620_v26  ;;  %v2983_v8 = vld [vmem:[%s9247_s3 + $0x30] sm:$0xff] }
 0x643   :  { %5429 = vmatmul.mubr.msk.f32.vlgmr.msra.gmra.mrb[18].mxu0 %vm1958_vm13, %v2214_v27  ;;  %v4978_v27 = vld [vmem:[%s9266_s26 + $0xc0] sm:$0xff] }
 0x644   :  { %v6034_v34 = vpack.c.bf16 %v4980_v28, %v4978_v27  ;;  %v3102_v27 = vld [vmem:[%s9248_s4 + $0x30] sm:$0xff]  ;;  %v3103_v28 = vld [vmem:[%s9248_s4 + $0x38] sm:$0xff] }
 0x645   :  { %v6107_v31 = vpack.c.bf16 %v3103_v28, %v3102_v27  ;;  %v3122_v27 = vld [vmem:[%s9248_s4 + $0xd0] sm:$0xff]  ;;  %v3123_v28 = vld [vmem:[%s9248_s4 + $0xd8] sm:$0xff] }
 0x716   :  { %v2283_v36 = vpop.f32.mrb[18].mxu0 }
 0x717   :  { %v6419_v39 = vadd.f32 %v2283_v36, %v1947_v33  ;;  %v5430_v40 = vpop.f32.mrb[19].mxu0  ;;  %v2622_v33 = vrot.slane %v7976_v54, 2  ;;  %v4982_v36 = vld [vmem:[%s9266_s26 + $0xe0] sm:$0xff] }
 0x718   :  { %v6039_v42 = vpack.c.bf16 %v4984_v37, %v4982_v36 }
 0x719   :  { %v2288_v43 = vmax.f32 %v6419_v39, 0.0  ;;  %v4994_v39 = vld [vmem:[%s9266_s26 + $0x118] sm:$0xff]  ;;  %v2623_v40 = vsel %vm291_vm5, %v2620_v26, %v2622_v33 }
 0x71a   :  { %v2984_v26 = vld [vmem:[%s9247_s3 + $0x38] sm:$0xff] }
 0x71b   :  { %5446 = vmatmul.mubr.msk.f32.vlgmr.msra.gmra.mrb[14].mxu1 %vm2297_vm15, %v2288_v43  ;;  %v6042_v43 = vpack.c.bf16 %v4994_v39, %v4992_v38  ;;  %v6062_v29 = vpack.c.bf16 %v2984_v26, %v2983_v8  ;;  %v2987_v38 = vld [vmem:[%s9247_s3 + $0x50] sm:$0xff]  ;;  %v2988_v39 = vld [vmem:[%s9247_s3 + $0x58] sm:$0xff] }
 0x71c   :  { %6005 = vmatpush1.bf16.msra.mxu1 %v6004_v41  ;;  %2497 = vmatprep.mubr.f32.mxu1 %v6534_v7  ;;  %v2624_v41 = vrot.slane %v7997_v62, 2  ;;  %v3003_v8 = vld [vmem:[%s9247_s3 + $0xd0] sm:$0xff]  ;;  %v3004_v26 = vld [vmem:[%s9247_s3 + $0xd8] sm:$0xff] }
 0x71d   :  { %6008 = vmatprep.subr.msk.bf16.mxu1 %vm6649_vm2, %v6006_v44 }
 0x71e   :  { %v2625_v44 = vsel %vm291_vm5, %v2622_v33, %v2624_v41  ;;  %v2986_v33 = vld [vmem:[%s9247_s3 + $0x48] sm:$0xff]  ;;  %v3107_v41 = vld [vmem:[%s9248_s4 + $0x58] sm:$0xff] }
 0x720   :  { %6011 = vmatpush1.bf16.msk.msra.mxu1 %vm6649_vm2, %v6009_v51  ;;  %v4993_v51 = vld [vmem:[%s9266_s26 + $0x110] sm:$0xff] }
 0x721   :  { %6013 = vmatprep.subr.bf16.mxu1 %v6012_v55  ;;  %v2737_v55 = vsel %vm409_vm6, %v2735_v45, %v2736_v49  ;;  %v6044_v56 = vpack.c.bf16 %v4993_v51, %v4991_v50  ;;  %v2990_v45 = vld [vmem:[%s9247_s3 + $0x68] sm:$0xff]  ;;  %v3108_v49 = vld [vmem:[%s9248_s4 + $0x60] sm:$0xff] }
 0x722   :  { %v3109_v50 = vld [vmem:[%s9248_s4 + $0x68] sm:$0xff] }
 0x723   :  { %4957 = vmatmul.mubr.msk.f32.vlgmr.msra.gmra.mrb[16].mxu1 %vm90_vm4, %v2416_v59  ;;  %v4997_v59 = vld [vmem:[%s9266_s26 + $0x130] sm:$0xf]  ;;  %v6116_v52 = vpack.c.bf16 %v3109_v50, %v3108_v49 }
 0x724   :  { %2503 = vmatprep.mubr.f32.mxu1 %v6534_v7  ;;  %6015 = vmatpush1.bf16.msra.mxu1 %v6014_v61  ;;  %v2740_v61 = vrot.slane %v7997_v62, 3 }
 0x725   :  { %6018 = vmatprep.subr.msk.bf16.mxu1 %vm6649_vm2, %v6016_v63  ;;  %v6049_v63 = vpack.c.bf16 %v4997_v59, %v4995_v58  ;;  %v2993_v59 = vld [vmem:[%s9247_s3 + $0x80] sm:$0xff] }
 0x726   :  { %v2741_v0 = vsel %vm409_vm6, %v2738_v6, %v2740_v61  ;;  %v3110_v6 = vld [vmem:[%s9248_s4 + $0x70] sm:$0xff]  ;;  %v3112_v61 = vld [vmem:[%s9248_s4 + $0x80] sm:$0xff] }
 0x727   :  { %4958 = vmatmul.mubr.msk.f32.gmra.mrb[18].mxu1 %vm90_vm4, %v2418_v13  ;;  %v2854_v13 = vrot.slane %v7976_v54, 4 }
 0x728   :  { %2509 = vmatprep.mubr.f32.mxu1 %v6534_v7  ;;  %6021 = vmatpush1.bf16.msk.msra.mxu1 %vm6649_vm2, %v6019_v9 }
 0x729   :  { %6023 = vmatprep.subr.bf16.mxu1 %v6022_v11  ;;  %v2855_v10 = vsel %vm97_vm0, %v2852_v2, %v2854_v13  ;;  %v3097_v11 = vld [vmem:[%s9248_s4 + $0x8] sm:$0xff]  ;;  %v2995_v2 = vld [vmem:[%s9247_s3 + $0x90] sm:$0xff] }
 0x72b   :  { %4959 = vmatmul.mubr.msk.f32.gmra.mrb[20].mxu1 %vm90_vm4, %v2420_v12 }
 0x72c   :  { %2592 = vmatprep.mubr.f32.mxu1 %v6534_v7 }
 0x72f   :  { %4962 = vmatmul.mubr.msk.f32.vlgmr.msra.gmra.mrb[16].mxu1 %vm90_vm4, %v7954_v46  ;;  %v2856_v46 = vrot.slane %v7997_v62, 4  ;;  %v3096_v62 = vld [vmem:[%s9248_s4] sm:$0xff] }
 0x730   :  { %2598 = vmatprep.mubr.f32.mxu1 %v6534_v7  ;;  %6025 = vmatpush1.bf16.msra.mxu1 %v6024_v18  ;;  %v6098_v12 = vpack.c.bf16 %v3097_v11, %v3096_v62  ;;  %v3099_v18 = vld [vmem:[%s9248_s4 + $0x18] sm:$0xff]  ;;  %v3116_v62 = vld [vmem:[%s9248_s4 + $0xa0] sm:$0xff] }
 0x731   :  { %6028 = vmatprep.subr.msk.bf16.mxu1 %vm6649_vm2, %v6026_v19  ;;  %v2981_v19 = vld [vmem:[%s9247_s3 + $0x20] sm:$0xff]  ;;  %v6101_v30 = vpack.c.bf16 %v3099_v18, %v3098_v16  ;;  %v3118_v16 = vld [vmem:[%s9248_s4 + $0xb0] sm:$0xff]  ;;  %v6086_v18 = vpack.c.bf16 %v3000_v15, %v2999_v21  ;;  %v5023_v15 = vld [vmem:[%s9251_s7 + $0x138] sm:$0xff] }
 0x732   :  { %v5020_v21 = vld [vmem:[%s9251_s7 + $0x120] sm:$0xff] }
 0x733   :  { %4963 = vmatmul.mubr.msk.f32.gmra.mrb[18].mxu1 %vm90_vm4, %v7959_v47  ;;  %v2857_v47 = vsel %vm97_vm0, %v2854_v13, %v2856_v46  ;;  %v3114_v13 = vld [vmem:[%s9248_s4 + $0x90] sm:$0xff] }
 0x734   :  { %2604 = vmatprep.mubr.f32.mxu1 %v6534_v7  ;;  %6031 = vmatpush1.bf16.msk.msra.mxu1 %vm6649_vm2, %v6029_v24  ;;  %v6059_v24 = vpack.c.bf16 %v2982_v22, %v2981_v19  ;;  %v3001_v22 = vld [vmem:[%s9247_s3 + $0xc0] sm:$0xff] }
 0x735   :  { %6033 = vmatprep.subr.bf16.mxu1 %v6032_v25  ;;  %v6104_v25 = vpack.c.bf16 %v3101_v48, %v3100_v23  ;;  %v3120_v23 = vld [vmem:[%s9248_s4 + $0xc0] sm:$0xff]  ;;  %v3121_v48 = vld [vmem:[%s9248_s4 + $0xc8] sm:$0xff] }
 0x737   :  { %4964 = vmatmul.mubr.msk.f32.gmra.mrb[20].mxu1 %vm90_vm4, %v7976_v54  ;;  %v2977_v54 = vld [vmem:[%s9247_s3] sm:$0xff] }
 0x738   :  { %2702 = vmatprep.mubr.f32.mxu1 %v6534_v7  ;;  %v6053_v9 = vpack.c.bf16 %v2978_v4, %v2977_v54  ;;  %v2997_v54 = vld [vmem:[%s9247_s3 + $0xa0] sm:$0xff]  ;;  %v2998_v4 = vld [vmem:[%s9247_s3 + $0xa8] sm:$0xff] }
 0x739   :  { %v6083_v11 = vpack.c.bf16 %v2998_v4, %v2997_v54  ;;  %v5016_v54 = vld [vmem:[%s9251_s7 + $0x100] sm:$0xff]  ;;  %v5019_v4 = vld [vmem:[%s9251_s7 + $0x118] sm:$0xff] }
 0x73a   :  { %6054 = vmatpush1.bf16.msra.mxu0 %v6053_v9  ;;  %v3117_v9 = vld [vmem:[%s9248_s4 + $0xa8] sm:$0xff] }
 0x73b   :  { %4975 = vmatmul.mubr.msk.f32.vlgmr.msra.gmra.mrb[16].mxu1 %vm90_vm4, %v2621_v32  ;;  %6055 = vmatprep.subr.bf16.mxu0 %v6536_v20  ;;  %v2985_v32 = vld [vmem:[%s9247_s3 + $0x40] sm:$0xff] }
 0x73c   :  { %2708 = vmatprep.mubr.f32.mxu1 %v6534_v7  ;;  %6035 = vmatpush1.bf16.msra.mxu1 %v6034_v34  ;;  %v3104_v34 = vld [vmem:[%s9248_s4 + $0x40] sm:$0xff]  ;;  %v6065_v36 = vpack.c.bf16 %v2986_v33, %v2985_v32  ;;  %v3006_v33 = vld [vmem:[%s9247_s3 + $0xe8] sm:$0xff] }
 0x73d   :  { %6038 = vmatprep.subr.msk.bf16.mxu1 %vm6649_vm2, %v6036_v35  ;;  %v3105_v35 = vld [vmem:[%s9248_s4 + $0x48] sm:$0xff]  ;;  %v3005_v32 = vld [vmem:[%s9247_s3 + $0xe0] sm:$0xff] }
 0x73e   :  { %6057 = vmatpush1.bf16.msra.mxu0 %v6056_v17  ;;  %v6110_v37 = vpack.c.bf16 %v3105_v35, %v3104_v34  ;;  %v3119_v17 = vld [vmem:[%s9248_s4 + $0xb8] sm:$0xff]  ;;  %v3124_v34 = vld [vmem:[%s9248_s4 + $0xe0] sm:$0xff]  ;;  %v6095_v35 = vpack.c.bf16 %v3006_v33, %v3005_v32 }
 0x73f   :  { %4976 = vmatmul.mubr.msk.f32.gmra.mrb[18].mxu1 %vm90_vm4, %v2623_v40  ;;  %6058 = vmatprep.subr.bf16.mxu0 %v6536_v20  ;;  %v3106_v40 = vld [vmem:[%s9248_s4 + $0x50] sm:$0xff]  ;;  %v6131_v19 = vpack.c.bf16 %v3119_v17, %v3118_v16  ;;  %v5025_v16 = vld [vmem:[%s9251_s7 + $0x148] sm:$0xff]  ;;  %v5032_v32 = vld [vmem:[%s9251_s7 + $0x180] sm:$0xff] }
 0x740   :  { %2714 = vmatprep.mubr.f32.mxu1 %v6534_v7  ;;  %6041 = vmatpush1.bf16.msk.msra.mxu1 %vm6649_vm2, %v6039_v42  ;;  %v6068_v42 = vpack.c.bf16 %v2988_v39, %v2987_v38  ;;  %v2296_v38 = vld [vmem:[%s9260_s16] sm:$0x1] }
 0x741   :  { %6043 = vmatprep.subr.bf16.mxu1 %v6042_v43  ;;  %v6113_v43 = vpack.c.bf16 %v3107_v41, %v3106_v40 }
 0x742   :  { %6060 = vmatpush1.bf16.msra.mxu0 %v6059_v24 }
 0x743   :  { %4977 = vmatmul.mubr.msk.f32.gmra.mrb[20].mxu1 %vm90_vm4, %v2625_v44  ;;  %6061 = vmatprep.subr.bf16.mxu0 %v6536_v20  ;;  %v2989_v44 = vld [vmem:[%s9247_s3 + $0x60] sm:$0xff] }
 0x744   :  { %2818 = vmatprep.mubr.f32.mxu1 %v6534_v7  ;;  %v6071_v51 = vpack.c.bf16 %v2990_v45, %v2989_v44 }
 0x746   :  { %6063 = vmatpush1.bf16.msra.mxu0 %v6062_v29  ;;  %v6092_v29 = vpack.c.bf16 %v3004_v26, %v3003_v8  ;;  %v5028_v8 = vld [vmem:[%s9251_s7 + $0x160] sm:$0xff]  ;;  %v5031_v26 = vld [vmem:[%s9251_s7 + $0x178] sm:$0xff] }
 0x747   :  { %4988 = vmatmul.mubr.msk.f32.vlgmr.msra.gmra.mrb[16].mxu1 %vm90_vm4, %v2737_v55  ;;  %6064 = vmatprep.subr.bf16.mxu0 %v6536_v20  ;;  %v2992_v55 = vld [vmem:[%s9247_s3 + $0x78] sm:$0xff] }
 0x748   :  { %2824 = vmatprep.mubr.f32.mxu1 %v6534_v7  ;;  %6045 = vmatpush1.bf16.msra.mxu1 %v6044_v56  ;;  %v3111_v56 = vld [vmem:[%s9248_s4 + $0x78] sm:$0xff] }
 0x749   :  { %6048 = vmatprep.subr.msk.bf16.mxu1 %vm6649_vm2, %v6046_v57  ;;  %v6074_v57 = vpack.c.bf16 %v2992_v55, %v2991_v53  ;;  %v6119_v58 = vpack.c.bf16 %v3111_v56, %v3110_v6 }
 0x74a   :  { %6066 = vmatpush1.bf16.msra.mxu0 %v6065_v36  ;;  %v3125_v36 = vld [vmem:[%s9248_s4 + $0xe8] sm:$0xff] }
 0x74b   :  { %4989 = vmatmul.mubr.msk.f32.gmra.mrb[18].mxu1 %vm90_vm4, %v2739_v60  ;;  %6067 = vmatprep.subr.bf16.mxu0 %v6536_v20  ;;  %v2994_v60 = vld [vmem:[%s9247_s3 + $0x88] sm:$0xff] }
 0x74c   :  { %2830 = vmatprep.mubr.f32.mxu1 %v6534_v7  ;;  %6051 = vmatpush1.bf16.msk.msra.mxu1 %vm6649_vm2, %v6049_v63  ;;  %v3113_v63 = vld [vmem:[%s9248_s4 + $0x88] sm:$0xff] }
 0x74d   :  { %6097 = vmatprep.subr.bf16.mxu1 %v6536_v20  ;;  %v6122_v1 = vpack.c.bf16 %v3113_v63, %v3112_v61 }
 0x74e   :  { %6069 = vmatpush1.bf16.msra.mxu0 %v6068_v42 }
 0x74f   :  { %4990 = vmatmul.mubr.msk.f32.gmra.mrb[20].mxu1 %vm90_vm4, %v2741_v0  ;;  %6070 = vmatprep.subr.bf16.mxu0 %v6536_v20  ;;  %v6077_v0 = vpack.c.bf16 %v2994_v60, %v2993_v59 }
 0x750   :  { %2934 = vmatprep.mubr.f32.mxu1 %v6534_v7 }
 0x752   :  { %6072 = vmatpush1.bf16.msra.mxu0 %v6071_v51 }
 0x753   :  { %5001 = vmatmul.mubr.msk.f32.vlgmr.msra.gmra.mrb[16].mxu1 %vm90_vm4, %v2853_v3  ;;  %6073 = vmatprep.subr.bf16.mxu0 %v6536_v20  ;;  %v2996_v3 = vld [vmem:[%s9247_s3 + $0x98] sm:$0xff] }
 0x754   :  { %2940 = vmatprep.mubr.f32.mxu1 %v6534_v7  ;;  %6099 = vmatpush1.bf16.msra.mxu1 %v6098_v12  ;;  %v6080_v46 = vpack.c.bf16 %v2996_v3, %v2995_v2  ;;  %v6128_v12 = vpack.c.bf16 %v3117_v9, %v3116_v62  ;;  %v5021_v62 = vld [vmem:[%s9251_s7 + $0x128] sm:$0xff] }
 0x755   :  { %6100 = vmatprep.subr.bf16.mxu1 %v6536_v20 }
 0x756   :  { %6075 = vmatpush1.bf16.msra.mxu0 %v6074_v57 }
 0x757   :  { %5002 = vmatmul.mubr.msk.f32.gmra.mrb[18].mxu1 %vm90_vm4, %v2855_v10  ;;  %6076 = vmatprep.subr.bf16.mxu0 %v6536_v20  ;;  %v3115_v10 = vld [vmem:[%s9248_s4 + $0x98] sm:$0xff] }
 0x758   :  { %2946 = vmatprep.mubr.f32.mxu1 %v6534_v7  ;;  %6102 = vmatpush1.bf16.msra.mxu1 %v6101_v30  ;;  %v3002_v30 = vld [vmem:[%s9247_s3 + $0xc8] sm:$0xff] }
 0x759   :  { %6103 = vmatprep.subr.bf16.mxu1 %v6536_v20  ;;  %v6089_v24 = vpack.c.bf16 %v3002_v30, %v3001_v22  ;;  %v5024_v22 = vld [vmem:[%s9251_s7 + $0x140] sm:$0xff]  ;;  %v5027_v30 = vld [vmem:[%s9251_s7 + $0x158] sm:$0xff] }
 0x75a   :  { %6078 = vmatpush1.bf16.msra.mxu0 %v6077_v0 }
 0x75b   :  { %5003 = vmatmul.mubr.msk.f32.gmra.mrb[20].mxu1 %vm90_vm4, %v2857_v47  ;;  %6079 = vmatprep.subr.bf16.mxu0 %v6536_v20  ;;  %v6125_v47 = vpack.c.bf16 %v3115_v10, %v3114_v13  ;;  %v5015_v13 = vld [vmem:[%s9251_s7 + $0xf8] sm:$0xff]  ;;  %v5017_v10 = vld [vmem:[%s9251_s7 + $0x108] sm:$0xff] }
 0x75c   :  { %6105 = vmatpush1.bf16.msra.mxu1 %v6104_v25  ;;  %v6134_v25 = vpack.c.bf16 %v3121_v48, %v3120_v23  ;;  %v5029_v23 = vld [vmem:[%s9251_s7 + $0x168] sm:$0xff] }
 0x75d   :  { %6106 = vmatprep.subr.bf16.mxu1 %v6536_v20 }
 0x75e   :  { %6081 = vmatpush1.bf16.msra.mxu0 %v6080_v46  ;;  %v5014_v46 = vld [vmem:[%s9251_s7 + $0xf0] sm:$0xff] }
 0x75f   :  { %6082 = vmatprep.subr.bf16.mxu0 %v6536_v20  ;;  %v6152_v9 = vpack.c.bf16 %v5016_v54, %v5014_v46  ;;  %v5038_v46 = vld [vmem:[%s9251_s7 + $0x1b0] sm:$0xff] }
 0x760   :  { %6108 = vmatpush1.bf16.msra.mxu1 %v6107_v31  ;;  %v6137_v31 = vpack.c.bf16 %v3123_v28, %v3122_v27  ;;  %v5033_v27 = vld [vmem:[%s9251_s7 + $0x188] sm:$0xff] }
 0x761   :  { %6109 = vmatprep.subr.bf16.mxu1 %v6536_v20 }
 0x762   :  { %6084 = vmatpush1.bf16.msra.mxu0 %v6083_v11  ;;  %v6154_v11 = vpack.c.bf16 %v5021_v62, %v5019_v4  ;;  %v5043_v4 = vld [vmem:[%s9251_s7 + $0x1d8] sm:$0xff]  ;;  %v5042_v62 = vld [vmem:[%s9251_s7 + $0x1d0] sm:$0xff] }
 0x763   :  { %6085 = vmatprep.subr.bf16.mxu0 %v6536_v20 }
 0x764   :  { %6111 = vmatpush1.bf16.msra.mxu1 %v6110_v37  ;;  %v6140_v37 = vpack.c.bf16 %v3125_v36, %v3124_v34 }
 0x765   :  { %6112 = vmatprep.subr.bf16.mxu1 %v6536_v20 }
 0x766   :  { %6087 = vmatpush1.bf16.msra.mxu0 %v6086_v18  ;;  %v6158_v18 = vpack.c.bf16 %v5025_v16, %v5023_v15 }
 0x767   :  { %6088 = vmatprep.subr.bf16.mxu0 %v6536_v20 }
 0x768   :  { %6114 = vmatpush1.bf16.msra.mxu1 %v6113_v43  ;;  %v2959_v43 = vld [vmem:[%s9246_s2] sm:$0x3] }
 0x769   :  { %6115 = vmatprep.subr.bf16.mxu1 %v6536_v20  ;;  %v2968_v44 = vrot.slane %v2959_v43, %v7066_v14  ;;  %v2964_v45 = vrot.slane %v2959_v43, %v7071_v5 }
 0x76a   :  { %6090 = vmatpush1.bf16.msra.mxu0 %v6089_v24  ;;  %v6162_v24 = vpack.c.bf16 %v5029_v23, %v5027_v30  ;;  %v3928_v30 = vld [vmem:[%s9253_s9] sm:$0xff]  ;;  %v3929_v23 = vld [vmem:[%s9253_s9 + $0x8] sm:$0xff] }
 0x76b   :  { %6091 = vmatprep.subr.bf16.mxu0 %v6536_v20 }
 0x76c   :  { %6117 = vmatpush1.bf16.msra.mxu1 %v6116_v52 }
 0x76d   :  { %6118 = vmatprep.subr.bf16.mxu1 %v6536_v20 }
 0x76e   :  { %6093 = vmatpush1.bf16.msra.mxu0 %v6092_v29  ;;  %v6166_v29 = vpack.c.bf16 %v5033_v27, %v5031_v26  ;;  %v3384_v27 = vld [vmem:[%s9251_s7 + $0x28] sm:$0xff] }
 0x76f   :  { %6094 = vmatprep.subr.bf16.mxu0 %v6536_v20 }
 0x770   :  { %6120 = vmatpush1.bf16.msra.mxu1 %v6119_v58 }
 0x771   :  { %6121 = vmatprep.subr.bf16.mxu1 %v6536_v20 }
 0x772   :  { %6096 = vmatpush1.bf16.msra.mxu0 %v6095_v35 }
 0x774   :  { %6123 = vmatpush1.bf16.msra.mxu1 %v6122_v1  ;;  %v3209_v1 = vld [vmem:[%s9249_s5] sm:$0xff] }
 0x775   :  { %6124 = vmatprep.subr.bf16.mxu1 %v6536_v20 }
 0x778   :  { %6126 = vmatpush1.bf16.msra.mxu1 %v6125_v47  ;;  %v6150_v47 = vpack.c.bf16 %v5017_v10, %v5015_v13  ;;  %v5041_v13 = vld [vmem:[%s9251_s7 + $0x1c8] sm:$0xff] }
 0x779   :  { %6127 = vmatprep.subr.bf16.mxu1 %v6536_v20 }
 0x77c   :  { %6129 = vmatpush1.bf16.msra.mxu1 %v6128_v12  ;;  %v5018_v12 = vld [vmem:[%s9251_s7 + $0x110] sm:$0xff] }
 0x77d   :  { %6130 = vmatprep.subr.bf16.mxu1 %v6536_v20  ;;  %v6156_v17 = vpack.c.bf16 %v5020_v21, %v5018_v12 }
 0x780   :  { %6132 = vmatpush1.bf16.msra.mxu1 %v6131_v19  ;;  %v5022_v19 = vld [vmem:[%s9251_s7 + $0x130] sm:$0xff] }
 0x781   :  { %6133 = vmatprep.subr.bf16.mxu1 %v6536_v20  ;;  %v6160_v48 = vpack.c.bf16 %v5024_v22, %v5022_v19 }
 0x784   :  { %6135 = vmatpush1.bf16.msra.mxu1 %v6134_v25  ;;  %v5026_v25 = vld [vmem:[%s9251_s7 + $0x150] sm:$0xff] }
 0x785   :  { %6136 = vmatprep.subr.bf16.mxu1 %v6536_v20  ;;  %v6164_v28 = vpack.c.bf16 %v5028_v8, %v5026_v25  ;;  %v6291_v25 = vpack.c.bf16 %v3929_v23, %v3928_v30  ;;  %v3931_v8 = vld [vmem:[%s9253_s9 + $0x18] sm:$0xff]  ;;  %v3941_v30 = vld [vmem:[%s9253_s9 + $0x68] sm:$0xff] }
 0x788   :  { %6138 = vmatpush1.bf16.msra.mxu1 %v6137_v31  ;;  %v5030_v31 = vld [vmem:[%s9251_s7 + $0x170] sm:$0xff] }
 0x789   :  { %6139 = vmatprep.subr.bf16.mxu1 %v6536_v20  ;;  %v6168_v33 = vpack.c.bf16 %v5032_v32, %v5030_v31  ;;  %v3386_v31 = vld [vmem:[%s9251_s7 + $0x38] sm:$0xff] }
 0x78c   :  { %6141 = vmatpush1.bf16.msra.mxu1 %v6140_v37 }
 0x78d   :  { %6151 = vmatprep.subr.bf16.mxu1 %v6150_v47  ;;  %v5040_v47 = vld [vmem:[%s9251_s7 + $0x1c0] sm:$0xff] }
 0x78e   :  { %v6176_v54 = vpack.c.bf16 %v5040_v47, %v5038_v46  ;;  %v3391_v46 = vld [vmem:[%s9251_s7 + $0x60] sm:$0xff]  ;;  %v3393_v47 = vld [vmem:[%s9251_s7 + $0x70] sm:$0xff] }
 0x7ee   :  { %v2371_v39 = vpop.f32.mrb[14].mxu1 }
 0x7ef   :  { %v2372_v40 = vadd.f32 %v2371_v39, %v2296_v38  ;;  %v5447_v41 = vpop.f32.mrb[15].mxu1 }
 0x7f1   :  { %v2376_v42 = vsel %vm2375_vm1, %v2372_v40, -inf }
 0x7f2   :  { %2377 = vmax.xlane.f32.xlu0 %v2376_v42 }
 0x826   :  { %v2936_v49 = vpop.f32.mrb[16].mxu1 }
 0x827   :  { %v2938_v50 = vpop.f32.mrb[17].mxu1  ;;  %v2971_v52 = vadd.f32 %v2964_v45, %v2936_v49 }
 0x828   :  { %v2972_v51 = vadd.f32 %v2968_v44, %v2938_v50 }
 0x82a   :  { %v2942_v53 = vpop.f32.mrb[18].mxu1  ;;  %5004 = vmatprep.mubr.msk.f32.mxu0 %vm683_vm7, %v2972_v51  ;;  %5007 = vmatprep.mubr.msk.f32.mxu1 %vm683_vm7, %v2972_v51 }
 0x82b   :  { %v2944_v55 = vpop.f32.mrb[19].mxu1  ;;  %3081 = vmatmul.mubr.f32.vlgmr.msra.gmra.mrb[20].mxu0 %v2971_v52  ;;  %3191 = vmatmul.mubr.f32.vlgmr.msra.gmra.mrb[22].mxu1 %v2971_v52  ;;  %v2973_v56 = vadd.f32 %v2964_v45, %v2942_v53  ;;  %v3210_v53 = vld [vmem:[%s9249_s5 + $0x8] sm:$0xf] }
 0x82c   :  { %v2974_v6 = vadd.f32 %v2968_v44, %v2944_v55  ;;  %6153 = vmatpush1.bf16.msra.mxu1 %v6152_v9  ;;  %v3292_v55 = vld [vmem:[%s9250_s6] sm:$0xff]  ;;  %v3380_v9 = vld [vmem:[%s9251_s7 + $0x8] sm:$0xff] }
 0x82d   :  { %6155 = vmatprep.subr.bf16.mxu1 %v6154_v11  ;;  %v3382_v11 = vld [vmem:[%s9251_s7 + $0x18] sm:$0xff] }
 0x82e   :  { %v2948_v57 = vpop.f32.mrb[20].mxu1  ;;  %5005 = vmatprep.mubr.msk.f32.mxu0 %vm683_vm7, %v2974_v6  ;;  %5008 = vmatprep.mubr.msk.f32.mxu1 %vm683_vm7, %v2974_v6  ;;  %v3293_v6 = vld [vmem:[%s9250_s6 + $0x8] sm:$0xf]  ;;  %v6178_v12 = vpack.c.bf16 %v3382_v11, %v3380_v9  ;;  %v3938_v9 = vld [vmem:[%s9253_s9 + $0x50] sm:$0xff]  ;;  %v3939_v11 = vld [vmem:[%s9253_s9 + $0x58] sm:$0xff] }
 0x82f   :  { %v2950_v58 = vpop.f32.mrb[21].mxu1  ;;  %3086 = vmatmul.mubr.f32.gmra.mrb[22].mxu0 %v2973_v56  ;;  %3196 = vmatmul.mubr.f32.gmra.mrb[24].mxu1 %v2973_v56  ;;  %v2975_v60 = vadd.f32 %v2964_v45, %v2948_v57 }
 0x830   :  { %v2976_v59 = vadd.f32 %v2968_v44, %v2950_v58  ;;  %6157 = vmatpush1.bf16.msra.mxu1 %v6156_v17  ;;  %v3379_v17 = vld [vmem:[%s9251_s7] sm:$0xff] }
 0x831   :  { %6159 = vmatprep.subr.bf16.mxu1 %v6158_v18  ;;  %v3381_v18 = vld [vmem:[%s9251_s7 + $0x10] sm:$0xff] }
 0x832   :  { %5006 = vmatprep.mubr.msk.f32.mxu0 %vm683_vm7, %v2976_v59  ;;  %5009 = vmatprep.mubr.msk.f32.mxu1 %vm683_vm7, %v2976_v59 }
 0x833   :  { %3091 = vmatmul.mubr.f32.gmra.mrb[24].mxu0 %v2975_v60  ;;  %3201 = vmatmul.mubr.f32.gmra.mrb[26].mxu1 %v2975_v60  ;;  %v5035_v60 = vld [vmem:[%s9251_s7 + $0x198] sm:$0xff] }
 0x834   :  { %3510 = vmatprep.mubr.f32.mxu1 %v6534_v7  ;;  %5454 = vmatprep.mubr.msk.f32.mxu0 %vm888_vm8, %v3209_v1 }
 0x835   :  { %6161 = vmatpush1.bf16.msra.mxu1 %v6160_v48  ;;  %v3930_v48 = vld [vmem:[%s9253_s9 + $0x10] sm:$0xff] }
 0x836   :  { %6163 = vmatprep.subr.bf16.mxu1 %v6162_v24  ;;  %v6294_v32 = vpack.c.bf16 %v3931_v8, %v3930_v48  ;;  %v3404_v8 = vld [vmem:[%s9251_s7 + $0xc8] sm:$0xff] }
 0x839   :  { %6165 = vmatpush1.bf16.msra.mxu1 %v6164_v28 }
 0x83a   :  { %6167 = vmatprep.subr.bf16.mxu1 %v6166_v29  ;;  %v6180_v29 = vpack.c.bf16 %v3381_v18, %v3379_v17  ;;  %v3400_v17 = vld [vmem:[%s9251_s7 + $0xa8] sm:$0xff]  ;;  %v3402_v18 = vld [vmem:[%s9251_s7 + $0xb8] sm:$0xff] }
 0x83b   :  { %v6198_v48 = vpack.c.bf16 %v3402_v18, %v3400_v17  ;;  %v5066_v18 = vld [vmem:[%s9251_s7 + $0x280] sm:$0xff] }
 0x83d   :  { %6169 = vmatpush1.bf16.msra.mxu1 %v6168_v33  ;;  %v3932_v33 = vld [vmem:[%s9253_s9 + $0x20] sm:$0xff] }
 0x87f   :  { %v2378_v61 = vpop.xlane.xlu0 %2377 }
 0x880   :  { %v8374_v63 = vsub.f32 %v2372_v40, %v2378_v61  ;;  %v5037_v61 = vld [vmem:[%s9251_s7 + $0x1a8] sm:$0xff] }
 0x881   :  { %v6170_v1 = vpack.c.bf16 %v5037_v61, %v5035_v60  ;;  %v3387_v60 = vld [vmem:[%s9251_s7 + $0x40] sm:$0xff]  ;;  %v3389_v61 = vld [vmem:[%s9251_s7 + $0x50] sm:$0xff] }
 0x882   :  { %v2380_v0 = vmul.f32 1.442695, %v8374_v63 }
 0x883   :  { %6171 = vmatprep.subr.bf16.mxu1 %v6170_v1  ;;  %v3394_v1 = vld [vmem:[%s9251_s7 + $0x78] sm:$0xff] }
 0x884   :  { %6502 = vpow2.f32 %v2380_v0  ;;  %v5034_v0 = vld [vmem:[%s9251_s7 + $0x190] sm:$0xff] }
 0x88e   :  { %v6503_v2 = vpop.eup %6502 }
 0x88f   :  { %v2382_v3 = vsel %vm2375_vm1, %v6503_v2, 0.0  ;;  %v5036_v2 = vld [vmem:[%s9251_s7 + $0x1a0] sm:$0xff] }
 0x890   :  { %2383 = vadd.xlane.f32.xlu1 %v2382_v3  ;;  %v5039_v3 = vld [vmem:[%s9251_s7 + $0x1b8] sm:$0xff] }
 0x891   :  { %v6174_v10 = vpack.c.bf16 %v5041_v13, %v5039_v3  ;;  %v3937_v3 = vld [vmem:[%s9253_s9 + $0x48] sm:$0xff]  ;;  %v6188_v13 = vpack.c.bf16 %v3389_v61, %v3387_v60  ;;  %v5057_v61 = vld [vmem:[%s9251_s7 + $0x238] sm:$0xff] }
 0x892   :  { %v5055_v60 = vld [vmem:[%s9251_s7 + $0x228] sm:$0xff] }
 0x8fe   :  { %v3082_v34 = vpop.f32.mrb[20].mxu0  ;;  %v3192_v35 = vpop.f32.mrb[22].mxu1 }
 0x8ff   :  { %v3206_v36 = vmax.f32 %v3082_v34, %v3192_v35  ;;  %v3084_v37 = vpop.f32.mrb[21].mxu0  ;;  %v3194_v38 = vpop.f32.mrb[23].mxu1  ;;  %v3933_v34 = vld [vmem:[%s9253_s9 + $0x28] sm:$0xff] }
 0x902   :  { %v3087_v39 = vpop.f32.mrb[22].mxu0  ;;  %v3197_v40 = vpop.f32.mrb[24].mxu1 }
 0x903   :  { %v3207_v41 = vmax.f32 %v3087_v39, %v3197_v40  ;;  %v3089_v42 = vpop.f32.mrb[23].mxu0  ;;  %v3199_v43 = vpop.f32.mrb[25].mxu1 }
 0x904   :  { %v6182_v43 = vpack.c.bf16 %v3386_v31, %v3384_v27  ;;  %v3943_v31 = vld [vmem:[%s9253_s9 + $0x78] sm:$0xff] }
 0x905   :  { %v6142_v44 = vpack.c.bf16 %v3207_v41, %v3206_v36 }
 0x906   :  { %v3092_v45 = vpop.f32.mrb[24].mxu0  ;;  %v3202_v49 = vpop.f32.mrb[26].mxu1 }
 0x907   :  { %v3208_v50 = vmax.f32 %v3092_v45, %v3202_v49  ;;  %v3094_v51 = vpop.f32.mrb[25].mxu0  ;;  %v3204_v52 = vpop.f32.mrb[27].mxu1  ;;  %6143 = vmatprep.subr.bf16.mxu0 %v6142_v44  ;;  %v3385_v45 = vld [vmem:[%s9251_s7 + $0x30] sm:$0xff]  ;;  %v6297_v49 = vpack.c.bf16 %v3933_v34, %v3932_v33  ;;  %v3403_v34 = vld [vmem:[%s9251_s7 + $0xc0] sm:$0xff] }
 0x908   :  { %6145 = vmatpush3.bf16.msra.mxu0 %v6142_v44  ;;  %v3388_v51 = vld [vmem:[%s9251_s7 + $0x48] sm:$0xff]  ;;  %v3390_v52 = vld [vmem:[%s9251_s7 + $0x58] sm:$0xff] }
 0x909   :  { %5452 = vmatprep.subr.mxu0 %v3208_v50 }
 0x90c   :  { %5453 = vmatpush3.msra.mxu0 %v3208_v50 }
 0x90d   :  { %6147 = vmatprep.subr.bf16.mxu0 %v6142_v44  ;;  %5455 = vmatmul.mubr.msk.f32.vlgmr.msra.gmra.mrb[26].mxu0 %vm888_vm8, %v3210_v53 }
 0x90e   :  { %6149 = vmatpush3.bf16.msra.mxu0 %v6142_v44  ;;  %5463 = vmatprep.mubr.msk.f32.mxu0 %vm888_vm8, %v3292_v55  ;;  %v3383_v44 = vld [vmem:[%s9251_s7 + $0x20] sm:$0xff] }
 0x90f   :  { %5461 = vmatprep.subr.mxu0 %v3208_v50 }
 0x912   :  { %5462 = vmatpush3.msra.mxu0 %v3208_v50 }
 0x913   :  { %5464 = vmatmul.mubr.msk.f32.vlgmr.msra.gmra.mrb[28].mxu0 %vm888_vm8, %v3293_v6  ;;  %6290 = vmatprep.subr.bf16.mxu0 %v6536_v20 }
 0x914   :  { %6292 = vmatpush1.bf16.msra.mxu0 %v6291_v25  ;;  %v3401_v25 = vld [vmem:[%s9251_s7 + $0xb0] sm:$0xff] }
 0x915   :  { %6293 = vmatprep.subr.bf16.mxu0 %v6536_v20 }
 0x918   :  { %6295 = vmatpush1.bf16.msra.mxu0 %v6294_v32 }
 0x919   :  { %6296 = vmatprep.subr.bf16.mxu0 %v6536_v20 }
 0x91c   :  { %6298 = vmatpush1.bf16.msra.mxu0 %v6297_v49  ;;  %v5051_v49 = vld [vmem:[%s9251_s7 + $0x208] sm:$0xff] }
 0x91d   :  { %v2384_v56 = vpop.xlane.xlu1 %2383  ;;  %6299 = vmatprep.subr.bf16.mxu0 %v6536_v20 }
 0x91e   :  { %6504 = vlog2.f32 %v2384_v56  ;;  %v3934_v56 = vld [vmem:[%s9253_s9 + $0x30] sm:$0xff] }
 0x928   :  { %v6505_v57 = vpop.eup %6504 }
 0x929   :  { %v2386_v58 = vmul.f32 0.6931472, %v6505_v57  ;;  %v3935_v57 = vld [vmem:[%s9253_s9 + $0x38] sm:$0xff] }
 0x92b   :  { %v2387_v59 = vsub.f32 %v8374_v63, %v2386_v58  ;;  %v6172_v63 = vpack.c.bf16 %v5036_v2, %v5034_v0  ;;  %v6184_v58 = vpack.c.bf16 %v3385_v45, %v3383_v44  ;;  %v3392_v0 = vld [vmem:[%s9251_s7 + $0x68] sm:$0xff]  ;;  %v6300_v2 = vpack.c.bf16 %v3935_v57, %v3934_v56  ;;  %v5046_v44 = vld [vmem:[%s9251_s7 + $0x1e0] sm:$0xff]  ;;  %v5048_v45 = vld [vmem:[%s9251_s7 + $0x1f0] sm:$0xff] }
 0x92c   :  { %v6208_v56 = vpack.c.bf16 %v5048_v45, %v5046_v44  ;;  %v5085_v45 = vld [vmem:[%s9251_s7 + $0x310] sm:$0xff] }
 0x92d   :  { %2388 = vst.msk [vmem:[#allocation2] sm:$0x1] %vm2375_vm1, %v2387_v59  ;;  %6173 = vmatpush1.bf16.msra.mxu1 %v6172_v63  ;;  %v6186_v59 = vpack.c.bf16 %v3390_v52, %v3388_v51  ;;  %v3936_v63 = vld [vmem:[%s9253_s9 + $0x40] sm:$0xff]  ;;  %6301 = vmatpush1.bf16.msra.mxu0 %v6300_v2 }
 0x92e   :  { %6175 = vmatprep.subr.bf16.mxu1 %v6174_v10  ;;  %v6190_v10 = vpack.c.bf16 %v3394_v1, %v3392_v0  ;;  %6302 = vmatprep.subr.bf16.mxu0 %v6536_v20  ;;  %v3407_v51 = vld [vmem:[%s9251_s7 + $0xe0] sm:$0xff]  ;;  %v6214_v1 = vpack.c.bf16 %v5057_v61, %v5055_v60 }
 0x92f   :  { %v5054_v2 = vld [vmem:[%s9251_s7 + $0x220] sm:$0xff] }
 0x931   :  { %6177 = vmatpush1.bf16.msra.mxu1 %v6176_v54  ;;  %v3396_v54 = vld [vmem:[%s9251_s7 + $0x88] sm:$0xff] }
 0x932   :  { %3474 = vmatprep.subr.mxu1 %v5043_v4  ;;  %v3398_v4 = vld [vmem:[%s9251_s7 + $0x98] sm:$0xff] }
 0x935   :  { %3475 = vmatpush1.msra.mxu1 %v5042_v62  ;;  %v6303_v62 = vpack.c.bf16 %v3937_v3, %v3936_v63  ;;  %v5056_v63 = vld [vmem:[%s9251_s7 + $0x230] sm:$0xff]  ;;  %v5059_v3 = vld [vmem:[%s9251_s7 + $0x248] sm:$0xff] }
 0x936   :  { %6179 = vmatprep.subr.bf16.mxu1 %v6178_v12  ;;  %v6192_v12 = vpack.c.bf16 %v3393_v47, %v3391_v46  ;;  %v5058_v46 = vld [vmem:[%s9251_s7 + $0x240] sm:$0xff]  ;;  %v5060_v47 = vld [vmem:[%s9251_s7 + $0x250] sm:$0xff] }
 0x937   :  { %6304 = vmatpush1.bf16.msra.mxu0 %v6303_v62  ;;  %v6220_v62 = vpack.c.bf16 %v5060_v47, %v5058_v46  ;;  %v5102_v46 = vld [vmem:[%s9251_s7 + $0x398] sm:$0xff]  ;;  %v5104_v47 = vld [vmem:[%s9251_s7 + $0x3a8] sm:$0xff] }
 0x938   :  { %6305 = vmatprep.subr.bf16.mxu0 %v6536_v20 }
 0x9e0   :  { %v5456_v21 = vpop.f32.mrb[26].mxu0 }
 0x9e1   :  { %v3283_v15 = vpop.f32.mrb[27].mxu0 }
 0x9e6   :  { %v5465_v16 = vpop.f32.mrb[28].mxu0 }
 0x9e7   :  { %v3376_v19 = vmax.f32 %v5456_v21, %v5465_v16  ;;  %v3366_v22 = vpop.f32.mrb[29].mxu0  ;;  %v6194_v21 = vpack.c.bf16 %v3398_v4, %v3396_v54  ;;  %v3397_v16 = vld [vmem:[%s9251_s7 + $0x90] sm:$0xff]  ;;  %v5063_v54 = vld [vmem:[%s9251_s7 + $0x268] sm:$0xff]  ;;  %v5065_v4 = vld [vmem:[%s9251_s7 + $0x278] sm:$0xff] }
 0x9e8   :  { %v3375_v24 = vmax.f32 %v3283_v15, %v3366_v22  ;;  %v3395_v15 = vld [vmem:[%s9251_s7 + $0x80] sm:$0xff] }
 0x9e9   :  { %v3378_v26 = vmax.f32 %v3376_v19, 0.0  ;;  %v6306_v19 = vpack.c.bf16 %v3939_v11, %v3938_v9  ;;  %v3940_v22 = vld [vmem:[%s9253_s9 + $0x60] sm:$0xff]  ;;  %v6196_v23 = vpack.c.bf16 %v3397_v16, %v3395_v15  ;;  %v6222_v9 = vpack.c.bf16 %v5065_v4, %v5063_v54  ;;  %v5069_v15 = vld [vmem:[%s9251_s7 + $0x298] sm:$0xff] }
 0x9ea   :  { %v8514_v28 = vmax.f32 %v3375_v24, 0.0  ;;  %v3399_v24 = vld [vmem:[%s9251_s7 + $0xa0] sm:$0xff]  ;;  %v6309_v27 = vpack.c.bf16 %v3941_v30, %v3940_v22  ;;  %v5071_v22 = vld [vmem:[%s9251_s7 + $0x2a8] sm:$0xff]  ;;  %v5073_v30 = vld [vmem:[%s9251_s7 + $0x2b8] sm:$0xff]  ;;  %v6258_v4 = vpack.c.bf16 %v5104_v47, %v5102_v46 }
 0x9eb   :  { %v3442_v35 = vrot.slane %v3378_v26, 1  ;;  %v3621_v36 = vrot.slane %v3378_v26, 2  ;;  %v3729_v37 = vrot.slane %v3378_v26, 3  ;;  %v3837_v38 = vrot.slane %v3378_v26, 4  ;;  %v3406_v26 = vld [vmem:[%s9251_s7 + $0xd8] sm:$0xff]  ;;  %6307 = vmatpush1.bf16.msra.mxu0 %v6306_v19  ;;  %v5062_v11 = vld [vmem:[%s9251_s7 + $0x260] sm:$0xff] }
 0x9ec   :  { %v3441_v39 = vrot.slane %v8514_v28, 1  ;;  %v3620_v40 = vrot.slane %v8514_v28, 2  ;;  %v3728_v41 = vrot.slane %v8514_v28, 3  ;;  %v3836_v42 = vrot.slane %v8514_v28, 4  ;;  %6308 = vmatprep.subr.bf16.mxu0 %v6536_v20  ;;  %v5068_v19 = vld [vmem:[%s9251_s7 + $0x290] sm:$0xff]  ;;  %v4022_v46 = vld [vmem:[%s9254_s10 + $0x8] sm:$0xff] }
 0x9ed   :  { %v6200_v32 = vpack.c.bf16 %v3401_v25, %v3399_v24  ;;  %v6202_v33 = vpack.c.bf16 %v3406_v26, %v3404_v8  ;;  %v5070_v24 = vld [vmem:[%s9251_s7 + $0x2a0] sm:$0xff]  ;;  %v5072_v25 = vld [vmem:[%s9251_s7 + $0x2b0] sm:$0xff]  ;;  %v5075_v26 = vld [vmem:[%s9251_s7 + $0x2c8] sm:$0xff] }
 0x9ee   :  { %v3443_v50 = vsel %vm82_vm3, %v3441_v39, %v3442_v35  ;;  %v8544_v53 = vsel %vm291_vm5, %v3620_v40, %v3621_v36  ;;  %v8547_v55 = vsel %vm409_vm6, %v3728_v41, %v3729_v37  ;;  %v8550_v6 = vsel %vm97_vm0, %v3836_v42, %v3837_v38  ;;  %v3405_v35 = vld [vmem:[%s9251_s7 + $0xd0] sm:$0xff]  ;;  %v3944_v37 = vld [vmem:[%s9253_s9 + $0x80] sm:$0xff]  ;;  %v3945_v38 = vld [vmem:[%s9253_s9 + $0x88] sm:$0xff] }
 0x9ef   :  { %5044 = vmatmul.mubr.msk.f32.vlgmr.msra.gmra.mrb[28].mxu1 %vm1123_vm9, %v3443_v50  ;;  %6310 = vmatpush1.bf16.msra.mxu0 %v6309_v27  ;;  %v6204_v39 = vpack.c.bf16 %v3405_v35, %v3403_v34  ;;  %v3408_v40 = vld [vmem:[%s9251_s7 + $0xe8] sm:$0xff]  ;;  %v5049_v42 = vld [vmem:[%s9251_s7 + $0x1f8] sm:$0xff]  ;;  %v6232_v8 = vpack.c.bf16 %v5072_v25, %v5070_v24  ;;  %v5074_v35 = vld [vmem:[%s9251_s7 + $0x2c0] sm:$0xff] }
 0x9f0   :  { %6181 = vmatpush1.bf16.msra.mxu1 %v6180_v29  ;;  %3583 = vmatprep.mubr.f32.mxu1 %v6534_v7  ;;  %v3942_v29 = vld [vmem:[%s9253_s9 + $0x70] sm:$0xff]  ;;  %v5047_v41 = vld [vmem:[%s9251_s7 + $0x1e8] sm:$0xff]  ;;  %v5053_v50 = vld [vmem:[%s9251_s7 + $0x218] sm:$0xff] }
 0x9f1   :  { %6183 = vmatprep.subr.bf16.mxu1 %v6182_v43  ;;  %v6312_v36 = vpack.c.bf16 %v3943_v31, %v3942_v29  ;;  %6311 = vmatprep.subr.bf16.mxu0 %v6536_v20  ;;  %v6315_v43 = vpack.c.bf16 %v3945_v38, %v3944_v37  ;;  %v6206_v52 = vpack.c.bf16 %v5049_v42, %v5047_v41  ;;  %v5078_v27 = vld [vmem:[%s9251_s7 + $0x2d8] sm:$0xff]  ;;  %v5080_v29 = vld [vmem:[%s9251_s7 + $0x2e8] sm:$0xff]  ;;  %v5077_v31 = vld [vmem:[%s9251_s7 + $0x2d0] sm:$0xff] }
 0x9f2   :  { %v6210_v57 = vpack.c.bf16 %v5053_v50, %v5051_v49  ;;  %v5084_v34 = vld [vmem:[%s9251_s7 + $0x308] sm:$0xff]  ;;  %v5086_v41 = vld [vmem:[%s9251_s7 + $0x318] sm:$0xff]  ;;  %v5087_v49 = vld [vmem:[%s9251_s7 + $0x320] sm:$0xff] }
 0x9f3   :  { %6313 = vmatpush1.bf16.msra.mxu0 %v6312_v36  ;;  %v6234_v36 = vpack.c.bf16 %v5080_v29, %v5078_v27  ;;  %v5088_v42 = vld [vmem:[%s9251_s7 + $0x328] sm:$0xff]  ;;  %v5090_v50 = vld [vmem:[%s9251_s7 + $0x338] sm:$0xff]  ;;  %v5112_v24 = vld [vmem:[%s9251_s7 + $0x3e0] sm:$0xff] }
 0x9f4   :  { %6185 = vmatpush1.bf16.msra.mxu1 %v6184_v58  ;;  %6314 = vmatprep.subr.bf16.mxu0 %v6536_v20  ;;  %v5050_v58 = vld [vmem:[%s9251_s7 + $0x200] sm:$0xff]  ;;  %v6242_v44 = vpack.c.bf16 %v5088_v42, %v5086_v41  ;;  %v5114_v25 = vld [vmem:[%s9251_s7 + $0x3f0] sm:$0xff] }
 0x9f5   :  { %6187 = vmatprep.subr.bf16.mxu1 %v6186_v59  ;;  %v5052_v59 = vld [vmem:[%s9251_s7 + $0x210] sm:$0xff]  ;;  %v6268_v27 = vpack.c.bf16 %v5114_v25, %v5112_v24  ;;  %v5124_v42 = vld [vmem:[%s9251_s7 + $0x440] sm:$0xff] }
 0x9f6   :  { %v6212_v0 = vpack.c.bf16 %v5052_v59, %v5050_v58  ;;  %v5094_v58 = vld [vmem:[%s9251_s7 + $0x358] sm:$0xff]  ;;  %v5096_v59 = vld [vmem:[%s9251_s7 + $0x368] sm:$0xff]  ;;  %v4033_v25 = vld [vmem:[%s9254_s10 + $0x60] sm:$0xff] }
 0x9f7   :  { %6316 = vmatpush1.bf16.msra.mxu0 %v6315_v43  ;;  %v6250_v61 = vpack.c.bf16 %v5096_v59, %v5094_v58  ;;  %v5132_v59 = vld [vmem:[%s9251_s7 + $0x480] sm:$0xff] }
 0x9f8   :  { %6189 = vmatpush1.bf16.msra.mxu1 %v6188_v13  ;;  %6317 = vmatprep.subr.bf16.mxu0 %v6536_v20  ;;  %v6216_v13 = vpack.c.bf16 %v5056_v63, %v5054_v2  ;;  %v5098_v2 = vld [vmem:[%s9251_s7 + $0x378] sm:$0xff]  ;;  %v5100_v63 = vld [vmem:[%s9251_s7 + $0x388] sm:$0xff] }
 0x9f9   :  { %6191 = vmatprep.subr.bf16.mxu1 %v6190_v10 }
 0x9fc   :  { %6193 = vmatpush1.bf16.msra.mxu1 %v6192_v12  ;;  %v5064_v12 = vld [vmem:[%s9251_s7 + $0x270] sm:$0xff] }
 0x9fd   :  { %6195 = vmatprep.subr.bf16.mxu1 %v6194_v21  ;;  %v5067_v21 = vld [vmem:[%s9251_s7 + $0x288] sm:$0xff]  ;;  %v6224_v16 = vpack.c.bf16 %v5064_v12, %v5062_v11  ;;  %v5106_v12 = vld [vmem:[%s9251_s7 + $0x3b8] sm:$0xff] }
 0x9fe   :  { %v6226_v17 = vpack.c.bf16 %v5069_v15, %v5067_v21  ;;  %v5109_v21 = vld [vmem:[%s9251_s7 + $0x3c8] sm:$0xff]  ;;  %v5111_v15 = vld [vmem:[%s9251_s7 + $0x3d8] sm:$0xff] }
 0xa00   :  { %6197 = vmatpush1.bf16.msra.mxu1 %v6196_v23  ;;  %v6228_v23 = vpack.c.bf16 %v5068_v19, %v5066_v18  ;;  %v5113_v18 = vld [vmem:[%s9251_s7 + $0x3e8] sm:$0xff]  ;;  %v5115_v19 = vld [vmem:[%s9251_s7 + $0x3f8] sm:$0xff] }
 0xa01   :  { %6199 = vmatprep.subr.bf16.mxu1 %v6198_v48  ;;  %v6230_v48 = vpack.c.bf16 %v5073_v30, %v5071_v22  ;;  %v5105_v22 = vld [vmem:[%s9251_s7 + $0x3b0] sm:$0xff]  ;;  %v6262_v30 = vpack.c.bf16 %v5111_v15, %v5109_v21  ;;  %v4026_v21 = vld [vmem:[%s9254_s10 + $0x28] sm:$0xff] }
 0xa04   :  { %6201 = vmatpush1.bf16.msra.mxu1 %v6200_v32  ;;  %v5079_v32 = vld [vmem:[%s9251_s7 + $0x2e0] sm:$0xff] }
 0xa05   :  { %6203 = vmatprep.subr.bf16.mxu1 %v6202_v33  ;;  %v5082_v33 = vld [vmem:[%s9251_s7 + $0x2f8] sm:$0xff]  ;;  %v6236_v37 = vpack.c.bf16 %v5079_v32, %v5077_v31  ;;  %v5116_v31 = vld [vmem:[%s9251_s7 + $0x400] sm:$0xff]  ;;  %v5118_v32 = vld [vmem:[%s9251_s7 + $0x410] sm:$0xff] }
 0xa06   :  { %v6238_v38 = vpack.c.bf16 %v5084_v34, %v5082_v33  ;;  %v5121_v33 = vld [vmem:[%s9251_s7 + $0x428] sm:$0xff]  ;;  %v6272_v34 = vpack.c.bf16 %v5118_v32, %v5116_v31  ;;  %v4037_v32 = vld [vmem:[%s9254_s10 + $0x80] sm:$0xff] }
 0xa08   :  { %6205 = vmatpush1.bf16.msra.mxu1 %v6204_v39  ;;  %v5081_v39 = vld [vmem:[%s9251_s7 + $0x2f0] sm:$0xff] }
 0xa09   :  { %3547 = vmatprep.subr.mxu1 %v3408_v40  ;;  %v5083_v40 = vld [vmem:[%s9251_s7 + $0x300] sm:$0xff] }
 0xa0a   :  { %v6240_v43 = vpack.c.bf16 %v5083_v40, %v5081_v39  ;;  %v5127_v39 = vld [vmem:[%s9251_s7 + $0x458] sm:$0xff] }
 0xa0c   :  { %3548 = vmatpush1.msra.mxu1 %v3407_v51  ;;  %v6244_v51 = vpack.c.bf16 %v5087_v49, %v5085_v45  ;;  %v5131_v45 = vld [vmem:[%s9251_s7 + $0x478] sm:$0xff] }
 0xa0d   :  { %5045 = vmatmul.mubr.msk.f32.vlgmr.msra.gmra.mrb[28].mxu1 %vm1123_vm9, %v8514_v28  ;;  %6207 = vmatprep.subr.bf16.mxu1 %v6206_v52  ;;  %v5061_v28 = vld [vmem:[%s9251_s7 + $0x258] sm:$0xff] }
 0xa0e   :  { %6209 = vmatpush1.bf16.msra.mxu1 %v6208_v56  ;;  %3689 = vmatprep.mubr.f32.mxu1 %v6534_v7  ;;  %v6218_v10 = vpack.c.bf16 %v5061_v28, %v5059_v3  ;;  %v5089_v56 = vld [vmem:[%s9251_s7 + $0x330] sm:$0xff]  ;;  %v6254_v28 = vpack.c.bf16 %v5100_v63, %v5098_v2  ;;  %v3947_v63 = vld [vmem:[%s9253_s9 + $0x98] sm:$0xff] }
 0xa0f   :  { %6211 = vmatprep.subr.bf16.mxu1 %v6210_v57  ;;  %v5091_v57 = vld [vmem:[%s9251_s7 + $0x340] sm:$0xff]  ;;  %v3946_v2 = vld [vmem:[%s9253_s9 + $0x90] sm:$0xff] }
 0xa10   :  { %v6248_v60 = vpack.c.bf16 %v5091_v57, %v5089_v56  ;;  %v5135_v56 = vld [vmem:[%s9251_s7 + $0x498] sm:$0xff] }
 0xa12   :  { %6213 = vmatpush1.bf16.msra.mxu1 %v6212_v0  ;;  %v5093_v0 = vld [vmem:[%s9251_s7 + $0x350] sm:$0xff] }
 0xa13   :  { %6215 = vmatprep.subr.bf16.mxu1 %v6214_v1  ;;  %v5095_v1 = vld [vmem:[%s9251_s7 + $0x360] sm:$0xff] }
 0xa14   :  { %v6252_v3 = vpack.c.bf16 %v5095_v1, %v5093_v0  ;;  %v5137_v0 = vld [vmem:[%s9251_s7 + $0x4a8] sm:$0xff]  ;;  %v5136_v1 = vld [vmem:[%s9251_s7 + $0x4a0] sm:$0xff] }
 0xa16   :  { %6217 = vmatpush1.bf16.msra.mxu1 %v6216_v13  ;;  %v5097_v13 = vld [vmem:[%s9251_s7 + $0x370] sm:$0xff] }
 0xa17   :  { %6219 = vmatprep.subr.bf16.mxu1 %v6218_v10  ;;  %v5099_v10 = vld [vmem:[%s9251_s7 + $0x380] sm:$0xff] }
 0xa18   :  { %v6256_v54 = vpack.c.bf16 %v5099_v10, %v5097_v13  ;;  %v4021_v10 = vld [vmem:[%s9254_s10] sm:$0xff] }
 0xa1a   :  { %6221 = vmatpush1.bf16.msra.mxu1 %v6220_v62  ;;  %v5101_v62 = vld [vmem:[%s9251_s7 + $0x390] sm:$0xff] }
 0xa1b   :  { %6223 = vmatprep.subr.bf16.mxu1 %v6222_v9  ;;  %v5103_v9 = vld [vmem:[%s9251_s7 + $0x3a0] sm:$0xff] }
 0xa1c   :  { %v6260_v11 = vpack.c.bf16 %v5103_v9, %v5101_v62  ;;  %v6321_v62 = vpack.c.bf16 %v4022_v46, %v4021_v10 }
 0xa1e   :  { %6225 = vmatpush1.bf16.msra.mxu1 %v6224_v16  ;;  %v5108_v16 = vld [vmem:[%s9251_s7 + $0x3c0] sm:$0xff] }
 0xa1f   :  { %6227 = vmatprep.subr.bf16.mxu1 %v6226_v17  ;;  %v5110_v17 = vld [vmem:[%s9251_s7 + $0x3d0] sm:$0xff] }
 0xa22   :  { %6229 = vmatpush1.bf16.msra.mxu1 %v6228_v23  ;;  %v6264_v23 = vpack.c.bf16 %v5110_v17, %v5108_v16  ;;  %v4027_v16 = vld [vmem:[%s9254_s10 + $0x30] sm:$0xff]  ;;  %v4028_v17 = vld [vmem:[%s9254_s10 + $0x38] sm:$0xff] }
 0xa23   :  { %6231 = vmatprep.subr.bf16.mxu1 %v6230_v48  ;;  %v6266_v48 = vpack.c.bf16 %v5115_v19, %v5113_v18  ;;  %v6330_v18 = vpack.c.bf16 %v4028_v17, %v4027_v16  ;;  %v4029_v19 = vld [vmem:[%s9254_s10 + $0x40] sm:$0xff]  ;;  %v5149_v16 = vld [vmem:[%s9257_s13 + $0x78] sm:$0xff] }
 0xa26   :  { %6233 = vmatpush1.bf16.msra.mxu1 %v6232_v8  ;;  %v5117_v8 = vld [vmem:[%s9251_s7 + $0x408] sm:$0xff] }
 0xa27   :  { %3653 = vmatprep.subr.mxu1 %v5075_v26  ;;  %v5119_v26 = vld [vmem:[%s9251_s7 + $0x418] sm:$0xff] }
 0xa28   :  { %v6270_v29 = vpack.c.bf16 %v5119_v26, %v5117_v8  ;;  %v4034_v8 = vld [vmem:[%s9254_s10 + $0x68] sm:$0xff] }
 0xa29   :  { %v6339_v26 = vpack.c.bf16 %v4034_v8, %v4033_v25  ;;  %v5156_v25 = vld [vmem:[%s9257_s13 + $0xa8] sm:$0xff] }
 0xa2a   :  { %3654 = vmatpush1.msra.mxu1 %v5074_v35 }
 0xa2b   :  { %5076 = vmatmul.mubr.msk.f32.vlgmr.msra.gmra.mrb[28].mxu1 %vm1123_vm9, %v8544_v53  ;;  %6235 = vmatprep.subr.bf16.mxu1 %v6234_v36  ;;  %v5092_v53 = vld [vmem:[%s9251_s7 + $0x348] sm:$0xff]  ;;  %v5120_v36 = vld [vmem:[%s9251_s7 + $0x420] sm:$0xff] }
 0xa2c   :  { %6237 = vmatpush1.bf16.msra.mxu1 %v6236_v37  ;;  %3797 = vmatprep.mubr.f32.mxu1 %v6534_v7  ;;  %v6246_v52 = vpack.c.bf16 %v5092_v53, %v5090_v50  ;;  %v5122_v37 = vld [vmem:[%s9251_s7 + $0x430] sm:$0xff]  ;;  %v5128_v53 = vld [vmem:[%s9251_s7 + $0x460] sm:$0xff] }
 0xa2d   :  { %6239 = vmatprep.subr.bf16.mxu1 %v6238_v38  ;;  %v5125_v38 = vld [vmem:[%s9251_s7 + $0x448] sm:$0xff]  ;;  %v6276_v40 = vpack.c.bf16 %v5122_v37, %v5120_v36 }
 0xa2e   :  { %v6278_v41 = vpack.c.bf16 %v5127_v39, %v5125_v38 }
 0xa30   :  { %6241 = vmatpush1.bf16.msra.mxu1 %v6240_v43  ;;  %v5126_v43 = vld [vmem:[%s9251_s7 + $0x450] sm:$0xff] }
 0xa31   :  { %6243 = vmatprep.subr.bf16.mxu1 %v6242_v44  ;;  %v5129_v44 = vld [vmem:[%s9251_s7 + $0x468] sm:$0xff]  ;;  %v6280_v49 = vpack.c.bf16 %v5126_v43, %v5124_v42  ;;  %v4112_v42 = vld [vmem:[%s9255_s11] sm:$0xf] }
 0xa32   :  { %v6282_v50 = vpack.c.bf16 %v5131_v45, %v5129_v44  ;;  %v4263_v43 = vld [vmem:[%s9257_s13] sm:$0xff]  ;;  %v4264_v44 = vld [vmem:[%s9257_s13 + $0x8] sm:$0xff] }
 0xa33   :  { %v4186_v45 = vld [vmem:[%s9256_s12] sm:$0xf] }
 0xa34   :  { %6245 = vmatpush1.bf16.msra.mxu1 %v6244_v51  ;;  %v5130_v51 = vld [vmem:[%s9251_s7 + $0x470] sm:$0xff] }
 0xa35   :  { %6247 = vmatprep.subr.bf16.mxu1 %v6246_v52  ;;  %v5133_v52 = vld [vmem:[%s9251_s7 + $0x488] sm:$0xff]  ;;  %v6284_v57 = vpack.c.bf16 %v5130_v51, %v5128_v53  ;;  %v4266_v53 = vld [vmem:[%s9257_s13 + $0x18] sm:$0xff] }
 0xa36   :  { %v6286_v58 = vpack.c.bf16 %v5135_v56, %v5133_v52  ;;  %v4267_v52 = vld [vmem:[%s9257_s13 + $0x20] sm:$0xff]  ;;  %v4268_v56 = vld [vmem:[%s9257_s13 + $0x28] sm:$0xff] }
 0xa38   :  { %6249 = vmatpush1.bf16.msra.mxu1 %v6248_v60  ;;  %v5134_v60 = vld [vmem:[%s9251_s7 + $0x490] sm:$0xff] }
 0xa39   :  { %6251 = vmatprep.subr.bf16.mxu1 %v6250_v61  ;;  %v6288_v61 = vpack.c.bf16 %v5134_v60, %v5132_v59  ;;  %v4270_v59 = vld [vmem:[%s9257_s13 + $0x38] sm:$0xff] }
 0xa3c   :  { %6253 = vmatpush1.bf16.msra.mxu1 %v6252_v3  ;;  %v6318_v3 = vpack.c.bf16 %v3947_v63, %v3946_v2  ;;  %v4600_v2 = vld [vmem:[%s9259_s15] sm:$0xff]  ;;  %v4601_v63 = vld [vmem:[%s9259_s15 + $0x8] sm:$0xff] }
 0xa3d   :  { %6255 = vmatprep.subr.bf16.mxu1 %v6254_v28 }
 0xa3e   :  { %6319 = vmatpush1.bf16.msra.mxu0 %v6318_v3  ;;  %v4602_v3 = vld [vmem:[%s9259_s15 + $0x10] sm:$0xff] }
 0xa3f   :  { %6320 = vmatprep.subr.bf16.mxu0 %v6536_v20 }
 0xa40   :  { %6257 = vmatpush1.bf16.msra.mxu1 %v6256_v54 }
 0xa41   :  { %6259 = vmatprep.subr.bf16.mxu1 %v6258_v4 }
 0xa44   :  { %6261 = vmatpush1.bf16.msra.mxu1 %v6260_v11  ;;  %v4023_v11 = vld [vmem:[%s9254_s10 + $0x10] sm:$0xff] }
 0xa45   :  { %3761 = vmatprep.subr.mxu1 %v5106_v12  ;;  %v4025_v12 = vld [vmem:[%s9254_s10 + $0x20] sm:$0xff] }
 0xa46   :  { %v6327_v15 = vpack.c.bf16 %v4026_v21, %v4025_v12  ;;  %v5147_v12 = vld [vmem:[%s9257_s13 + $0x68] sm:$0xff] }
 0xa48   :  { %3762 = vmatpush1.msra.mxu1 %v5105_v22  ;;  %v4030_v22 = vld [vmem:[%s9254_s10 + $0x48] sm:$0xff] }
 0xa49   :  { %5107 = vmatmul.mubr.msk.f32.vlgmr.msra.gmra.mrb[28].mxu1 %vm1123_vm9, %v8547_v55  ;;  %6263 = vmatprep.subr.bf16.mxu1 %v6262_v30  ;;  %v5123_v55 = vld [vmem:[%s9251_s7 + $0x438] sm:$0xff]  ;;  %v6333_v30 = vpack.c.bf16 %v4030_v22, %v4029_v19  ;;  %v5151_v19 = vld [vmem:[%s9257_s13 + $0x88] sm:$0xff] }
 0xa4a   :  { %6265 = vmatpush1.bf16.msra.mxu1 %v6264_v23  ;;  %3905 = vmatprep.mubr.f32.mxu1 %v6534_v7  ;;  %v6274_v35 = vpack.c.bf16 %v5123_v55, %v5121_v33  ;;  %v4031_v23 = vld [vmem:[%s9254_s10 + $0x50] sm:$0xff]  ;;  %v4038_v33 = vld [vmem:[%s9254_s10 + $0x88] sm:$0xff] }
 0xa4b   :  { %6267 = vmatprep.subr.bf16.mxu1 %v6266_v48  ;;  %v4032_v48 = vld [vmem:[%s9254_s10 + $0x58] sm:$0xff]  ;;  %v6345_v55 = vpack.c.bf16 %v4038_v33, %v4037_v32  ;;  %v5159_v32 = vld [vmem:[%s9257_s13 + $0xc0] sm:$0xff]  ;;  %v5160_v33 = vld [vmem:[%s9257_s13 + $0xc8] sm:$0xff] }
 0xa4c   :  { %v6336_v24 = vpack.c.bf16 %v4032_v48, %v4031_v23  ;;  %v5153_v23 = vld [vmem:[%s9257_s13 + $0x98] sm:$0xff] }
 0xa4e   :  { %6269 = vmatpush1.bf16.msra.mxu1 %v6268_v27  ;;  %v4035_v27 = vld [vmem:[%s9254_s10 + $0x70] sm:$0xff] }
 0xa4f   :  { %6271 = vmatprep.subr.bf16.mxu1 %v6270_v29  ;;  %v4036_v29 = vld [vmem:[%s9254_s10 + $0x78] sm:$0xff] }
 0xa50   :  { %v6342_v31 = vpack.c.bf16 %v4036_v29, %v4035_v27  ;;  %v5157_v27 = vld [vmem:[%s9257_s13 + $0xb0] sm:$0xff]  ;;  %v5158_v29 = vld [vmem:[%s9257_s13 + $0xb8] sm:$0xff] }
 0xa52   :  { %6273 = vmatpush1.bf16.msra.mxu1 %v6272_v34  ;;  %v4039_v34 = vld [vmem:[%s9254_s10 + $0x90] sm:$0xff] }
 0xa53   :  { %6275 = vmatprep.subr.bf16.mxu1 %v6274_v35  ;;  %v4040_v35 = vld [vmem:[%s9254_s10 + $0x98] sm:$0xff] }
 0xa54   :  { %v6348_v36 = vpack.c.bf16 %v4040_v35, %v4039_v34  ;;  %v5161_v34 = vld [vmem:[%s9257_s13 + $0xd0] sm:$0xff]  ;;  %v5162_v35 = vld [vmem:[%s9257_s13 + $0xd8] sm:$0xff] }
 0xa56   :  { %6277 = vmatpush1.bf16.msra.mxu1 %v6276_v40 }
 0xa57   :  { %6279 = vmatprep.subr.bf16.mxu1 %v6278_v41 }
 0xa5a   :  { %6281 = vmatpush1.bf16.msra.mxu1 %v6280_v49  ;;  %v6351_v49 = vpack.c.bf16 %v4264_v44, %v4263_v43  ;;  %v5168_v44 = vld [vmem:[%s9257_s13 + $0x100] sm:$0xff] }
 0xa5b   :  { %6283 = vmatprep.subr.bf16.mxu1 %v6282_v50  ;;  %v4265_v50 = vld [vmem:[%s9257_s13 + $0x10] sm:$0xff] }
 0xa5c   :  { %v6354_v51 = vpack.c.bf16 %v4266_v53, %v4265_v50  ;;  %v5170_v50 = vld [vmem:[%s9257_s13 + $0x110] sm:$0xff]  ;;  %v5171_v53 = vld [vmem:[%s9257_s13 + $0x118] sm:$0xff] }
 0xa5e   :  { %6285 = vmatpush1.bf16.msra.mxu1 %v6284_v57  ;;  %v6357_v57 = vpack.c.bf16 %v4268_v56, %v4267_v52  ;;  %v5172_v52 = vld [vmem:[%s9257_s13 + $0x120] sm:$0xff]  ;;  %v5173_v56 = vld [vmem:[%s9257_s13 + $0x128] sm:$0xff] }
 0xa5f   :  { %6287 = vmatprep.subr.bf16.mxu1 %v6286_v58  ;;  %v4269_v58 = vld [vmem:[%s9257_s13 + $0x30] sm:$0xff] }
 0xa60   :  { %v6360_v60 = vpack.c.bf16 %v4270_v59, %v4269_v58  ;;  %v5174_v58 = vld [vmem:[%s9257_s13 + $0x130] sm:$0xff]  ;;  %v5175_v59 = vld [vmem:[%s9257_s13 + $0x138] sm:$0xff] }
 0xa62   :  { %6289 = vmatpush1.bf16.msra.mxu1 %v6288_v61  ;;  %v4271_v61 = vld [vmem:[%s9257_s13 + $0x40] sm:$0xff] }
 0xa63   :  { %3869 = vmatprep.subr.mxu1 %v5137_v0  ;;  %v4272_v0 = vld [vmem:[%s9257_s13 + $0x48] sm:$0xff] }
 0xa66   :  { %3870 = vmatpush1.msra.mxu1 %v5136_v1  ;;  %v6363_v1 = vpack.c.bf16 %v4272_v0, %v4271_v61  ;;  %v4604_v0 = vld [vmem:[%s9259_s15 + $0x20] sm:$0xff] }
 0xa67   :  { %5138 = vmatmul.mubr.msk.f32.vlgmr.msra.gmra.mrb[28].mxu1 %vm1123_vm9, %v8550_v6  ;;  %6410 = vmatprep.subr.bf16.mxu1 %v6536_v20  ;;  %v3914_v6 = vld [vmem:[%s9252_s8] sm:$0x3] }
 0xa68   :  { %5582 = vmatprep.mubr.msk.f32.mxu1 %vm6537_vm11, %v6534_v7  ;;  %v3923_v28 = vrot.slane %v3914_v6, %v7066_v14  ;;  %v3919_v13 = vrot.slane %v3914_v6, %v7071_v5  ;;  %v4024_v14 = vld [vmem:[%s9254_s10 + $0x18] sm:$0xff]  ;;  %v6411_v6 = vpack.c.bf16 %v4601_v63, %v4600_v2  ;;  %v4262_v63 = vld [vmem:[%s9258_s14] sm:$0x1]  ;;  %s6538_s14 = smov [#allocation2]  }
 0xa69   :  { %v6324_v5 = vpack.c.bf16 %v4024_v14, %v4023_v11 }
 0xa6a   :  { %6412 = vmatpush3.bf16.msra.mxu1 %v6411_v6 }
 0xa6b   :  { %6413 = vmatprep.subr.bf16.mxu1 %v6536_v20 }
 0xb3a   :  { %v3907_v47 = vpop.f32.mrb[28].mxu1 }
 0xb3b   :  { %v3909_v54 = vpop.f32.mrb[29].mxu1  ;;  %v3926_v9 = vadd.f32 %v3919_v13, %v3907_v47  ;;  %v5144_v47 = vld [vmem:[%s9257_s13 + $0x50] sm:$0xff] }
 0xb3c   :  { %v3927_v4 = vadd.f32 %v3923_v28, %v3909_v54  ;;  %v4603_v28 = vld [vmem:[%s9259_s15 + $0x18] sm:$0xff] }
 0xb3d   :  { %v6414_v13 = vpack.c.bf16 %v4603_v28, %v4602_v3  ;;  %v5145_v54 = vld [vmem:[%s9257_s13 + $0x58] sm:$0xff] }
 0xb3e   :  { %5139 = vmatprep.mubr.msk.f32.mxu0 %vm1631_vm10, %v3927_v4  ;;  %v6366_v11 = vpack.c.bf16 %v5145_v54, %v5144_v47 }
 0xb3f   :  { %4016 = vmatmul.mubr.f32.vlgmr.msra.gmra.mrb[30].mxu0 %v3926_v9  ;;  %6415 = vmatpush3.bf16.msra.mxu1 %v6414_v13 }
 0xb40   :  { %6322 = vmatpush1.bf16.msra.mxu0 %v6321_v62  ;;  %5140 = vmatprep.mubr.msk.f32.mxu0 %vm1631_vm10, %v3927_v4 }
 0xb41   :  { %6323 = vmatprep.subr.bf16.mxu0 %v6536_v20  ;;  %6416 = vmatprep.subr.bf16.mxu1 %v6536_v20 }
 0xb44   :  { %6325 = vmatpush1.bf16.msra.mxu0 %v6324_v5  ;;  %v5146_v5 = vld [vmem:[%s9257_s13 + $0x60] sm:$0xff] }
 0xb45   :  { %6326 = vmatprep.subr.bf16.mxu0 %v6536_v20  ;;  %v6369_v21 = vpack.c.bf16 %v5147_v12, %v5146_v5 }
 0xb48   :  { %6328 = vmatpush1.bf16.msra.mxu0 %v6327_v15  ;;  %v5148_v15 = vld [vmem:[%s9257_s13 + $0x70] sm:$0xff] }
 0xb49   :  { %6329 = vmatprep.subr.bf16.mxu0 %v6536_v20  ;;  %v6372_v17 = vpack.c.bf16 %v5149_v16, %v5148_v15 }
 0xb4c   :  { %6331 = vmatpush1.bf16.msra.mxu0 %v6330_v18  ;;  %v5150_v18 = vld [vmem:[%s9257_s13 + $0x80] sm:$0xff] }
 0xb4d   :  { %6332 = vmatprep.subr.bf16.mxu0 %v6536_v20  ;;  %v6375_v22 = vpack.c.bf16 %v5151_v19, %v5150_v18 }
 0xb50   :  { %6334 = vmatpush1.bf16.msra.mxu0 %v6333_v30  ;;  %v5152_v30 = vld [vmem:[%s9257_s13 + $0x90] sm:$0xff] }
 0xb51   :  { %6335 = vmatprep.subr.bf16.mxu0 %v6536_v20  ;;  %v6378_v48 = vpack.c.bf16 %v5153_v23, %v5152_v30 }
 0xb54   :  { %6337 = vmatpush1.bf16.msra.mxu0 %v6336_v24  ;;  %v5155_v24 = vld [vmem:[%s9257_s13 + $0xa0] sm:$0xff] }
 0xb55   :  { %6338 = vmatprep.subr.bf16.mxu0 %v6536_v20  ;;  %v6381_v8 = vpack.c.bf16 %v5156_v25, %v5155_v24 }
 0xb58   :  { %6340 = vmatpush1.bf16.msra.mxu0 %v6339_v26 }
 0xb59   :  { %6341 = vmatprep.subr.bf16.mxu0 %v6536_v20 }
 0xb5c   :  { %6343 = vmatpush1.bf16.msra.mxu0 %v6342_v31  ;;  %v6384_v31 = vpack.c.bf16 %v5158_v29, %v5157_v27 }
 0xb5d   :  { %6344 = vmatprep.subr.bf16.mxu0 %v6536_v20 }
 0xb60   :  { %6346 = vmatpush1.bf16.msra.mxu0 %v6345_v55  ;;  %v6387_v55 = vpack.c.bf16 %v5160_v33, %v5159_v32 }
 0xb61   :  { %6347 = vmatprep.subr.bf16.mxu0 %v6536_v20 }
 0xb64   :  { %6349 = vmatpush1.bf16.msra.mxu0 %v6348_v36  ;;  %v6390_v36 = vpack.c.bf16 %v5162_v35, %v5161_v34 }
 0xb65   :  { %5466 = vmatprep.subr.mxu0 %v6534_v7 }
 0xb67   :  { %4106 = vmatmul.mubr.f32.vlgmr.msra.gmra.mrb[32].mxu0 %v3926_v9 }
 0xb68   :  { %5468 = vmatprep.mubr.msk.f32.mxu0 %vm6537_vm11, %v6534_v7 }
 0xc12   :  { %v4017_v37 = vpop.f32.mrb[30].mxu0 }
 0xc13   :  { %v4019_v38 = vpop.f32.mrb[31].mxu0 }
 0xc14   :  { %v5164_v38 = vld [vmem:[%s9257_s13 + $0xe8] sm:$0xff] }
 0xc3a   :  { %v4107_v39 = vpop.f32.mrb[32].mxu0 }
 0xc3b   :  { %v4111_v40 = vmax.f32 %v4017_v37, %v4107_v39  ;;  %v4109_v41 = vpop.f32.mrb[33].mxu0  ;;  %v5163_v37 = vld [vmem:[%s9257_s13 + $0xe0] sm:$0xff] }
 0xc3c   :  { %v6393_v39 = vpack.c.bf16 %v5164_v38, %v5163_v37  ;;  %v5167_v41 = vld [vmem:[%s9257_s13 + $0xf8] sm:$0xff] }
 0xc3d   :  { %5467 = vmatpush3.msra.mxu0 %v4111_v40 }
 0xc3e   :  { %5469 = vmatmul.mubr.msk.f32.vlgmr.msra.gmra.mrb[34].mxu0 %vm1797_vm12, %v4112_v42  ;;  %5471 = vmatprep.subr.mxu0 %v6534_v7 }
 0xc3f   :  { %5472 = vmatpush3.msra.mxu0 %v4111_v40  ;;  %5473 = vmatprep.mubr.msk.f32.mxu0 %vm6537_vm11, %v6534_v7  ;;  %v5166_v40 = vld [vmem:[%s9257_s13 + $0xf0] sm:$0xff] }
 0xc40   :  { %6350 = vmatprep.subr.bf16.mxu0 %v6536_v20  ;;  %v6396_v42 = vpack.c.bf16 %v5167_v41, %v5166_v40 }
 0xc42   :  { %5474 = vmatmul.mubr.msk.f32.vlgmr.msra.gmra.mrb[36].mxu0 %vm1797_vm12, %v4186_v45  ;;  %v5169_v45 = vld [vmem:[%s9257_s13 + $0x108] sm:$0xff] }
 0xc43   :  { %6352 = vmatpush3.bf16.msra.mxu0 %v6351_v49  ;;  %5496 = vmatprep.mubr.msk.f32.mxu0 %vm6537_vm11, %v6534_v7  ;;  %v6399_v49 = vpack.c.bf16 %v5169_v45, %v5168_v44 }
 0xc44   :  { %6353 = vmatprep.subr.bf16.mxu0 %v6536_v20 }
 0xc47   :  { %6355 = vmatpush3.bf16.msra.mxu0 %v6354_v51  ;;  %v6402_v51 = vpack.c.bf16 %v5171_v53, %v5170_v50 }
 0xc48   :  { %6356 = vmatprep.subr.bf16.mxu0 %v6536_v20 }
 0xc4b   :  { %6358 = vmatpush3.bf16.msra.mxu0 %v6357_v57  ;;  %v6405_v57 = vpack.c.bf16 %v5173_v56, %v5172_v52 }
 0xc4c   :  { %6359 = vmatprep.subr.bf16.mxu0 %v6536_v20 }
 0xc4f   :  { %6361 = vmatpush3.bf16.msra.mxu0 %v6360_v60  ;;  %v6408_v60 = vpack.c.bf16 %v5175_v59, %v5174_v58 }
 0xc50   :  { %6362 = vmatprep.subr.bf16.mxu0 %v6536_v20 }
 0xc53   :  { %6364 = vmatpush3.bf16.msra.mxu0 %v6363_v1  ;;  %v4605_v1 = vld [vmem:[%s9259_s15 + $0x28] sm:$0xff] }
 0xc54   :  { %6365 = vmatprep.subr.bf16.mxu0 %v6536_v20  ;;  %v6417_v2 = vpack.c.bf16 %v4605_v1, %v4604_v0 }
 0xc56   :  { %6418 = vmatpush3.bf16.msra.mxu1 %v6417_v2 }
 0xc57   :  { %5580 = vmatprep.subr.mxu1 %v6534_v7 }
 0xd11   :  { %v4182_v10 = vpop.f32.mrb[34].mxu0 }
 0xd12   :  { %v5470_v46 = vpop.f32.mrb[35].mxu0 }
 0xd15   :  { %v4256_v4 = vpop.f32.mrb[36].mxu0 }
 0xd16   :  { %v4260_v62 = vmax.f32 %v4182_v10, %v4256_v4  ;;  %v5475_v9 = vpop.f32.mrb[37].mxu0 }
 0xd18   :  { %v9097_v14 = vmax.f32 %v4260_v62, 0.0 }
 0xd1a   :  { %5497 = vmatmul.mubr.msk.f32.vlgmr.msra.gmra.mrb[38].mxu0 %vm1958_vm13, %v9097_v14  ;;  %v4357_v26 = vrot.slane %v9097_v14, 1  ;;  %v4441_v43 = vrot.slane %v9097_v14, 2  ;;  %v4525_v61 = vrot.slane %v9097_v14, 3 }
 0xd1b   :  { %6367 = vmatpush3.bf16.msra.mxu0 %v6366_v11  ;;  %5519 = vmatprep.mubr.msk.f32.mxu0 %vm6537_vm11, %v6534_v7 }
 0xd1c   :  { %6368 = vmatprep.subr.bf16.mxu0 %v6536_v20 }
 0xd1f   :  { %6370 = vmatpush3.bf16.msra.mxu0 %v6369_v21 }
 0xd20   :  { %6371 = vmatprep.subr.bf16.mxu0 %v6536_v20 }
 0xd23   :  { %6373 = vmatpush3.bf16.msra.mxu0 %v6372_v17 }
 0xd24   :  { %6374 = vmatprep.subr.bf16.mxu0 %v6536_v20 }
 0xd27   :  { %6376 = vmatpush3.bf16.msra.mxu0 %v6375_v22 }
 0xd28   :  { %6377 = vmatprep.subr.bf16.mxu0 %v6536_v20 }
 0xd2b   :  { %6379 = vmatpush3.bf16.msra.mxu0 %v6378_v48 }
 0xd2c   :  { %6380 = vmatprep.subr.bf16.mxu0 %v6536_v20 }
 0xd2e   :  { %5520 = vmatmul.mubr.msk.f32.vlgmr.msra.gmra.mrb[38].mxu0 %vm1958_vm13, %v4357_v26 }
 0xd2f   :  { %6382 = vmatpush3.bf16.msra.mxu0 %v6381_v8  ;;  %5542 = vmatprep.mubr.msk.f32.mxu0 %vm6537_vm11, %v6534_v7 }
 0xd30   :  { %6383 = vmatprep.subr.bf16.mxu0 %v6536_v20 }
 0xd33   :  { %6385 = vmatpush3.bf16.msra.mxu0 %v6384_v31 }
 0xd34   :  { %6386 = vmatprep.subr.bf16.mxu0 %v6536_v20 }
 0xd37   :  { %6388 = vmatpush3.bf16.msra.mxu0 %v6387_v55 }
 0xd38   :  { %6389 = vmatprep.subr.bf16.mxu0 %v6536_v20 }
 0xd3b   :  { %6391 = vmatpush3.bf16.msra.mxu0 %v6390_v36 }
 0xd3c   :  { %6392 = vmatprep.subr.bf16.mxu0 %v6536_v20 }
 0xd3f   :  { %6394 = vmatpush3.bf16.msra.mxu0 %v6393_v39 }
 0xd40   :  { %6395 = vmatprep.subr.bf16.mxu0 %v6536_v20 }
 0xd42   :  { %5543 = vmatmul.mubr.msk.f32.vlgmr.msra.gmra.mrb[38].mxu0 %vm1958_vm13, %v4441_v43 }
 0xd43   :  { %6397 = vmatpush3.bf16.msra.mxu0 %v6396_v42  ;;  %5565 = vmatprep.mubr.msk.f32.mxu0 %vm6537_vm11, %v6534_v7  ;;  %v4607_v7 = vld [vmem:[%s9260_s16] sm:$0x1] }
 0xd44   :  { %6398 = vmatprep.subr.bf16.mxu0 %v6536_v20 }
 0xd47   :  { %6400 = vmatpush3.bf16.msra.mxu0 %v6399_v49 }
 0xd48   :  { %6401 = vmatprep.subr.bf16.mxu0 %v6536_v20 }
 0xd4b   :  { %6403 = vmatpush3.bf16.msra.mxu0 %v6402_v51 }
 0xd4c   :  { %6404 = vmatprep.subr.bf16.mxu0 %v6536_v20 }
 0xd4f   :  { %6406 = vmatpush3.bf16.msra.mxu0 %v6405_v57 }
 0xd50   :  { %6407 = vmatprep.subr.bf16.mxu0 %v6536_v20  ;;  %v4606_v20 = vld [vmem:[%s9259_s15 + $0x30] sm:$0x3]  ;;  %s4703_s15 = sshll.u32 %s6538_s14, 4  ;;  %s4704_s15 = int_to_ptr.vmem [resolvable:$true] %s4703_s15 }
 0xd51   :  { %5581 = vmatpush3.msk.msra.mxu1 %vm2301_vm14, %v4606_v20  ;;  %s6510_s16 = scalar_lea.vmem %s4704_s15, 32  ;;  %p6515_p1 = scmp.lt.s32.totalorder %s4704_s15, %s4704_s15 }
 0xd52   :  { %p6511_p0 = scmp.ne.s32.totalorder %s4704_s15, %s6510_s16  ;;  %p6516_p2 = scmp.lt.s32.totalorder %s6510_s16, %s6510_s16 }
 0xd53   :  { %6409 = vmatpush3.bf16.msra.mxu0 %v6408_v60 }
 0xd54   :  { %p6517_p3 = por %p6516_p2, %p6515_p1 }
 0xd56   :  { %5566 = vmatmul.mubr.msk.f32.vlgmr.msra.gmra.mrb[38].mxu0 %vm1958_vm13, %v4525_v61  ;;  %p6518_p4 = pnand %p6517_p3, %p6511_p0 }
 0xe29   :  { %v4594_v3 = vpop.f32.mrb[38].mxu0 }
 0xe2a   :  { %v6420_v6 = vadd.f32 %v4594_v3, %v4262_v63  ;;  %v5567_v28 = vpop.f32.mrb[39].mxu0 }
 0xe2c   :  { %v4599_v13 = vmax.f32 %v6420_v6, 0.0 }
 0xe2e   :  { %5583 = vmatmul.mubr.msk.f32.vlgmr.msra.gmra.mrb[30].mxu1 %vm2297_vm15, %v4599_v13 }
 0xf01   :  { %v4680_v10 = vpop.f32.mrb[30].mxu1 }
 0xf02   :  { %v4681_v46 = vadd.f32 %v4680_v10, %v4607_v7  ;;  %v5584_v47 = vpop.f32.mrb[31].mxu1 }
 0xf04   :  { %v4684_v54 = vsel %vm2375_vm1, %v4681_v46, -inf }
 0xf05   :  { %4685 = vmax.xlane.f32.xlu0 %v4684_v54 }
 0xf92   :  { %v4686_v4 = vpop.xlane.xlu0 %4685 }
 0xf93   :  { %v4687_v62 = vsub.f32 %v4681_v46, %v4686_v4 }
 0xf95   :  { %v4688_v9 = vmul.f32 1.442695, %v4687_v62 }
 0xf97   :  { %6506 = vpow2.f32 %v4688_v9 }
 0xfa1   :  { %v6507_v11 = vpop.eup %6506 }
 0xfa2   :  { %v4690_v14 = vsel %vm2375_vm1, %v6507_v11, 0.0 }
 0xfa3   :  { %4691 = vadd.xlane.f32.xlu1 %v4690_v14 }
0x1030   :  { %v4692_v5 = vpop.xlane.xlu1 %4691 }
0x1031   :  { %6508 = vlog2.f32 %v4692_v5 }
0x103b   :  { %v6509_v12 = vpop.eup %6508 }
0x103c   :  { %v4694_v21 = vmul.f32 0.6931472, %v6509_v12 }
0x103e   :  { %v4695_v15 = vsub.f32 %v4687_v62, %v4694_v21 }
0x1040   :  { %4696 = vst.msk [vmem:[#allocation2 + $0x1] sm:$0x1] %vm2375_vm1, %v4695_v15 }
0x1041   :  { %6521 = shalt.err (!%p6518_p4)
}
0x1042   :  { %s6522_s21 = scalar_lea.hbm %s9261_s17, 32 }
0x1043   :  { %p6523_p5 = scmp.ne.s32.totalorder %s9261_s17, %s6522_s21  ;;  %p6526_p6 = scmp.lt.u32.totalorder %s6522_s21, %s9261_s17 }
0x1045   :  { %p6528_p7 = pnand %p6526_p6, %p6523_p5 }
0x1047   :  { %6531 = shalt.err (!%p6528_p7)
}
0x1048   :  { %4706 = dma.vmem_to_hbm [thread:$0]  %s4704_s15, 32, %s9261_s17, [#allocation3]  }
0x1049   :  { %6532 = dma.done.wait [#allocation3], 32  }
0x104a   :  { %6533 = vsyncadd [#allocation3], 4294967264 }
0x104b   :  { %4710 = vsyncpa [#allocation3], 1 }

</bundles_post_ra>
